<compile_context>
chip_gen: v5e
topology: v5e:2x2
jax: 0.10.0
libtpu: 0.0.40
codegen_flags: <defaults>
</compile_context>

<pallas_src>
import math

import jax
import jax.numpy as jnp
import numpy as np
from jax.experimental import pallas as pl
from jax.experimental.pallas import tpu as pltpu

_MB = 1024 * 1024


# ----------------------------- Pallas kernel -------------------------------

def _mlp_kernel(x_ref, w1_ref, b1_ref, w2_ref, b2_ref, o_ref, h_ref):
    """y = relu(x @ W1 + b1) @ W2 + b2   (dropout = identity, eval mode)."""
    x = x_ref[...].astype(w1_ref.dtype)                                   # bf16 MXU input
    h = jnp.dot(x, w1_ref[...], preferred_element_type=jnp.float32) + b1_ref[...]
    h_ref[...] = jnp.maximum(h, 0.0).astype(h_ref.dtype)                  # ReLU (f32) -> bf16 VMEM scratch
    # TODO(synk): training-mode dropout: pltpu.prng_seed + pltpu.stateful_bernoulli
    # mask on h_ref plus 1/(1-p) scaling.
    y = jnp.dot(h_ref[...], w2_ref[...], preferred_element_type=jnp.float32) + b2_ref[...]
    o_ref[...] = y.astype(o_ref.dtype)


# ------------------------------ tiling helpers ------------------------------

def _round_up(v, m):
    return ((v + m - 1) // m) * m


def _vmem_bytes(tm, n_units, hidden, weight_bufs):
    """Rough per-step VMEM footprint (bytes)."""
    weights = weight_bufs * 2 * n_units * hidden * 2     # W1 + W2 (bf16)
    biases = weight_bufs * (hidden + n_units) * 4        # f32
    x_io = 2 * tm * n_units * 4                          # x tile, double-buffered f32
    y_io = 2 * tm * n_units * 4                          # out tile, double-buffered f32
    h = tm * hidden * 2                                  # bf16 hidden scratch
    return weights + biases + x_io + y_io + h


def _choose_row_tile(m, n_units, hidden, row_tile):
    """Big tile to amortize step overhead, bounded by VMEM, >= 2 steps when large."""
    m8 = _round_up(max(m, 1), 8)
    tm = min(row_tile, m8)
    # Keep >= 2 grid steps when the problem is big enough (v7x megacore).
    if m8 >= 1024 and m8 // tm < 2:
        tm = _round_up((m8 + 1) // 2, 8)
    # Shrink until the pessimistic (double-buffered-weights) footprint fits a
    # v7x-safe 44 MiB budget.
    while tm > 8 and _vmem_bytes(tm, n_units, hidden, weight_bufs=2) > 44 * _MB:
        tm = max(8, _round_up(tm // 2, 8))
    m_pad = _round_up(m8, tm)
    return tm, m_pad


# ------------------------------- pallas_call builder -------------------------

def _build_mlp_call(m_pad, tm, n_units, hidden, single_buffer_weights):
    grid = (m_pad // tm,)

    resident_kwargs = {}
    if single_buffer_weights and hasattr(pl, "Buffered"):
        # Constant-index weights never change block -> one VMEM buffer suffices.
        resident_kwargs = dict(pipeline_mode=pl.Buffered(1))

    weight_bufs = 1 if single_buffer_weights else 2
    needed = _vmem_bytes(tm, n_units, hidden, weight_bufs)
    # Cap at 48 MiB (v7x has 64 MiB physical per TC; leave Mosaic headroom).
    vmem_limit = int(min(48 * _MB, max(32 * _MB, needed + 12 * _MB)))

    flops = 4 * m_pad * n_units * hidden                      # two GEMMs, 2*M*N*K each
    bytes_accessed = (2 * n_units * hidden * 2                # bf16 weights (read once)
                      + (hidden + n_units) * 4                # biases
                      + 2 * m_pad * n_units * 4)              # x read + y write (f32)

    return pl.pallas_call(
        _mlp_kernel,
        out_shape=jax.ShapeDtypeStruct((m_pad, n_units), jnp.float32),
        grid_spec=pltpu.PrefetchScalarGridSpec(
            num_scalar_prefetch=0,
            grid=grid,
            in_specs=[
                pl.BlockSpec((tm, n_units), lambda i: (i, 0)),                         # x rows (streamed)
                pl.BlockSpec((n_units, hidden), lambda i: (0, 0), **resident_kwargs),  # W1 (VMEM resident)
                pl.BlockSpec((1, hidden), lambda i: (0, 0), **resident_kwargs),        # b1
                pl.BlockSpec((hidden, n_units), lambda i: (0, 0), **resident_kwargs),  # W2 (VMEM resident)
                pl.BlockSpec((1, n_units), lambda i: (0, 0), **resident_kwargs),       # b2
            ],
            out_specs=pl.BlockSpec((tm, n_units), lambda i: (i, 0)),                   # lane-dense stores
            scratch_shapes=[pltpu.VMEM((tm, hidden), jnp.bfloat16)],                   # hidden activation
        ),
        compiler_params=pltpu.CompilerParams(
            dimension_semantics=("parallel",),    # independent row tiles -> megacore shard
            vmem_limit_bytes=vmem_limit,
        ),
        cost_estimate=pl.CostEstimate(
            flops=flops, transcendentals=0, bytes_accessed=bytes_accessed),
    )


# --------------------------------- wrapper -----------------------------------

def mlp_forward(params, x, *, row_tile=1024):
    """x: (..., n_units) f32  ->  (..., n_units) f32."""
    orig_shape = x.shape
    n_units = orig_shape[-1]
    x2 = x.reshape(-1, n_units)
    m = x2.shape[0]

    w1, b1, w2, b2 = params["w1"], params["b1"], params["w2"], params["b2"]
    hidden = w1.shape[1]
    # TODO(synk): for very large n_units (resident weights > ~40 MiB) a K-tiled
    # "arbitrary" reduction grid with a VMEM f32 accumulator is needed on v7x
    # (64 MiB VMEM); this resident-weight design assumes the weights fit.

    tm, m_pad = _choose_row_tile(m, n_units, hidden, row_tile)
    if m_pad != m:
        x2 = jnp.pad(x2, ((0, m_pad - m), (0, 0)))

    out = None
    last_err = None
    for single_buf in (True, False):
        try:
            call = _build_mlp_call(m_pad, tm, n_units, hidden, single_buf)
            out = call(x2, w1, b1, w2, b2)
            break
        except Exception as e:  # fall back to default double-buffered specs
            last_err = e
    if out is None:
        raise last_err

    if m_pad != m:
        out = out[:m]
    return out.reshape(orig_shape)


# ------------------------------ parameter init ------------------------------

def init_mlp_params(key, n_units, hidden=2048):
    """PyTorch nn.Linear-style init: U(-1/sqrt(fan_in), 1/sqrt(fan_in)).

    Weights stored transposed (in_features, out_features) so the kernel computes
    y = x @ W + b (== PyTorch's x @ W.T + b).  Weights in bf16 for the MXU;
    biases in f32 (added after f32 accumulation).
    """
    k1, k2, k3, k4 = jax.random.split(key, 4)
    bw1 = 1.0 / math.sqrt(n_units)
    bw2 = 1.0 / math.sqrt(hidden)
    w1 = jax.random.uniform(k1, (n_units, hidden), jnp.float32, -bw1, bw1)
    b1 = jax.random.uniform(k2, (1, hidden), jnp.float32, -bw1, bw1)
    w2 = jax.random.uniform(k3, (hidden, n_units), jnp.float32, -bw2, bw2)
    b2 = jax.random.uniform(k4, (1, n_units), jnp.float32, -bw2, bw2)
    return {
        "w1": w1.astype(jnp.bfloat16),
        "b1": b1,
        "w2": w2.astype(jnp.bfloat16),
        "b2": b2,
    }


# ------------------------- pure-JAX reference (check) ------------------------

def mlp_ref(params, x):
    """Mirrors the kernel's numerics (bf16 MXU inputs, f32 accumulation)."""
    xb = x.astype(jnp.bfloat16).astype(jnp.float32)
    w1 = params["w1"].astype(jnp.float32)
    w2 = params["w2"].astype(jnp.float32)
    h = jnp.maximum(xb @ w1 + params["b1"], 0.0)
    hb = h.astype(jnp.bfloat16).astype(jnp.float32)
    return hb @ w2 + params["b2"]


# ---------------------------------- main ------------------------------------

if __name__ == "__main__":
    # Small shapes consistent with the module's forward: x: (batch, seq, n_units).
    batch, seq, n_units, hidden = 2, 8, 128, 2048

    key = jax.random.PRNGKey(0)
    k_params, k_x = jax.random.split(key)

    params = init_mlp_params(k_params, n_units, hidden)
    x = jax.random.normal(k_x, (batch, seq, n_units), jnp.float32)

    y = mlp_forward(params, x)
    jax.block_until_ready(y)

    assert y.shape == (batch, seq, n_units)
    y_ref = mlp_ref(params, x.reshape(-1, n_units)).reshape(batch, seq, n_units)
    np.testing.assert_allclose(np.asarray(y), np.asarray(y_ref), rtol=2e-2, atol=2e-2)

    print("KERNEL_OK")
</pallas_src>

<mosaic_0001>
module attributes {stable_mosaic.version = 11 : i64} {
  func.func @_mlp_kernel(%arg0: i32, %arg1: memref<16x128xf32, #tpu.memory_space<vmem>>, %arg2: memref<128x2048xbf16, #tpu.memory_space<vmem>>, %arg3: memref<1x2048xf32, #tpu.memory_space<vmem>>, %arg4: memref<2048x128xbf16, #tpu.memory_space<vmem>>, %arg5: memref<1x128xf32, #tpu.memory_space<vmem>>, %arg6: memref<16x128xf32, #tpu.memory_space<vmem>>, %arg7: memref<16x2048xbf16, #tpu.memory_space<vmem>>) attributes {dimension_semantics = [#tpu.dimension_semantics<parallel>], iteration_bounds = array<i64: 1>, scalar_prefetch = 0 : i64, scratch_operands = 1 : i64, tpu.core_type = #tpu.core_type<tc>, window_params = [{transform_indices = @transform_0, window_bounds = array<i64: 16, 128>}, {pipeline_mode = #tpu.pipeline_mode<synchronous>, transform_indices = @transform_1, window_bounds = array<i64: 128, 2048>}, {pipeline_mode = #tpu.pipeline_mode<synchronous>, transform_indices = @transform_2, window_bounds = array<i64: 1, 2048>}, {pipeline_mode = #tpu.pipeline_mode<synchronous>, transform_indices = @transform_3, window_bounds = array<i64: 2048, 128>}, {pipeline_mode = #tpu.pipeline_mode<synchronous>, transform_indices = @transform_4, window_bounds = array<i64: 1, 128>}, {transform_indices = @transform_5, window_bounds = array<i64: 16, 128>}]} {
    %c0 = arith.constant 0 : index
    %c0_0 = arith.constant 0 : index
    %0 = vector.load %arg1[%c0, %c0_0] : memref<16x128xf32, #tpu.memory_space<vmem>>, vector<16x128xf32>
    %1 = arith.truncf %0 : vector<16x128xf32> to vector<16x128xbf16>
    %c0_1 = arith.constant 0 : index
    %c0_2 = arith.constant 0 : index
    %2 = vector.load %arg2[%c0_1, %c0_2] : memref<128x2048xbf16, #tpu.memory_space<vmem>>, vector<128x2048xbf16>
    %cst = arith.constant dense<0.000000e+00> : vector<16x2048xf32>
    %3 = tpu.matmul %1, %2, %cst {dimension_numbers = #tpu.dot_dimension_numbers<[1], [0], [0], [1], [0, 0, 1, 1], [], []>} : vector<16x128xbf16>, vector<128x2048xbf16>, vector<16x2048xf32> -> vector<16x2048xf32>
    %c0_3 = arith.constant 0 : index
    %c0_4 = arith.constant 0 : index
    %4 = vector.load %arg3[%c0_3, %c0_4] : memref<1x2048xf32, #tpu.memory_space<vmem>>, vector<1x2048xf32>
    %5 = vector.broadcast %4 : vector<1x2048xf32> to vector<16x2048xf32>
    %6 = arith.addf %3, %5 : vector<16x2048xf32>
    %cst_5 = arith.constant 0.000000e+00 : f32
    %7 = vector.broadcast %cst_5 : f32 to vector<16x2048xf32>
    %8 = arith.maximumf %6, %7 : vector<16x2048xf32>
    %9 = arith.truncf %8 : vector<16x2048xf32> to vector<16x2048xbf16>
    %c0_6 = arith.constant 0 : index
    %c0_7 = arith.constant 0 : index
    %10 = vector.load %arg7[%c0_6, %c0_7] : memref<16x2048xbf16, #tpu.memory_space<vmem>>, vector<16x2048xbf16>
    tpu.vector_store %arg7[%c0_6, %c0_7], %9 {strides = array<i32>} : memref<16x2048xbf16, #tpu.memory_space<vmem>>, vector<16x2048xbf16>,
    %c0_8 = arith.constant 0 : index
    %c0_9 = arith.constant 0 : index
    %11 = vector.load %arg7[%c0_8, %c0_9] : memref<16x2048xbf16, #tpu.memory_space<vmem>>, vector<16x2048xbf16>
    %c0_10 = arith.constant 0 : index
    %c0_11 = arith.constant 0 : index
    %12 = vector.load %arg4[%c0_10, %c0_11] : memref<2048x128xbf16, #tpu.memory_space<vmem>>, vector<2048x128xbf16>
    %cst_12 = arith.constant dense<0.000000e+00> : vector<16x128xf32>
    %13 = tpu.matmul %11, %12, %cst_12 {dimension_numbers = #tpu.dot_dimension_numbers<[1], [0], [0], [1], [0, 0, 1, 1], [], []>} : vector<16x2048xbf16>, vector<2048x128xbf16>, vector<16x128xf32> -> vector<16x128xf32>
    %c0_13 = arith.constant 0 : index
    %c0_14 = arith.constant 0 : index
    %14 = vector.load %arg5[%c0_13, %c0_14] : memref<1x128xf32, #tpu.memory_space<vmem>>, vector<1x128xf32>
    %15 = vector.broadcast %14 : vector<1x128xf32> to vector<16x128xf32>
    %16 = arith.addf %13, %15 : vector<16x128xf32>
    %c0_15 = arith.constant 0 : index
    %c0_16 = arith.constant 0 : index
    %17 = vector.load %arg6[%c0_15, %c0_16] : memref<16x128xf32, #tpu.memory_space<vmem>>, vector<16x128xf32>
    tpu.vector_store %arg6[%c0_15, %c0_16], %16 {strides = array<i32>} : memref<16x128xf32, #tpu.memory_space<vmem>>, vector<16x128xf32>,
    return
  }
  func.func @transform_0(%arg0: i32) -> (i32, i32) {
    %c0_i32 = arith.constant 0 : i32
    %c0_i32_0 = arith.constant 0 : i32
    return %arg0, %c0_i32 : i32, i32
  }
  func.func @transform_1(%arg0: i32) -> (i32, i32) {
    %c0_i32 = arith.constant 0 : i32
    %c0_i32_0 = arith.constant 0 : i32
    %c0_i32_1 = arith.constant 0 : i32
    return %c0_i32, %c0_i32_0 : i32, i32
  }
  func.func @transform_2(%arg0: i32) -> (i32, i32) {
    %c0_i32 = arith.constant 0 : i32
    %c0_i32_0 = arith.constant 0 : i32
    %c0_i32_1 = arith.constant 0 : i32
    return %c0_i32, %c0_i32_0 : i32, i32
  }
  func.func @transform_3(%arg0: i32) -> (i32, i32) {
    %c0_i32 = arith.constant 0 : i32
    %c0_i32_0 = arith.constant 0 : i32
    %c0_i32_1 = arith.constant 0 : i32
    return %c0_i32, %c0_i32_0 : i32, i32
  }
  func.func @transform_4(%arg0: i32) -> (i32, i32) {
    %c0_i32 = arith.constant 0 : i32
    %c0_i32_0 = arith.constant 0 : i32
    %c0_i32_1 = arith.constant 0 : i32
    return %c0_i32, %c0_i32_0 : i32, i32
  }
  func.func @transform_5(%arg0: i32) -> (i32, i32) {
    %c0_i32 = arith.constant 0 : i32
    %c0_i32_0 = arith.constant 0 : i32
    return %arg0, %c0_i32 : i32, i32
  }
}

module attributes {stable_mosaic.version = 11 : i64} {
  func.func @_mlp_kernel(%arg0: i32, %arg1: memref<16x128xf32, #tpu.memory_space<vmem>>, %arg2: memref<128x2048xbf16, #tpu.memory_space<vmem>>, %arg3: memref<1x2048xf32, #tpu.memory_space<vmem>>, %arg4: memref<2048x128xbf16, #tpu.memory_space<vmem>>, %arg5: memref<1x128xf32, #tpu.memory_space<vmem>>, %arg6: memref<16x128xf32, #tpu.memory_space<vmem>>, %arg7: memref<16x2048xbf16, #tpu.memory_space<vmem>>) attributes {dimension_semantics = [#tpu.dimension_semantics<parallel>], iteration_bounds = array<i64: 1>, scalar_prefetch = 0 : i64, scratch_operands = 1 : i64, tpu.core_type = #tpu.core_type<tc>, window_params = [{transform_indices = @transform_0, window_bounds = array<i64: 16, 128>}, {pipeline_mode = #tpu.pipeline_mode<synchronous>, transform_indices = @transform_1, window_bounds = array<i64: 128, 2048>}, {pipeline_mode = #tpu.pipeline_mode<synchronous>, transform_indices = @transform_2, window_bounds = array<i64: 1, 2048>}, {pipeline_mode = #tpu.pipeline_mode<synchronous>, transform_indices = @transform_3, window_bounds = array<i64: 2048, 128>}, {pipeline_mode = #tpu.pipeline_mode<synchronous>, transform_indices = @transform_4, window_bounds = array<i64: 1, 128>}, {transform_indices = @transform_5, window_bounds = array<i64: 16, 128>}]} {
    %c0 = arith.constant 0 : index
    %c0_0 = arith.constant 0 : index
    %0 = vector.load %arg1[%c0, %c0_0] : memref<16x128xf32, #tpu.memory_space<vmem>>, vector<16x128xf32>
    %1 = arith.truncf %0 : vector<16x128xf32> to vector<16x128xbf16>
    %c0_1 = arith.constant 0 : index
    %c0_2 = arith.constant 0 : index
    %2 = vector.load %arg2[%c0_1, %c0_2] : memref<128x2048xbf16, #tpu.memory_space<vmem>>, vector<128x2048xbf16>
    %cst = arith.constant dense<0.000000e+00> : vector<16x2048xf32>
    %3 = tpu.matmul %1, %2, %cst {dimension_numbers = #tpu.dot_dimension_numbers<[1], [0], [0], [1], [0, 0, 1, 1], [], []>} : vector<16x128xbf16>, vector<128x2048xbf16>, vector<16x2048xf32> -> vector<16x2048xf32>
    %c0_3 = arith.constant 0 : index
    %c0_4 = arith.constant 0 : index
    %4 = vector.load %arg3[%c0_3, %c0_4] : memref<1x2048xf32, #tpu.memory_space<vmem>>, vector<1x2048xf32>
    %5 = vector.broadcast %4 : vector<1x2048xf32> to vector<16x2048xf32>
    %6 = arith.addf %3, %5 : vector<16x2048xf32>
    %cst_5 = arith.constant 0.000000e+00 : f32
    %7 = vector.broadcast %cst_5 : f32 to vector<16x2048xf32>
    %8 = arith.maximumf %6, %7 : vector<16x2048xf32>
    %9 = arith.truncf %8 : vector<16x2048xf32> to vector<16x2048xbf16>
    %c0_6 = arith.constant 0 : index
    %c0_7 = arith.constant 0 : index
    %10 = vector.load %arg7[%c0_6, %c0_7] : memref<16x2048xbf16, #tpu.memory_space<vmem>>, vector<16x2048xbf16>
    tpu.vector_store %arg7[%c0_6, %c0_7], %9 {strides = array<i32>} : memref<16x2048xbf16, #tpu.memory_space<vmem>>, vector<16x2048xbf16>,
    %c0_8 = arith.constant 0 : index
    %c0_9 = arith.constant 0 : index
    %11 = vector.load %arg7[%c0_8, %c0_9] : memref<16x2048xbf16, #tpu.memory_space<vmem>>, vector<16x2048xbf16>
    %c0_10 = arith.constant 0 : index
    %c0_11 = arith.constant 0 : index
    %12 = vector.load %arg4[%c0_10, %c0_11] : memref<2048x128xbf16, #tpu.memory_space<vmem>>, vector<2048x128xbf16>
    %cst_12 = arith.constant dense<0.000000e+00> : vector<16x128xf32>
    %13 = tpu.matmul %11, %12, %cst_12 {dimension_numbers = #tpu.dot_dimension_numbers<[1], [0], [0], [1], [0, 0, 1, 1], [], []>} : vector<16x2048xbf16>, vector<2048x128xbf16>, vector<16x128xf32> -> vector<16x128xf32>
    %c0_13 = arith.constant 0 : index
    %c0_14 = arith.constant 0 : index
    %14 = vector.load %arg5[%c0_13, %c0_14] : memref<1x128xf32, #tpu.memory_space<vmem>>, vector<1x128xf32>
    %15 = vector.broadcast %14 : vector<1x128xf32> to vector<16x128xf32>
    %16 = arith.addf %13, %15 : vector<16x128xf32>
    %c0_15 = arith.constant 0 : index
    %c0_16 = arith.constant 0 : index
    %17 = vector.load %arg6[%c0_15, %c0_16] : memref<16x128xf32, #tpu.memory_space<vmem>>, vector<16x128xf32>
    tpu.vector_store %arg6[%c0_15, %c0_16], %16 {strides = array<i32>} : memref<16x128xf32, #tpu.memory_space<vmem>>, vector<16x128xf32>,
    return
  }
  func.func @transform_0(%arg0: i32) -> (i32, i32) {
    %c0_i32 = arith.constant 0 : i32
    %c0_i32_0 = arith.constant 0 : i32
    return %arg0, %c0_i32 : i32, i32
  }
  func.func @transform_1(%arg0: i32) -> (i32, i32) {
    %c0_i32 = arith.constant 0 : i32
    %c0_i32_0 = arith.constant 0 : i32
    %c0_i32_1 = arith.constant 0 : i32
    return %c0_i32, %c0_i32_0 : i32, i32
  }
  func.func @transform_2(%arg0: i32) -> (i32, i32) {
    %c0_i32 = arith.constant 0 : i32
    %c0_i32_0 = arith.constant 0 : i32
    %c0_i32_1 = arith.constant 0 : i32
    return %c0_i32, %c0_i32_0 : i32, i32
  }
  func.func @transform_3(%arg0: i32) -> (i32, i32) {
    %c0_i32 = arith.constant 0 : i32
    %c0_i32_0 = arith.constant 0 : i32
    %c0_i32_1 = arith.constant 0 : i32
    return %c0_i32, %c0_i32_0 : i32, i32
  }
  func.func @transform_4(%arg0: i32) -> (i32, i32) {
    %c0_i32 = arith.constant 0 : i32
    %c0_i32_0 = arith.constant 0 : i32
    %c0_i32_1 = arith.constant 0 : i32
    return %c0_i32, %c0_i32_0 : i32, i32
  }
  func.func @transform_5(%arg0: i32) -> (i32, i32) {
    %c0_i32 = arith.constant 0 : i32
    %c0_i32_0 = arith.constant 0 : i32
    return %arg0, %c0_i32 : i32, i32
  }
}

</mosaic_0001>

<bundles_post_ra>
// kernel: tpu_custom_call.1
= control target key start
LH: loop header
LB: loop body
LE: loop exit
PB: predicated region body
PF: predicated region fallthrough
CT: control target
= control target key end

     0   :  { %10 = vsyncpa [#allocation4], 0  ;;  %s4149_s0 = inlined_call_operand.hbm [shape: f32[16,128], index: 0, kind: input, shape index: {}]   ;;  %s4150_s1 = inlined_call_operand.hbm [shape: bf16[128,2048], index: 1, kind: input, shape index: {}]   ;;  %s4151_s2 = inlined_call_operand.hbm [shape: f32[1,2048], index: 2, kind: input, shape index: {}]   ;;  %s4152_s3 = inlined_call_operand.hbm [shape: bf16[2048,128], index: 3, kind: input, shape index: {}]   ;;  %s4153_s4 = inlined_call_operand.vmem [shape: f32[1,128], index: 4, kind: input, shape index: {}]   ;;  %s4154_s5 = inlined_call_operand.hbm [shape: f32[16,128], index: 5, kind: output, shape index: {}]  }
   0x1   :  { %11 = vsyncpa [#allocation7], 0 }
   0x2   :  { %12 = vsyncpa [#allocation10], 0  ;;  %s31_s20 = sshll.u32 %s4150_s1, 4  ;;  %s32_s20 = int_to_ptr.hbm [resolvable:$true] %s31_s20 }
   0x3   :  { %13 = vsyncpa [#allocation5], 0  ;;  %s4047_s21 = smov [#allocation6]   ;;  %s18_s25 = sshll.u32 %s4149_s0, 4  ;;  %s19_s25 = int_to_ptr.hbm [resolvable:$true] %s18_s25 }
   0x4   :  { %s33_s22 = sshll.u32 %s4047_s21, 4  ;;  %s4048_s26 = smov 1024   ;;  %s34_s22 = int_to_ptr.vmem [resolvable:$true] %s33_s22 }
   0x5   :  { %s4049_s27 = smov 64   ;;  %s4050_s28 = smov [#allocation3]  }
   0x6   :  { %39 = dma.hbm_to_vmem [thread:$0]  %s32_s20, 16384, %s34_s22, [#allocation7], %s4048_s26, %s4048_s26, %s4049_s27  }
   0x7   :  { %s20_s29 = sshll.u32 %s4050_s28, 4  ;;  %s4051_s30 = smov 128   ;;  %s21_s29 = int_to_ptr.vmem [resolvable:$true] %s20_s29 }
   0x8   :  { %s4052_s6 = smov 8   ;;  %s45_s8 = sshll.u32 %s4151_s2, 4  ;;  %s46_s8 = int_to_ptr.hbm [resolvable:$true] %s45_s8 }
   0x9   :  { %26 = dma.hbm_to_vmem [thread:$0]  %s19_s25, 256, %s21_s29, [#allocation4], %s4051_s30, %s4051_s30, %s4052_s6  }
   0xa   :  { %s4053_s9 = smov [#allocation8]   ;;  %s55_s12 = sshll.u32 %s4152_s3, 4  ;;  %s56_s12 = int_to_ptr.hbm [resolvable:$true] %s55_s12 }
   0xb   :  { %s47_s0 = sshll.u32 %s4053_s9, 4  ;;  %s4054_s13 = smov [#allocation9]   ;;  %s48_s0 = int_to_ptr.vmem [resolvable:$true] %s47_s0 }
   0xc   :  { %50 = dma.hbm_to_vmem [thread:$0]  %s46_s8, 256, %s48_s0, [#allocation7]  }
   0xd   :  { %s57_s14 = sshll.u32 %s4054_s13, 4  ;;  %s4055_s15 = smov 4   ;;  %s58_s14 = int_to_ptr.vmem [resolvable:$true] %s57_s14 }
   0xe   :  { %63 = dma.hbm_to_vmem [thread:$0]  %s56_s12, 16384, %s58_s14, [#allocation10], %s4049_s27, %s4049_s27, %s4055_s15  }
   0xf   :  { %4039 = dma.done.wait [#allocation4], 256  }
  0x10   :  { %4040 = vsyncadd [#allocation4], 4294967040 }
  0x11   :  { %4041 = dma.done.wait [#allocation7], 16640  }
  0x12   :  { %4042 = vsyncadd [#allocation7], 4294950656 }
  0x13   :  { %4043 = dma.done.wait [#allocation10], 16384  }
  0x14   :  { %4044 = vsyncadd [#allocation10], 4294950912  ;;  %v2998_v0 = vld [vmem:[#allocation6 + $0x380] sm:$0xf]  ;;  %v3748_v2 = vld [vmem:[#allocation6 + $0x384] sm:$0xf] }
  0x15   :  { %v3756_v1 = vld [vmem:[#allocation6 + $0x3bc] sm:$0xf0]  ;;  %v3000_v4 = vld [vmem:[#allocation6 + $0x3c0] sm:$0xf0]  ;;  %v3006_v5 = vld [vmem:[#allocation6 + $0x388] sm:$0xf] }
  0x16   :  { %v2999_v3 = vor.u32 %v3756_v1, %v2998_v0  ;;  %v3757_v6 = vld [vmem:[#allocation6 + $0x3c4] sm:$0xf0]  ;;  %v3003_v7 = vor.u32 %v3748_v2, %v3000_v4  ;;  %v3749_v9 = vld [vmem:[#allocation6 + $0x38c] sm:$0xf]  ;;  %v2934_v11 = vld [vmem:[#allocation6 + $0x300] sm:$0xf] }
  0x17   :  { %v3007_v8 = vor.u32 %v3757_v6, %v3006_v5  ;;  %v3008_v10 = vld [vmem:[#allocation6 + $0x3c8] sm:$0xf0]  ;;  %v3740_v13 = vld [vmem:[#allocation6 + $0x33c] sm:$0xf0]  ;;  %v3732_v14 = vld [vmem:[#allocation6 + $0x304] sm:$0xf] }
  0x18   :  { %889 = vmatpush.bf16.msra.mxu0 %v2999_v3  ;;  %v3011_v12 = vor.u32 %v3749_v9, %v3008_v10  ;;  %v2936_v15 = vld [vmem:[#allocation6 + $0x340] sm:$0xf0]  ;;  %903 = vmatpush.bf16.msra.mxu1 %v3003_v7  ;;  %v2935_v16 = vor.u32 %v3740_v13, %v2934_v11  ;;  %v2942_v18 = vld [vmem:[#allocation6 + $0x308] sm:$0xf]  ;;  %v3733_v20 = vld [vmem:[#allocation6 + $0x30c] sm:$0xf] }
  0x19   :  { %917 = vmatpush.bf16.msra.mxu2 %v3007_v8  ;;  %v2939_v17 = vor.u32 %v3732_v14, %v2936_v15  ;;  %v3741_v19 = vld [vmem:[#allocation6 + $0x344] sm:$0xf0]  ;;  %v2944_v22 = vld [vmem:[#allocation6 + $0x348] sm:$0xf0]  ;;  %v2870_v23 = vld [vmem:[#allocation6 + $0x280] sm:$0xf] }
  0x1a   :  { %931 = vmatpush.bf16.msra.mxu3 %v3011_v12  ;;  %v2943_v21 = vor.u32 %v3741_v19, %v2942_v18  ;;  %v3724_v24 = vld [vmem:[#allocation6 + $0x2bc] sm:$0xf0]  ;;  %v2947_v25 = vor.u32 %v3733_v20, %v2944_v22  ;;  %v3716_v26 = vld [vmem:[#allocation6 + $0x284] sm:$0xf]  ;;  %v2878_v28 = vld [vmem:[#allocation6 + $0x288] sm:$0xf] }
  0x1b   :  { %v2872_v27 = vld [vmem:[#allocation6 + $0x2c0] sm:$0xf0]  ;;  %v2871_v29 = vor.u32 %v3724_v24, %v2870_v23  ;;  %v3725_v30 = vld [vmem:[#allocation6 + $0x2c4] sm:$0xf0]  ;;  %v3717_v31 = vld [vmem:[#allocation6 + $0x28c] sm:$0xf] }
  0x1c   :  { %890 = vmatpush.bf16.msra.mxu0 %v2935_v16  ;;  %v2880_v32 = vld [vmem:[#allocation6 + $0x2c8] sm:$0xf0]  ;;  %904 = vmatpush.bf16.msra.mxu1 %v2939_v17  ;;  %v2875_v33 = vor.u32 %v3716_v26, %v2872_v27  ;;  %v2879_v34 = vor.u32 %v3725_v30, %v2878_v28  ;;  %v2806_v35 = vld [vmem:[#allocation6 + $0x200] sm:$0xf]  ;;  %v3700_v37 = vld [vmem:[#allocation6 + $0x204] sm:$0xf] }
  0x1d   :  { %918 = vmatpush.bf16.msra.mxu2 %v2943_v21  ;;  %v3708_v36 = vld [vmem:[#allocation6 + $0x23c] sm:$0xf0]  ;;  %v2883_v38 = vor.u32 %v3717_v31, %v2880_v32  ;;  %v2808_v39 = vld [vmem:[#allocation6 + $0x240] sm:$0xf0]  ;;  %v2814_v40 = vld [vmem:[#allocation6 + $0x208] sm:$0xf] }
  0x1e   :  { %932 = vmatpush.bf16.msra.mxu3 %v2947_v25  ;;  %v3709_v41 = vld [vmem:[#allocation6 + $0x244] sm:$0xf0]  ;;  %v3701_v42 = vld [vmem:[#allocation6 + $0x20c] sm:$0xf]  ;;  %v2807_v44 = vor.u32 %v3708_v36, %v2806_v35  ;;  %v2811_v45 = vor.u32 %v3700_v37, %v2808_v39  ;;  %v2742_v47 = vld [vmem:[#allocation6 + $0x180] sm:$0xf] }
  0x1f   :  { %v2816_v43 = vld [vmem:[#allocation6 + $0x248] sm:$0xf0]  ;;  %v2815_v46 = vor.u32 %v3709_v41, %v2814_v40  ;;  %v3692_v48 = vld [vmem:[#allocation6 + $0x1bc] sm:$0xf0]  ;;  %v3684_v49 = vld [vmem:[#allocation6 + $0x184] sm:$0xf] }
  0x20   :  { %891 = vmatpush.bf16.msra.mxu0 %v2871_v29  ;;  %905 = vmatpush.bf16.msra.mxu1 %v2875_v33  ;;  %v2819_v50 = vor.u32 %v3701_v42, %v2816_v43  ;;  %v2744_v51 = vld [vmem:[#allocation6 + $0x1c0] sm:$0xf0]  ;;  %v2750_v52 = vld [vmem:[#allocation6 + $0x188] sm:$0xf]  ;;  %v3685_v54 = vld [vmem:[#allocation6 + $0x18c] sm:$0xf]  ;;  %v2743_v56 = vor.u32 %v3692_v48, %v2742_v47 }
  0x21   :  { %919 = vmatpush.bf16.msra.mxu2 %v2879_v34  ;;  %v3693_v53 = vld [vmem:[#allocation6 + $0x1c4] sm:$0xf0]  ;;  %v2752_v55 = vld [vmem:[#allocation6 + $0x1c8] sm:$0xf0]  ;;  %v2747_v57 = vor.u32 %v3684_v49, %v2744_v51  ;;  %v2678_v59 = vld [vmem:[#allocation6 + $0x100] sm:$0xf] }
  0x22   :  { %933 = vmatpush.bf16.msra.mxu3 %v2883_v38  ;;  %v2751_v58 = vor.u32 %v3693_v53, %v2750_v52  ;;  %v3676_v60 = vld [vmem:[#allocation6 + $0x13c] sm:$0xf0]  ;;  %v3668_v61 = vld [vmem:[#allocation6 + $0x104] sm:$0xf]  ;;  %v2755_v62 = vor.u32 %v3685_v54, %v2752_v55  ;;  %v2686_v0 = vld [vmem:[#allocation6 + $0x108] sm:$0xf] }
  0x23   :  { %v2680_v63 = vld [vmem:[#allocation6 + $0x140] sm:$0xf0]  ;;  %v3677_v1 = vld [vmem:[#allocation6 + $0x144] sm:$0xf0]  ;;  %v3669_v2 = vld [vmem:[#allocation6 + $0x10c] sm:$0xf]  ;;  %v2679_v4 = vor.u32 %v3676_v60, %v2678_v59 }
  0x24   :  { %892 = vmatpush.bf16.msra.mxu0 %v2807_v44  ;;  %906 = vmatpush.bf16.msra.mxu1 %v2811_v45  ;;  %v2688_v3 = vld [vmem:[#allocation6 + $0x148] sm:$0xf0]  ;;  %v2683_v5 = vor.u32 %v3668_v61, %v2680_v63  ;;  %v2687_v6 = vor.u32 %v3677_v1, %v2686_v0  ;;  %v2614_v7 = vld [vmem:[#allocation6 + $0x80] sm:$0xf]  ;;  %v3652_v9 = vld [vmem:[#allocation6 + $0x84] sm:$0xf] }
  0x25   :  { %920 = vmatpush.bf16.msra.mxu2 %v2815_v46  ;;  %v3660_v8 = vld [vmem:[#allocation6 + $0xbc] sm:$0xf0]  ;;  %v2691_v10 = vor.u32 %v3669_v2, %v2688_v3  ;;  %v2616_v11 = vld [vmem:[#allocation6 + $0xc0] sm:$0xf0]  ;;  %v2622_v12 = vld [vmem:[#allocation6 + $0x88] sm:$0xf] }
  0x26   :  { %934 = vmatpush.bf16.msra.mxu3 %v2819_v50  ;;  %v3661_v13 = vld [vmem:[#allocation6 + $0xc4] sm:$0xf0]  ;;  %v3653_v14 = vld [vmem:[#allocation6 + $0x8c] sm:$0xf]  ;;  %v2615_v16 = vor.u32 %v3660_v8, %v2614_v7  ;;  %v2550_v17 = vld [vmem:[#allocation6] sm:$0xf]  ;;  %v2619_v19 = vor.u32 %v3652_v9, %v2616_v11 }
  0x27   :  { %v2624_v15 = vld [vmem:[#allocation6 + $0xc8] sm:$0xf0]  ;;  %v3644_v18 = vld [vmem:[#allocation6 + $0x3c] sm:$0xf0]  ;;  %v2623_v20 = vor.u32 %v3661_v13, %v2622_v12  ;;  %v3636_v21 = vld [vmem:[#allocation6 + $0x4] sm:$0xf] }
  0x28   :  { %893 = vmatpush.bf16.msra.mxu0 %v2743_v56  ;;  %907 = vmatpush.bf16.msra.mxu1 %v2747_v57  ;;  %v2552_v22 = vld [vmem:[#allocation6 + $0x40] sm:$0xf0]  ;;  %v2558_v23 = vld [vmem:[#allocation6 + $0x8] sm:$0xf]  ;;  %v2627_v24 = vor.u32 %v3653_v14, %v2624_v15  ;;  %v3637_v26 = vld [vmem:[#allocation6 + $0xc] sm:$0xf]  ;;  %v2551_v31 = vor.u32 %v3644_v18, %v2550_v17 }
  0x29   :  { %921 = vmatpush.bf16.msra.mxu2 %v2751_v58  ;;  %v3645_v25 = vld [vmem:[#allocation6 + $0x44] sm:$0xf0]  ;;  %v2560_v27 = vld [vmem:[#allocation6 + $0x48] sm:$0xf0]  ;;  %v3014_v28 = vld [vmem:[#allocation6 + $0x390] sm:$0xf]  ;;  %v2555_v35 = vor.u32 %v3636_v21, %v2552_v22 }
  0x2a   :  { %935 = vmatpush.bf16.msra.mxu3 %v2755_v62  ;;  %v3758_v29 = vld [vmem:[#allocation6 + $0x3cc] sm:$0xf0]  ;;  %v3750_v30 = vld [vmem:[#allocation6 + $0x394] sm:$0xf]  ;;  %v3022_v33 = vld [vmem:[#allocation6 + $0x398] sm:$0xf]  ;;  %v2559_v36 = vor.u32 %v3645_v25, %v2558_v23  ;;  %v2563_v39 = vor.u32 %v3637_v26, %v2560_v27 }
  0x2b   :  { %v3016_v32 = vld [vmem:[#allocation6 + $0x3d0] sm:$0xf0]  ;;  %v3759_v34 = vld [vmem:[#allocation6 + $0x3d4] sm:$0xf0]  ;;  %v3751_v37 = vld [vmem:[#allocation6 + $0x39c] sm:$0xf]  ;;  %v3015_v40 = vor.u32 %v3758_v29, %v3014_v28 }
  0x2c   :  { %894 = vmatpush.bf16.msra.mxu0 %v2679_v4  ;;  %908 = vmatpush.bf16.msra.mxu1 %v2683_v5  ;;  %v3024_v38 = vld [vmem:[#allocation6 + $0x3d8] sm:$0xf0]  ;;  %v82_v41 = vld [vmem:[#allocation3] sm:$0xff]  ;;  %v3019_v43 = vor.u32 %v3750_v30, %v3016_v32  ;;  %v3023_v44 = vor.u32 %v3759_v34, %v3022_v33  ;;  %v2958_v50 = vld [vmem:[#allocation6 + $0x318] sm:$0xf]  ;;  %s2533_s19 = sshll.u32 %s4154_s5, 4  ;;  %s2534_s19 = int_to_ptr.hbm [resolvable:$true] %s2533_s19 }
  0x2d   :  { %922 = vmatpush.bf16.msra.mxu2 %v2687_v6  ;;  %v83_v42 = vld [vmem:[#allocation3 + $0x8] sm:$0xff]  ;;  %v2950_v45 = vld [vmem:[#allocation6 + $0x310] sm:$0xf]  ;;  %v3734_v47 = vld [vmem:[#allocation6 + $0x314] sm:$0xf]  ;;  %v3027_v48 = vor.u32 %v3751_v37, %v3024_v38 }
  0x2e   :  { %936 = vmatpush.bf16.msra.mxu3 %v2691_v10  ;;  %v3742_v46 = vld [vmem:[#allocation6 + $0x34c] sm:$0xf0]  ;;  %v2952_v49 = vld [vmem:[#allocation6 + $0x350] sm:$0xf0]  ;;  %v3743_v51 = vld [vmem:[#allocation6 + $0x354] sm:$0xf0]  ;;  %v4102_v52 = vpack.c.bf16 %v83_v42, %v82_v41 }
  0x2f   :  { %v3735_v53 = vld [vmem:[#allocation6 + $0x31c] sm:$0xf]  ;;  %v2951_v55 = vor.u32 %v3742_v46, %v2950_v45  ;;  %v2955_v56 = vor.u32 %v3734_v47, %v2952_v49  ;;  %v2959_v57 = vor.u32 %v3743_v51, %v2958_v50  ;;  %v2886_v58 = vld [vmem:[#allocation6 + $0x290] sm:$0xf]  ;;  %v3718_v60 = vld [vmem:[#allocation6 + $0x294] sm:$0xf] }
  0x30   :  { %895 = vmatpush.bf16.msra.mxu0 %v2615_v16  ;;  %909 = vmatpush.bf16.msra.mxu1 %v2619_v19  ;;  %v2960_v54 = vld [vmem:[#allocation6 + $0x358] sm:$0xf0]  ;;  %v3726_v59 = vld [vmem:[#allocation6 + $0x2cc] sm:$0xf0]  ;;  %v2888_v62 = vld [vmem:[#allocation6 + $0x2d0] sm:$0xf0] }
  0x31   :  { %923 = vmatpush.bf16.msra.mxu2 %v2623_v20  ;;  %v2963_v61 = vor.u32 %v3735_v53, %v2960_v54  ;;  %v2894_v63 = vld [vmem:[#allocation6 + $0x298] sm:$0xf]  ;;  %v3719_v1 = vld [vmem:[#allocation6 + $0x29c] sm:$0xf]  ;;  %v2887_v3 = vor.u32 %v3726_v59, %v2886_v58  ;;  %v2891_v4 = vor.u32 %v3718_v60, %v2888_v62  ;;  %v2822_v6 = vld [vmem:[#allocation6 + $0x210] sm:$0xf] }
  0x32   :  { %937 = vmatpush.bf16.msra.mxu3 %v2627_v24  ;;  %v3727_v0 = vld [vmem:[#allocation6 + $0x2d4] sm:$0xf0]  ;;  %v2896_v2 = vld [vmem:[#allocation6 + $0x2d8] sm:$0xf0]  ;;  %v3710_v7 = vld [vmem:[#allocation6 + $0x24c] sm:$0xf0] }
  0x33   :  { %v2895_v5 = vor.u32 %v3727_v0, %v2894_v63  ;;  %v3702_v8 = vld [vmem:[#allocation6 + $0x214] sm:$0xf]  ;;  %v2899_v9 = vor.u32 %v3719_v1, %v2896_v2  ;;  %v2830_v11 = vld [vmem:[#allocation6 + $0x218] sm:$0xf]  ;;  %v3703_v13 = vld [vmem:[#allocation6 + $0x21c] sm:$0xf]  ;;  %v2823_v15 = vor.u32 %v3710_v7, %v2822_v6 }
  0x34   :  { %896 = vmatpush.bf16.msra.mxu0 %v2551_v31  ;;  %910 = vmatpush.bf16.msra.mxu1 %v2555_v35  ;;  %v2824_v10 = vld [vmem:[#allocation6 + $0x250] sm:$0xf0]  ;;  %v3711_v12 = vld [vmem:[#allocation6 + $0x254] sm:$0xf0]  ;;  %v2832_v14 = vld [vmem:[#allocation6 + $0x258] sm:$0xf0] }
  0x35   :  { %924 = vmatpush.bf16.msra.mxu2 %v2559_v36  ;;  %v2827_v16 = vor.u32 %v3702_v8, %v2824_v10  ;;  %v2831_v17 = vor.u32 %v3711_v12, %v2830_v11  ;;  %v2758_v18 = vld [vmem:[#allocation6 + $0x190] sm:$0xf]  ;;  %v3686_v20 = vld [vmem:[#allocation6 + $0x194] sm:$0xf]  ;;  %v2835_v21 = vor.u32 %v3703_v13, %v2832_v14  ;;  %v2766_v23 = vld [vmem:[#allocation6 + $0x198] sm:$0xf] }
  0x36   :  { %938 = vmatpush.bf16.msra.mxu3 %v2563_v39  ;;  %v3694_v19 = vld [vmem:[#allocation6 + $0x1cc] sm:$0xf0]  ;;  %v2760_v22 = vld [vmem:[#allocation6 + $0x1d0] sm:$0xf0]  ;;  %v3695_v24 = vld [vmem:[#allocation6 + $0x1d4] sm:$0xf0] }
  0x37   :  { %897 = vmatmul.bf16.vlgmr.msra.gmra.mxu0 %v4102_v52  ;;  %911 = vmatmul.bf16.vlgmr.msra.gmra.mxu1 %v4102_v52  ;;  %v3687_v25 = vld [vmem:[#allocation6 + $0x19c] sm:$0xf]  ;;  %v2759_v27 = vor.u32 %v3694_v19, %v2758_v18  ;;  %v2763_v28 = vor.u32 %v3686_v20, %v2760_v22  ;;  %v2767_v29 = vor.u32 %v3695_v24, %v2766_v23  ;;  %v2694_v30 = vld [vmem:[#allocation6 + $0x110] sm:$0xf]  ;;  %v3670_v32 = vld [vmem:[#allocation6 + $0x114] sm:$0xf] }
  0x38   :  { %945 = vmatpush.bf16.msrb.mxu0 %v3015_v40  ;;  %959 = vmatpush.bf16.msrb.mxu1 %v3019_v43  ;;  %v2768_v26 = vld [vmem:[#allocation6 + $0x1d8] sm:$0xf0]  ;;  %v3678_v31 = vld [vmem:[#allocation6 + $0x14c] sm:$0xf0]  ;;  %v2696_v34 = vld [vmem:[#allocation6 + $0x150] sm:$0xf0] }
  0x39   :  { %973 = vmatpush.bf16.msrb.mxu2 %v3023_v44  ;;  %939 = vmatmul.bf16.vlgmr.msra.gmra.mxu3 %v4102_v52  ;;  %v2771_v33 = vor.u32 %v3687_v25, %v2768_v26  ;;  %v2702_v35 = vld [vmem:[#allocation6 + $0x118] sm:$0xf]  ;;  %v3671_v37 = vld [vmem:[#allocation6 + $0x11c] sm:$0xf]  ;;  %v2695_v39 = vor.u32 %v3678_v31, %v2694_v30  ;;  %v2699_v40 = vor.u32 %v3670_v32, %v2696_v34  ;;  %v2630_v42 = vld [vmem:[#allocation6 + $0x90] sm:$0xf] }
  0x3a   :  { %987 = vmatpush.bf16.msrb.mxu3 %v3027_v48  ;;  %925 = vmatmul.bf16.vlgmr.msra.gmra.mxu2 %v4102_v52  ;;  %v3679_v36 = vld [vmem:[#allocation6 + $0x154] sm:$0xf0]  ;;  %v2704_v38 = vld [vmem:[#allocation6 + $0x158] sm:$0xf0]  ;;  %v3662_v43 = vld [vmem:[#allocation6 + $0xcc] sm:$0xf0] }
  0x3b   :  { %v2703_v41 = vor.u32 %v3679_v36, %v2702_v35  ;;  %v3654_v44 = vld [vmem:[#allocation6 + $0x94] sm:$0xf]  ;;  %v2707_v45 = vor.u32 %v3671_v37, %v2704_v38  ;;  %v2638_v47 = vld [vmem:[#allocation6 + $0x98] sm:$0xf]  ;;  %v3655_v49 = vld [vmem:[#allocation6 + $0x9c] sm:$0xf]  ;;  %v2631_v51 = vor.u32 %v3662_v43, %v2630_v42 }
  0x3c   :  { %946 = vmatpush.bf16.msrb.mxu0 %v2951_v55  ;;  %960 = vmatpush.bf16.msrb.mxu1 %v2955_v56  ;;  %v2632_v46 = vld [vmem:[#allocation6 + $0xd0] sm:$0xf0]  ;;  %v3663_v48 = vld [vmem:[#allocation6 + $0xd4] sm:$0xf0]  ;;  %v2640_v50 = vld [vmem:[#allocation6 + $0xd8] sm:$0xf0] }
  0x3d   :  { %974 = vmatpush.bf16.msrb.mxu2 %v2959_v57  ;;  %v2566_v53 = vld [vmem:[#allocation6 + $0x10] sm:$0xf]  ;;  %v2635_v55 = vor.u32 %v3654_v44, %v2632_v46  ;;  %v2639_v56 = vor.u32 %v3663_v48, %v2638_v47  ;;  %v3638_v57 = vld [vmem:[#allocation6 + $0x14] sm:$0xf]  ;;  %v2574_v59 = vld [vmem:[#allocation6 + $0x18] sm:$0xf]  ;;  %v2643_v60 = vor.u32 %v3655_v49, %v2640_v50 }
  0x3e   :  { %988 = vmatpush.bf16.msrb.mxu3 %v2963_v61  ;;  %v3646_v54 = vld [vmem:[#allocation6 + $0x4c] sm:$0xf0]  ;;  %v2568_v58 = vld [vmem:[#allocation6 + $0x50] sm:$0xf0]  ;;  %v3647_v61 = vld [vmem:[#allocation6 + $0x54] sm:$0xf0] }
  0x3f   :  { %v3639_v62 = vld [vmem:[#allocation6 + $0x1c] sm:$0xf]  ;;  %v3030_v0 = vld [vmem:[#allocation6 + $0x3a0] sm:$0xf]  ;;  %v3752_v2 = vld [vmem:[#allocation6 + $0x3a4] sm:$0xf]  ;;  %v2571_v7 = vor.u32 %v3638_v57, %v2568_v58  ;;  %v2575_v8 = vor.u32 %v3647_v61, %v2574_v59 }
  0x40   :  { %947 = vmatpush.bf16.msrb.mxu0 %v2887_v3  ;;  %961 = vmatpush.bf16.msrb.mxu1 %v2891_v4  ;;  %v2576_v63 = vld [vmem:[#allocation6 + $0x58] sm:$0xf0]  ;;  %v3760_v1 = vld [vmem:[#allocation6 + $0x3dc] sm:$0xf0]  ;;  %v2567_v3 = vor.u32 %v3646_v54, %v2566_v53  ;;  %v3032_v4 = vld [vmem:[#allocation6 + $0x3e0] sm:$0xf0] }
  0x41   :  { %975 = vmatpush.bf16.msrb.mxu2 %v2895_v5  ;;  %v3038_v5 = vld [vmem:[#allocation6 + $0x3a8] sm:$0xf]  ;;  %v3040_v10 = vld [vmem:[#allocation6 + $0x3e8] sm:$0xf0]  ;;  %v2579_v11 = vor.u32 %v3639_v62, %v2576_v63  ;;  %v3031_v12 = vor.u32 %v3760_v1, %v3030_v0  ;;  %v3035_v13 = vor.u32 %v3752_v2, %v3032_v4  ;;  %v2968_v19 = vld [vmem:[#allocation6 + $0x360] sm:$0xf0] }
  0x42   :  { %989 = vmatpush.bf16.msrb.mxu3 %v2899_v9  ;;  %v3761_v6 = vld [vmem:[#allocation6 + $0x3e4] sm:$0xf0]  ;;  %v3753_v9 = vld [vmem:[#allocation6 + $0x3ac] sm:$0xf]  ;;  %v2904_v31 = vld [vmem:[#allocation6 + $0x2e0] sm:$0xf0] }
  0x43   :  { %v3039_v14 = vor.u32 %v3761_v6, %v3038_v5  ;;  %v3043_v18 = vor.u32 %v3753_v9, %v3040_v10  ;;  %v2974_v20 = vld [vmem:[#allocation6 + $0x328] sm:$0xf]  ;;  %v3737_v22 = vld [vmem:[#allocation6 + $0x32c] sm:$0xf]  ;;  %v2840_v43 = vld [vmem:[#allocation6 + $0x260] sm:$0xf0] }
  0x44   :  { %948 = vmatpush.bf16.msrb.mxu0 %v2823_v15  ;;  %962 = vmatpush.bf16.msrb.mxu1 %v2827_v16  ;;  %v2966_v15 = vld [vmem:[#allocation6 + $0x320] sm:$0xf]  ;;  %v2976_v23 = vld [vmem:[#allocation6 + $0x368] sm:$0xf0]  ;;  %v2910_v32 = vld [vmem:[#allocation6 + $0x2a8] sm:$0xf] }
  0x45   :  { %976 = vmatpush.bf16.msrb.mxu2 %v2831_v17  ;;  %v3744_v16 = vld [vmem:[#allocation6 + $0x35c] sm:$0xf0]  ;;  %v3736_v17 = vld [vmem:[#allocation6 + $0x324] sm:$0xf]  ;;  %v2979_v30 = vor.u32 %v3737_v22, %v2976_v23  ;;  %v3721_v34 = vld [vmem:[#allocation6 + $0x2ac] sm:$0xf] }
  0x46   :  { %990 = vmatpush.bf16.msrb.mxu3 %v2835_v21  ;;  %v3745_v21 = vld [vmem:[#allocation6 + $0x364] sm:$0xf0]  ;;  %v2967_v24 = vor.u32 %v3744_v16, %v2966_v15  ;;  %v2971_v25 = vor.u32 %v3736_v17, %v2968_v19  ;;  %v2912_v35 = vld [vmem:[#allocation6 + $0x2e8] sm:$0xf0]  ;;  %v3696_v53 = vld [vmem:[#allocation6 + $0x1dc] sm:$0xf0] }
  0x47   :  { %v2975_v26 = vor.u32 %v3745_v21, %v2974_v20  ;;  %v2915_v42 = vor.u32 %v3721_v34, %v2912_v35  ;;  %v2846_v44 = vld [vmem:[#allocation6 + $0x228] sm:$0xf]  ;;  %v3705_v46 = vld [vmem:[#allocation6 + $0x22c] sm:$0xf]  ;;  %v3688_v54 = vld [vmem:[#allocation6 + $0x1a4] sm:$0xf] }
  0x48   :  { %949 = vmatpush.bf16.msrb.mxu0 %v2759_v27  ;;  %963 = vmatpush.bf16.msrb.mxu1 %v2763_v28  ;;  %v2902_v27 = vld [vmem:[#allocation6 + $0x2a0] sm:$0xf]  ;;  %v2848_v47 = vld [vmem:[#allocation6 + $0x268] sm:$0xf0]  ;;  %v2782_v57 = vld [vmem:[#allocation6 + $0x1a8] sm:$0xf] }
  0x49   :  { %977 = vmatpush.bf16.msrb.mxu2 %v2767_v29  ;;  %v3728_v28 = vld [vmem:[#allocation6 + $0x2dc] sm:$0xf0]  ;;  %v3720_v29 = vld [vmem:[#allocation6 + $0x2a4] sm:$0xf]  ;;  %v3697_v58 = vld [vmem:[#allocation6 + $0x1e4] sm:$0xf0] }
  0x4a   :  { %991 = vmatpush.bf16.msrb.mxu3 %v2771_v33  ;;  %v3729_v33 = vld [vmem:[#allocation6 + $0x2e4] sm:$0xf0]  ;;  %v2903_v36 = vor.u32 %v3728_v28, %v2902_v27  ;;  %v2907_v37 = vor.u32 %v3720_v29, %v2904_v31  ;;  %v3689_v59 = vld [vmem:[#allocation6 + $0x1ac] sm:$0xf]  ;;  %v2783_v63 = vor.u32 %v3697_v58, %v2782_v57  ;;  %v2710_v0 = vld [vmem:[#allocation6 + $0x120] sm:$0xf] }
  0x4b   :  { %v2911_v38 = vor.u32 %v3729_v33, %v2910_v32  ;;  %v3680_v1 = vld [vmem:[#allocation6 + $0x15c] sm:$0xf0]  ;;  %v3672_v2 = vld [vmem:[#allocation6 + $0x124] sm:$0xf]  ;;  %v2718_v5 = vld [vmem:[#allocation6 + $0x128] sm:$0xf] }
  0x4c   :  { %950 = vmatpush.bf16.msrb.mxu0 %v2695_v39  ;;  %964 = vmatpush.bf16.msrb.mxu1 %v2699_v40  ;;  %v2838_v39 = vld [vmem:[#allocation6 + $0x220] sm:$0xf]  ;;  %v2712_v4 = vld [vmem:[#allocation6 + $0x160] sm:$0xf0]  ;;  %v3681_v6 = vld [vmem:[#allocation6 + $0x164] sm:$0xf0]  ;;  %v2711_v9 = vor.u32 %v3680_v1, %v2710_v0 }
  0x4d   :  { %978 = vmatpush.bf16.msrb.mxu2 %v2703_v41  ;;  %v3712_v40 = vld [vmem:[#allocation6 + $0x25c] sm:$0xf0]  ;;  %v3704_v41 = vld [vmem:[#allocation6 + $0x224] sm:$0xf]  ;;  %v2715_v10 = vor.u32 %v3672_v2, %v2712_v4  ;;  %v2654_v17 = vld [vmem:[#allocation6 + $0xa8] sm:$0xf] }
  0x4e   :  { %992 = vmatpush.bf16.msrb.mxu3 %v2707_v45  ;;  %v3713_v45 = vld [vmem:[#allocation6 + $0x264] sm:$0xf0]  ;;  %v2839_v48 = vor.u32 %v3712_v40, %v2838_v39  ;;  %v2843_v49 = vor.u32 %v3704_v41, %v2840_v43  ;;  %v2648_v16 = vld [vmem:[#allocation6 + $0xe0] sm:$0xf0]  ;;  %v3657_v19 = vld [vmem:[#allocation6 + $0xac] sm:$0xf] }
  0x4f   :  { %v2847_v50 = vor.u32 %v3713_v45, %v2846_v44  ;;  %v2656_v20 = vld [vmem:[#allocation6 + $0xe8] sm:$0xf0]  ;;  %v2582_v22 = vld [vmem:[#allocation6 + $0x20] sm:$0xf]  ;;  %v2584_v27 = vld [vmem:[#allocation6 + $0x60] sm:$0xf0] }
  0x50   :  { %951 = vmatpush.bf16.msrb.mxu0 %v2631_v51  ;;  %965 = vmatpush.bf16.msrb.mxu1 %v2635_v55  ;;  %v2774_v51 = vld [vmem:[#allocation6 + $0x1a0] sm:$0xf]  ;;  %v2851_v55 = vor.u32 %v3705_v46, %v2848_v47  ;;  %v2590_v28 = vld [vmem:[#allocation6 + $0x28] sm:$0xf]  ;;  %v2659_v29 = vor.u32 %v3657_v19, %v2656_v20  ;;  %v3641_v31 = vld [vmem:[#allocation6 + $0x2c] sm:$0xf] }
  0x51   :  { %979 = vmatpush.bf16.msrb.mxu2 %v2639_v56  ;;  %v2776_v56 = vld [vmem:[#allocation6 + $0x1e0] sm:$0xf0]  ;;  %v2775_v61 = vor.u32 %v3696_v53, %v2774_v51  ;;  %v3648_v23 = vld [vmem:[#allocation6 + $0x5c] sm:$0xf0]  ;;  %v2592_v32 = vld [vmem:[#allocation6 + $0x68] sm:$0xf0] }
  0x52   :  { %993 = vmatpush.bf16.msrb.mxu3 %v2643_v60  ;;  %v2784_v60 = vld [vmem:[#allocation6 + $0x1e8] sm:$0xf0]  ;;  %v2779_v62 = vor.u32 %v3688_v54, %v2776_v56  ;;  %v3046_v33 = vld [vmem:[#allocation6 + $0x3b0] sm:$0xf]  ;;  %v3754_v35 = vld [vmem:[#allocation6 + $0x3b4] sm:$0xf]  ;;  %v2595_v44 = vor.u32 %v3641_v31, %v2592_v32 }
  0x53   :  { %v3762_v34 = vld [vmem:[#allocation6 + $0x3ec] sm:$0xf0]  ;;  %v3763_v39 = vld [vmem:[#allocation6 + $0x3f4] sm:$0xf0]  ;;  %v3056_v43 = vld [vmem:[#allocation6 + $0x3f8] sm:$0xf0] }
  0x54   :  { %952 = vmatpush.bf16.msrb.mxu0 %v2567_v3  ;;  %966 = vmatpush.bf16.msrb.mxu1 %v2571_v7  ;;  %v2787_v3 = vor.u32 %v3689_v59, %v2784_v60  ;;  %v3673_v7 = vld [vmem:[#allocation6 + $0x12c] sm:$0xf]  ;;  %v3047_v45 = vor.u32 %v3762_v34, %v3046_v33  ;;  %v2984_v53 = vld [vmem:[#allocation6 + $0x370] sm:$0xf0]  ;;  %v2990_v54 = vld [vmem:[#allocation6 + $0x338] sm:$0xf] }
  0x55   :  { %980 = vmatpush.bf16.msrb.mxu2 %v2575_v8  ;;  %v2720_v8 = vld [vmem:[#allocation6 + $0x168] sm:$0xf0]  ;;  %v3739_v56 = vld [vmem:[#allocation6 + $0x33c] sm:$0xf]  ;;  %v2920_v1 = vld [vmem:[#allocation6 + $0x2f0] sm:$0xf0] }
  0x56   :  { %994 = vmatpush.bf16.msrb.mxu3 %v2579_v11  ;;  %v2719_v11 = vor.u32 %v3681_v6, %v2718_v5  ;;  %v2723_v15 = vor.u32 %v3673_v7, %v2720_v8  ;;  %v2992_v57 = vld [vmem:[#allocation6 + $0x378] sm:$0xf0]  ;;  %v2926_v2 = vld [vmem:[#allocation6 + $0x2b8] sm:$0xf]  ;;  %v2726_v33 = vld [vmem:[#allocation6 + $0x130] sm:$0xf] }
  0x57   :  { %953 = vmatmul.bf16.vlgmr.msrb.gmra.mxu0 %v4102_v52  ;;  %967 = vmatmul.bf16.vlgmr.msrb.gmra.mxu1 %v4102_v52  ;;  %v2995_v0 = vor.u32 %v3739_v56, %v2992_v57  ;;  %v3723_v4 = vld [vmem:[#allocation6 + $0x2bc] sm:$0xf]  ;;  %v3682_v34 = vld [vmem:[#allocation6 + $0x16c] sm:$0xf0] }
  0x58   :  { %1001 = vmatpush.bf16.msra.mxu0 %v3031_v12  ;;  %1015 = vmatpush.bf16.msra.mxu1 %v3035_v13  ;;  %v2646_v12 = vld [vmem:[#allocation6 + $0xa0] sm:$0xf]  ;;  %v2928_v5 = vld [vmem:[#allocation6 + $0x2f8] sm:$0xf0] }
  0x59   :  { %1029 = vmatpush.bf16.msra.mxu2 %v3039_v14  ;;  %995 = vmatmul.bf16.vlgmr.msrb.gmra.mxu3 %v4102_v52  ;;  %v3664_v13 = vld [vmem:[#allocation6 + $0xdc] sm:$0xf0]  ;;  %v3656_v14 = vld [vmem:[#allocation6 + $0xa4] sm:$0xf] }
  0x5a   :  { %1043 = vmatpush.bf16.msra.mxu3 %v3043_v18  ;;  %981 = vmatmul.bf16.vlgmr.msrb.gmra.mxu2 %v4102_v52  ;;  %v3665_v18 = vld [vmem:[#allocation6 + $0xe4] sm:$0xf0]  ;;  %v2647_v21 = vor.u32 %v3664_v13, %v2646_v12  ;;  %v2931_v12 = vor.u32 %v3723_v4, %v2928_v5  ;;  %v2856_v13 = vld [vmem:[#allocation6 + $0x270] sm:$0xf0] }
  0x5c   :  { %1002 = vmatpush.bf16.msra.mxu0 %v2967_v24  ;;  %1016 = vmatpush.bf16.msra.mxu1 %v2971_v25  ;;  %v2651_v24 = vor.u32 %v3656_v14, %v2648_v16  ;;  %v2655_v25 = vor.u32 %v3665_v18, %v2654_v17  ;;  %v2862_v14 = vld [vmem:[#allocation6 + $0x238] sm:$0xf]  ;;  %v3707_v16 = vld [vmem:[#allocation6 + $0x23c] sm:$0xf] }
  0x5d   :  { %1030 = vmatpush.bf16.msra.mxu2 %v2975_v26  ;;  %v3640_v26 = vld [vmem:[#allocation6 + $0x24] sm:$0xf]  ;;  %v2864_v17 = vld [vmem:[#allocation6 + $0x278] sm:$0xf0] }
  0x5e   :  { %1044 = vmatpush.bf16.msra.mxu3 %v2979_v30  ;;  %v3649_v30 = vld [vmem:[#allocation6 + $0x64] sm:$0xf0]  ;;  %v2587_v40 = vor.u32 %v3640_v26, %v2584_v27  ;;  %v2798_v26 = vld [vmem:[#allocation6 + $0x1b8] sm:$0xf] }
  0x5f   :  { %v2591_v41 = vor.u32 %v3649_v30, %v2590_v28  ;;  %v3699_v27 = vld [vmem:[#allocation6 + $0x1f4] sm:$0xf0]  ;;  %v3691_v28 = vld [vmem:[#allocation6 + $0x1bc] sm:$0xf] }
  0x60   :  { %1003 = vmatpush.bf16.msra.mxu0 %v2903_v36  ;;  %1017 = vmatpush.bf16.msra.mxu1 %v2907_v37  ;;  %v2583_v36 = vor.u32 %v3648_v23, %v2582_v22  ;;  %v3048_v37 = vld [vmem:[#allocation6 + $0x3f0] sm:$0xf0]  ;;  %v3698_v22 = vld [vmem:[#allocation6 + $0x1ec] sm:$0xf0]  ;;  %v2799_v32 = vor.u32 %v3699_v27, %v2798_v26  ;;  %v3799_v26 = vld [vmem:[#allocation9 + $0x98] sm:$0xff] }
  0x61   :  { %1031 = vmatpush.bf16.msra.mxu2 %v2911_v38  ;;  %v3054_v38 = vld [vmem:[#allocation6 + $0x3b8] sm:$0xf]  ;;  %v3051_v46 = vor.u32 %v3754_v35, %v3048_v37  ;;  %v3690_v23 = vld [vmem:[#allocation6 + $0x1b4] sm:$0xf]  ;;  %v3807_v27 = vld [vmem:[#allocation9 + $0xd8] sm:$0xff] }
  0x62   :  { %1045 = vmatpush.bf16.msra.mxu3 %v2915_v42  ;;  %v3755_v42 = vld [vmem:[#allocation6 + $0x3bc] sm:$0xf]  ;;  %v3055_v47 = vor.u32 %v3763_v39, %v3054_v38  ;;  %v3674_v35 = vld [vmem:[#allocation6 + $0x134] sm:$0xf]  ;;  %v2734_v38 = vld [vmem:[#allocation6 + $0x138] sm:$0xf] }
  0x63   :  { %v3059_v51 = vor.u32 %v3755_v42, %v3056_v43  ;;  %v2728_v37 = vld [vmem:[#allocation6 + $0x170] sm:$0xf0]  ;;  %v3683_v39 = vld [vmem:[#allocation6 + $0x174] sm:$0xf0]  ;;  %v2727_v42 = vor.u32 %v3682_v34, %v2726_v33  ;;  %v3819_v34 = vld [vmem:[#allocation9 + $0x138] sm:$0xff] }
  0x64   :  { %1004 = vmatpush.bf16.msra.mxu0 %v2839_v48  ;;  %1018 = vmatpush.bf16.msra.mxu1 %v2843_v49  ;;  %v2982_v48 = vld [vmem:[#allocation6 + $0x330] sm:$0xf]  ;;  %v2731_v43 = vor.u32 %v3674_v35, %v2728_v37  ;;  %v3827_v35 = vld [vmem:[#allocation9 + $0x178] sm:$0xff]  ;;  %v3805_v37 = vld [vmem:[#allocation9 + $0xc8] sm:$0xff] }
  0x65   :  { %1032 = vmatpush.bf16.msra.mxu2 %v2847_v50  ;;  %v3746_v49 = vld [vmem:[#allocation6 + $0x36c] sm:$0xf0]  ;;  %v3738_v50 = vld [vmem:[#allocation6 + $0x334] sm:$0xf] }
  0x66   :  { %1046 = vmatpush.bf16.msra.mxu3 %v2851_v55  ;;  %v3747_v55 = vld [vmem:[#allocation6 + $0x374] sm:$0xf0]  ;;  %v2983_v58 = vor.u32 %v3746_v49, %v2982_v48  ;;  %v2987_v59 = vor.u32 %v3738_v50, %v2984_v53  ;;  %v2664_v49 = vld [vmem:[#allocation6 + $0xf0] sm:$0xf0]  ;;  %v3659_v53 = vld [vmem:[#allocation6 + $0xbc] sm:$0xf] }
  0x67   :  { %v2991_v60 = vor.u32 %v3747_v55, %v2990_v54  ;;  %v2670_v50 = vld [vmem:[#allocation6 + $0xb8] sm:$0xf]  ;;  %v2672_v54 = vld [vmem:[#allocation6 + $0xf8] sm:$0xf0]  ;;  %v3788_v33 = vld [vmem:[#allocation9 + $0x40] sm:$0xff] }
  0x68   :  { %1005 = vmatpush.bf16.msra.mxu0 %v2775_v61  ;;  %1019 = vmatpush.bf16.msra.mxu1 %v2779_v62  ;;  %v2918_v61 = vld [vmem:[#allocation6 + $0x2b0] sm:$0xf] }
  0x69   :  { %1033 = vmatpush.bf16.msra.mxu2 %v2783_v63  ;;  %v3730_v62 = vld [vmem:[#allocation6 + $0x2ec] sm:$0xf0]  ;;  %v3722_v63 = vld [vmem:[#allocation6 + $0x2b4] sm:$0xf] }
  0x6a   :  { %1047 = vmatpush.bf16.msra.mxu3 %v2787_v3  ;;  %v3731_v3 = vld [vmem:[#allocation6 + $0x2f4] sm:$0xf0]  ;;  %v2919_v6 = vor.u32 %v3730_v62, %v2918_v61  ;;  %v2923_v7 = vor.u32 %v3722_v63, %v2920_v1  ;;  %v2675_v61 = vor.u32 %v3659_v53, %v2672_v54  ;;  %v2600_v62 = vld [vmem:[#allocation6 + $0x70] sm:$0xf0]  ;;  %v3643_v1 = vld [vmem:[#allocation6 + $0x3c] sm:$0xf] }
  0x6b   :  { %v2927_v8 = vor.u32 %v3731_v3, %v2926_v2  ;;  %v2606_v63 = vld [vmem:[#allocation6 + $0x38] sm:$0xf]  ;;  %v2608_v2 = vld [vmem:[#allocation6 + $0x78] sm:$0xf0] }
  0x6c   :  { %1006 = vmatpush.bf16.msra.mxu0 %v2711_v9  ;;  %1020 = vmatpush.bf16.msra.mxu1 %v2715_v10  ;;  %v2854_v9 = vld [vmem:[#allocation6 + $0x230] sm:$0xf] }
  0x6d   :  { %1034 = vmatpush.bf16.msra.mxu2 %v2719_v11  ;;  %v3714_v10 = vld [vmem:[#allocation6 + $0x26c] sm:$0xf0]  ;;  %v3706_v11 = vld [vmem:[#allocation6 + $0x234] sm:$0xf] }
  0x6e   :  { %1048 = vmatpush.bf16.msra.mxu3 %v2723_v15  ;;  %v3715_v15 = vld [vmem:[#allocation6 + $0x274] sm:$0xf0]  ;;  %v2855_v18 = vor.u32 %v3714_v10, %v2854_v9  ;;  %v2859_v19 = vor.u32 %v3706_v11, %v2856_v13  ;;  %v3803_v9 = vld [vmem:[#allocation9 + $0xb8] sm:$0xff]  ;;  %v3786_v10 = vld [vmem:[#allocation9 + $0x30] sm:$0xff] }
  0x6f   :  { %v2863_v20 = vor.u32 %v3715_v15, %v2862_v14  ;;  %v3811_v11 = vld [vmem:[#allocation9 + $0xf8] sm:$0xff]  ;;  %v3802_v13 = vld [vmem:[#allocation9 + $0xb0] sm:$0xff]  ;;  %v3785_v14 = vld [vmem:[#allocation9 + $0x28] sm:$0xff] }
  0x70   :  { %1007 = vmatpush.bf16.msra.mxu0 %v2647_v21  ;;  %1021 = vmatpush.bf16.msra.mxu1 %v2651_v24  ;;  %v2790_v21 = vld [vmem:[#allocation6 + $0x1b0] sm:$0xf]  ;;  %v2867_v24 = vor.u32 %v3707_v16, %v2864_v17  ;;  %v3810_v15 = vld [vmem:[#allocation9 + $0xf0] sm:$0xff]  ;;  %v3793_v16 = vld [vmem:[#allocation9 + $0x68] sm:$0xff] }
  0x71   :  { %1035 = vmatpush.bf16.msra.mxu2 %v2655_v25  ;;  %v2792_v25 = vld [vmem:[#allocation6 + $0x1f0] sm:$0xf0]  ;;  %v2791_v30 = vor.u32 %v3698_v22, %v2790_v21  ;;  %v3801_v17 = vld [vmem:[#allocation9 + $0xa8] sm:$0xff] }
  0x72   :  { %1049 = vmatpush.bf16.msra.mxu3 %v2659_v29  ;;  %v2800_v29 = vld [vmem:[#allocation6 + $0x1f8] sm:$0xf0]  ;;  %v2795_v31 = vor.u32 %v3690_v23, %v2792_v25  ;;  %v3800_v21 = vld [vmem:[#allocation9 + $0xa0] sm:$0xff]  ;;  %v3791_v23 = vld [vmem:[#allocation9 + $0x58] sm:$0xff] }
  0x73   :  { %v3808_v22 = vld [vmem:[#allocation9 + $0xe0] sm:$0xff]  ;;  %v3790_v25 = vld [vmem:[#allocation9 + $0x50] sm:$0xff] }
  0x74   :  { %1008 = vmatpush.bf16.msra.mxu0 %v2583_v36  ;;  %1022 = vmatpush.bf16.msra.mxu1 %v2587_v40  ;;  %v2803_v36 = vor.u32 %v3691_v28, %v2800_v29  ;;  %v3675_v40 = vld [vmem:[#allocation6 + $0x13c] sm:$0xf] }
  0x75   :  { %1036 = vmatpush.bf16.msra.mxu2 %v2591_v41  ;;  %v2736_v41 = vld [vmem:[#allocation6 + $0x178] sm:$0xf0] }
  0x76   :  { %1050 = vmatpush.bf16.msra.mxu3 %v2595_v44  ;;  %v2735_v44 = vor.u32 %v3683_v39, %v2734_v38  ;;  %v2739_v48 = vor.u32 %v3675_v40, %v2736_v41  ;;  %v3781_v28 = vld [vmem:[#allocation9 + $0x8] sm:$0xff]  ;;  %v3818_v38 = vld [vmem:[#allocation9 + $0x130] sm:$0xff]  ;;  %v3796_v40 = vld [vmem:[#allocation9 + $0x80] sm:$0xff] }
  0x77   :  { %1009 = vmatmul.bf16.vlgmr.msra.gmra.mxu0 %v4102_v52  ;;  %1023 = vmatmul.bf16.vlgmr.msra.gmra.mxu1 %v4102_v52  ;;  %v3789_v29 = vld [vmem:[#allocation9 + $0x48] sm:$0xff]  ;;  %v3826_v39 = vld [vmem:[#allocation9 + $0x170] sm:$0xff]  ;;  %v3804_v41 = vld [vmem:[#allocation9 + $0xc0] sm:$0xff] }
  0x78   :  { %1057 = vmatpush.bf16.msrb.mxu0 %v3047_v45  ;;  %1071 = vmatpush.bf16.msrb.mxu1 %v3051_v46  ;;  %v2662_v45 = vld [vmem:[#allocation6 + $0xb0] sm:$0xf] }
  0x79   :  { %1085 = vmatpush.bf16.msrb.mxu2 %v3055_v47  ;;  %1051 = vmatmul.bf16.vlgmr.msra.gmra.mxu3 %v4102_v52  ;;  %v3666_v46 = vld [vmem:[#allocation6 + $0xec] sm:$0xf0]  ;;  %v3658_v47 = vld [vmem:[#allocation6 + $0xb4] sm:$0xf] }
  0x7a   :  { %1099 = vmatpush.bf16.msrb.mxu3 %v3059_v51  ;;  %1037 = vmatmul.bf16.vlgmr.msra.gmra.mxu2 %v4102_v52  ;;  %v3667_v51 = vld [vmem:[#allocation6 + $0xf4] sm:$0xf0]  ;;  %v2663_v55 = vor.u32 %v3666_v46, %v2662_v45  ;;  %v2667_v56 = vor.u32 %v3658_v47, %v2664_v49  ;;  %v3835_v45 = vld [vmem:[#allocation9 + $0x1b8] sm:$0xff] }
  0x7b   :  { %v2671_v57 = vor.u32 %v3667_v51, %v2670_v50  ;;  %v3843_v46 = vld [vmem:[#allocation9 + $0x1f8] sm:$0xff]  ;;  %v3825_v49 = vld [vmem:[#allocation9 + $0x168] sm:$0xff] }
  0x7c   :  { %1058 = vmatpush.bf16.msrb.mxu0 %v2983_v58  ;;  %1072 = vmatpush.bf16.msrb.mxu1 %v2987_v59  ;;  %v2598_v58 = vld [vmem:[#allocation6 + $0x30] sm:$0xf] }
  0x7d   :  { %1086 = vmatpush.bf16.msrb.mxu2 %v2991_v60  ;;  %v3650_v59 = vld [vmem:[#allocation6 + $0x6c] sm:$0xf0]  ;;  %v3642_v60 = vld [vmem:[#allocation6 + $0x34] sm:$0xf] }
  0x7e   :  { %1100 = vmatpush.bf16.msrb.mxu3 %v2995_v0  ;;  %v3651_v0 = vld [vmem:[#allocation6 + $0x74] sm:$0xf0]  ;;  %v2599_v3 = vor.u32 %v3650_v59, %v2598_v58  ;;  %v2603_v4 = vor.u32 %v3642_v60, %v2600_v62  ;;  %v3816_v60 = vld [vmem:[#allocation9 + $0x120] sm:$0xff] }
  0x7f   :  { %v2607_v5 = vor.u32 %v3651_v0, %v2606_v63 }
  0x80   :  { %1059 = vmatpush.bf16.msrb.mxu0 %v2919_v6  ;;  %1073 = vmatpush.bf16.msrb.mxu1 %v2923_v7  ;;  %v2611_v6 = vor.u32 %v3643_v1, %v2608_v2  ;;  %v3787_v7 = vld [vmem:[#allocation9 + $0x38] sm:$0xff]  ;;  %v3833_v2 = vld [vmem:[#allocation9 + $0x1a8] sm:$0xff] }
  0x81   :  { %1087 = vmatpush.bf16.msrb.mxu2 %v2927_v8  ;;  %v3795_v8 = vld [vmem:[#allocation9 + $0x78] sm:$0xff] }
  0x82   :  { %1101 = vmatpush.bf16.msrb.mxu3 %v2931_v12  ;;  %v3794_v12 = vld [vmem:[#allocation9 + $0x70] sm:$0xff] }
  0x84   :  { %1060 = vmatpush.bf16.msrb.mxu0 %v2855_v18  ;;  %1074 = vmatpush.bf16.msrb.mxu1 %v2859_v19  ;;  %v3784_v18 = vld [vmem:[#allocation9 + $0x20] sm:$0xff]  ;;  %v3809_v19 = vld [vmem:[#allocation9 + $0xe8] sm:$0xff] }
  0x85   :  { %1088 = vmatpush.bf16.msrb.mxu2 %v2863_v20  ;;  %v3792_v20 = vld [vmem:[#allocation9 + $0x60] sm:$0xff] }
  0x86   :  { %1102 = vmatpush.bf16.msrb.mxu3 %v2867_v24  ;;  %v3782_v24 = vld [vmem:[#allocation9 + $0x10] sm:$0xff] }
  0x88   :  { %1061 = vmatpush.bf16.msrb.mxu0 %v2791_v30  ;;  %1075 = vmatpush.bf16.msrb.mxu1 %v2795_v31  ;;  %v3798_v30 = vld [vmem:[#allocation9 + $0x90] sm:$0xff] }
  0x89   :  { %1089 = vmatpush.bf16.msrb.mxu2 %v2799_v32  ;;  %v3806_v31 = vld [vmem:[#allocation9 + $0xd0] sm:$0xff]  ;;  %v3780_v32 = vld [vmem:[#allocation9] sm:$0xff] }
  0x8a   :  { %1103 = vmatpush.bf16.msrb.mxu3 %v2803_v36  ;;  %v3797_v36 = vld [vmem:[#allocation9 + $0x88] sm:$0xff] }
  0x8c   :  { %1062 = vmatpush.bf16.msrb.mxu0 %v2727_v42  ;;  %1076 = vmatpush.bf16.msrb.mxu1 %v2731_v43  ;;  %v4120_v42 = vld [vmem:[#allocation8] sm:$0xff] }
  0x8d   :  { %1090 = vmatpush.bf16.msrb.mxu2 %v2735_v44  ;;  %v217_v43 = vperm.slane %v4120_v42, 0  ;;  %v218_v44 = vperm.slane %v4120_v42, 1  ;;  %v219_v54 = vperm.slane %v4120_v42, 2  ;;  %v220_v58 = vperm.slane %v4120_v42, 3 }
  0x8e   :  { %1104 = vmatpush.bf16.msrb.mxu3 %v2739_v48  ;;  %v3817_v48 = vld [vmem:[#allocation9 + $0x128] sm:$0xff] }
  0x90   :  { %1063 = vmatpush.bf16.msrb.mxu0 %v2663_v55  ;;  %1077 = vmatpush.bf16.msrb.mxu1 %v2667_v56  ;;  %v3834_v55 = vld [vmem:[#allocation9 + $0x1b0] sm:$0xff] }
  0x91   :  { %1091 = vmatpush.bf16.msrb.mxu2 %v2671_v57  ;;  %v3842_v56 = vld [vmem:[#allocation9 + $0x1f0] sm:$0xff] }
  0x92   :  { %1105 = vmatpush.bf16.msrb.mxu3 %v2675_v61  ;;  %v3824_v61 = vld [vmem:[#allocation9 + $0x160] sm:$0xff] }
  0x94   :  { %1064 = vmatpush.bf16.msrb.mxu0 %v2599_v3  ;;  %1078 = vmatpush.bf16.msrb.mxu1 %v2603_v4  ;;  %v3841_v3 = vld [vmem:[#allocation9 + $0x1e8] sm:$0xff] }
  0x95   :  { %1092 = vmatpush.bf16.msrb.mxu2 %v2607_v5 }
  0x96   :  { %1106 = vmatpush.bf16.msrb.mxu3 %v2611_v6 }
  0x97   :  { %1065 = vmatmul.bf16.vlgmr.msrb.gmra.mxu0 %v4102_v52  ;;  %1079 = vmatmul.bf16.vlgmr.msrb.gmra.mxu1 %v4102_v52 }
  0x98   :  { %2301 = vmatpush.bf16.msra.mxu0 %v3787_v7  ;;  %2315 = vmatpush.bf16.msra.mxu1 %v3795_v8  ;;  %v3815_v7 = vld [vmem:[#allocation9 + $0x118] sm:$0xff] }
  0x99   :  { %1093 = vmatmul.bf16.vlgmr.msrb.gmra.mxu2 %v4102_v52  ;;  %1107 = vmatmul.bf16.vlgmr.msrb.gmra.mxu3 %v4102_v52  ;;  %v3783_v52 = vld [vmem:[#allocation9 + $0x18] sm:$0xff] }
  0x9a   :  { %2329 = vmatpush.bf16.msra.mxu2 %v3803_v9  ;;  %2343 = vmatpush.bf16.msra.mxu3 %v3811_v11  ;;  %v3823_v8 = vld [vmem:[#allocation9 + $0x158] sm:$0xff] }
  0x9c   :  { %2302 = vmatpush.bf16.msra.mxu0 %v3786_v10  ;;  %2316 = vmatpush.bf16.msra.mxu1 %v3794_v12 }
  0x9e   :  { %2330 = vmatpush.bf16.msra.mxu2 %v3802_v13  ;;  %2344 = vmatpush.bf16.msra.mxu3 %v3810_v15  ;;  %v3832_v13 = vld [vmem:[#allocation9 + $0x1a0] sm:$0xff] }
  0xa0   :  { %2303 = vmatpush.bf16.msra.mxu0 %v3785_v14  ;;  %2317 = vmatpush.bf16.msra.mxu1 %v3793_v16  ;;  %v3840_v14 = vld [vmem:[#allocation9 + $0x1e0] sm:$0xff] }
  0xa2   :  { %2331 = vmatpush.bf16.msra.mxu2 %v3801_v17  ;;  %2345 = vmatpush.bf16.msra.mxu3 %v3809_v19  ;;  %v3822_v19 = vld [vmem:[#allocation9 + $0x150] sm:$0xff] }
  0xa4   :  { %2304 = vmatpush.bf16.msra.mxu0 %v3784_v18  ;;  %2318 = vmatpush.bf16.msra.mxu1 %v3792_v20  ;;  %v3814_v18 = vld [vmem:[#allocation9 + $0x110] sm:$0xff] }
  0xa6   :  { %2332 = vmatpush.bf16.msra.mxu2 %v3800_v21  ;;  %2346 = vmatpush.bf16.msra.mxu3 %v3808_v22 }
  0xa8   :  { %2305 = vmatpush.bf16.msra.mxu0 %v3783_v52  ;;  %2319 = vmatpush.bf16.msra.mxu1 %v3791_v23  ;;  %v3831_v23 = vld [vmem:[#allocation9 + $0x198] sm:$0xff] }
  0xaa   :  { %2333 = vmatpush.bf16.msra.mxu2 %v3799_v26  ;;  %2347 = vmatpush.bf16.msra.mxu3 %v3807_v27  ;;  %v3813_v27 = vld [vmem:[#allocation9 + $0x108] sm:$0xff] }
  0xac   :  { %2306 = vmatpush.bf16.msra.mxu0 %v3782_v24  ;;  %2320 = vmatpush.bf16.msra.mxu1 %v3790_v25  ;;  %v3839_v24 = vld [vmem:[#allocation9 + $0x1d8] sm:$0xff] }
  0xae   :  { %2334 = vmatpush.bf16.msra.mxu2 %v3798_v30  ;;  %2348 = vmatpush.bf16.msra.mxu3 %v3806_v31  ;;  %v3830_v30 = vld [vmem:[#allocation9 + $0x190] sm:$0xff] }
  0xaf   :  { %v3838_v31 = vld [vmem:[#allocation9 + $0x1d0] sm:$0xff] }
  0xb0   :  { %2307 = vmatpush.bf16.msra.mxu0 %v3781_v28  ;;  %2321 = vmatpush.bf16.msra.mxu1 %v3789_v29  ;;  %v3821_v28 = vld [vmem:[#allocation9 + $0x148] sm:$0xff] }
  0xb2   :  { %2335 = vmatpush.bf16.msra.mxu2 %v3797_v36  ;;  %2349 = vmatpush.bf16.msra.mxu3 %v3805_v37  ;;  %v3820_v36 = vld [vmem:[#allocation9 + $0x140] sm:$0xff]  ;;  %v3851_v37 = vld [vmem:[#allocation9 + $0x238] sm:$0xff] }
  0xb4   :  { %2308 = vmatpush.bf16.msra.mxu0 %v3780_v32  ;;  %2322 = vmatpush.bf16.msra.mxu1 %v3788_v33  ;;  %v898_v47 = vpop.f32.mrf.mxu0  ;;  %v912_v51 = vpop.f32.mrf.mxu1  ;;  %v3812_v33 = vld [vmem:[#allocation9 + $0x100] sm:$0xff] }
  0xb5   :  { %v899_v50 = vadd.f32 %v898_v47, %v217_v43  ;;  %v913_v53 = vadd.f32 %v912_v51, %v218_v44  ;;  %v3836_v47 = vld [vmem:[#allocation9 + $0x1c0] sm:$0xff]  ;;  %v222_v51 = vperm.slane %v4120_v42, 5 }
  0xb6   :  { %2336 = vmatpush.bf16.msra.mxu2 %v3796_v40  ;;  %2350 = vmatpush.bf16.msra.mxu3 %v3804_v41 }
  0xb7   :  { %v1113_v57 = vmax.f32 %v899_v50, 0.0  ;;  %v1114_v59 = vmax.f32 %v913_v53, 0.0  ;;  %v3850_v53 = vld [vmem:[#allocation9 + $0x230] sm:$0xff] }
  0xb8   :  { %2357 = vmatpush.bf16.msrb.mxu0 %v3819_v34  ;;  %2371 = vmatpush.bf16.msrb.mxu1 %v3827_v35 }
  0xb9   :  { %v1145_v63 = vpack.c.bf16 %v1114_v59, %v1113_v57 }
  0xba   :  { %2385 = vmatpush.bf16.msrb.mxu2 %v3835_v45  ;;  %2399 = vmatpush.bf16.msrb.mxu3 %v3843_v46  ;;  %v3828_v46 = vld [vmem:[#allocation9 + $0x180] sm:$0xff] }
  0xbb   :  { %1161 = vst [vmem:[#allocation2] sm:$0xff] %v1145_v63 }
  0xbc   :  { %2358 = vmatpush.bf16.msrb.mxu0 %v3818_v38  ;;  %2372 = vmatpush.bf16.msrb.mxu1 %v3826_v39  ;;  %v940_v1 = vpop.f32.mrf.mxu3  ;;  %v900_v6 = vpop.f32.mrf.mxu0  ;;  %v3829_v38 = vld [vmem:[#allocation9 + $0x188] sm:$0xff] }
  0xbd   :  { %v926_v62 = vpop.f32.mrf.mxu2  ;;  %v941_v4 = vadd.f32 %v940_v1, %v220_v58  ;;  %v901_v10 = vadd.f32 %v900_v6, %v217_v43  ;;  %v914_v11 = vpop.f32.mrf.mxu1  ;;  %v3837_v39 = vld [vmem:[#allocation9 + $0x1c8] sm:$0xff]  ;;  %v3859_v43 = vld [vmem:[#allocation9 + $0x278] sm:$0xff]  ;;  %v3866_v6 = vld [vmem:[#allocation9 + $0x2b0] sm:$0xff] }
  0xbe   :  { %2386 = vmatpush.bf16.msrb.mxu2 %v3834_v55  ;;  %2400 = vmatpush.bf16.msrb.mxu3 %v3842_v56  ;;  %v927_v0 = vadd.f32 %v926_v62, %v219_v54  ;;  %v915_v12 = vadd.f32 %v914_v11, %v218_v44  ;;  %v3858_v56 = vld [vmem:[#allocation9 + $0x270] sm:$0xff]  ;;  %v3848_v11 = vld [vmem:[#allocation9 + $0x220] sm:$0xff] }
  0xbf   :  { %v1116_v9 = vmax.f32 %v941_v4, 0.0  ;;  %v1129_v16 = vmax.f32 %v901_v10, 0.0 }
  0xc0   :  { %2359 = vmatpush.bf16.msrb.mxu0 %v3817_v48  ;;  %2373 = vmatpush.bf16.msrb.mxu1 %v3825_v49  ;;  %v1115_v5 = vmax.f32 %v927_v0, 0.0  ;;  %v1130_v17 = vmax.f32 %v915_v12, 0.0  ;;  %v221_v48 = vperm.slane %v4120_v42, 4  ;;  %v3856_v12 = vld [vmem:[#allocation9 + $0x260] sm:$0xff] }
  0xc2   :  { %2387 = vmatpush.bf16.msrb.mxu2 %v3833_v2  ;;  %2401 = vmatpush.bf16.msrb.mxu3 %v3841_v3  ;;  %v1146_v15 = vpack.c.bf16 %v1116_v9, %v1115_v5  ;;  %v1153_v21 = vpack.c.bf16 %v1130_v17, %v1129_v16  ;;  %v3062_v34 = vld [vmem:[#allocation2] sm:$0xf]  ;;  %v3764_v35 = vld [vmem:[#allocation2 + $0x4] sm:$0xf]  ;;  %v3849_v2 = vld [vmem:[#allocation9 + $0x228] sm:$0xff]  ;;  %v223_v5 = vperm.slane %v4120_v42, 6 }
  0xc3   :  { %v3857_v3 = vld [vmem:[#allocation9 + $0x268] sm:$0xff] }
  0xc4   :  { %2360 = vmatpush.bf16.msrb.mxu0 %v3816_v60  ;;  %2374 = vmatpush.bf16.msrb.mxu1 %v3824_v61  ;;  %1162 = vst [vmem:[#allocation2 + $0x8] sm:$0xff] %v1146_v15  ;;  %v942_v22 = vpop.f32.mrf.mxu3  ;;  %v3867_v60 = vld [vmem:[#allocation9 + $0x2b8] sm:$0xff]  ;;  %v3865_v16 = vld [vmem:[#allocation9 + $0x2a8] sm:$0xff] }
  0xc5   :  { %v928_v20 = vpop.f32.mrf.mxu2  ;;  %v943_v25 = vadd.f32 %v942_v22, %v220_v58  ;;  %1169 = vst [vmem:[#allocation2 + $0x40] sm:$0xff] %v1153_v21  ;;  %v3875_v61 = vld [vmem:[#allocation9 + $0x2f8] sm:$0xff]  ;;  %v3873_v17 = vld [vmem:[#allocation9 + $0x2e8] sm:$0xff] }
  0xc6   :  { %2388 = vmatpush.bf16.msrb.mxu2 %v3832_v13  ;;  %2402 = vmatpush.bf16.msrb.mxu3 %v3840_v14  ;;  %v929_v52 = vadd.f32 %v928_v20, %v219_v54 }
  0xc7   :  { %v1132_v29 = vmax.f32 %v943_v25, 0.0 }
  0xc8   :  { %2361 = vmatpush.bf16.msrb.mxu0 %v3815_v7  ;;  %2375 = vmatpush.bf16.msrb.mxu1 %v3823_v8  ;;  %v1131_v26 = vmax.f32 %v929_v52, 0.0  ;;  %v3874_v7 = vld [vmem:[#allocation9 + $0x2f0] sm:$0xff]  ;;  %v224_v8 = vperm.slane %v4120_v42, 7 }
  0xca   :  { %2389 = vmatpush.bf16.msrb.mxu2 %v3831_v23  ;;  %2403 = vmatpush.bf16.msrb.mxu3 %v3839_v24  ;;  %v1154_v32 = vpack.c.bf16 %v1132_v29, %v1131_v26  ;;  %v3847_v23 = vld [vmem:[#allocation9 + $0x218] sm:$0xff]  ;;  %v3864_v26 = vld [vmem:[#allocation9 + $0x2a0] sm:$0xff] }
  0xcb   :  { %v3070_v49 = vld [vmem:[#allocation2 + $0x8] sm:$0xf]  ;;  %v3765_v50 = vld [vmem:[#allocation2 + $0xc] sm:$0xf]  ;;  %v3855_v24 = vld [vmem:[#allocation9 + $0x258] sm:$0xff] }
  0xcc   :  { %2362 = vmatpush.bf16.msrb.mxu0 %v3814_v18  ;;  %2376 = vmatpush.bf16.msrb.mxu1 %v3822_v19  ;;  %1170 = vst [vmem:[#allocation2 + $0x48] sm:$0xff] %v1154_v32  ;;  %v3772_v40 = vld [vmem:[#allocation2 + $0x3c] sm:$0xf0]  ;;  %v3064_v41 = vld [vmem:[#allocation2 + $0x40] sm:$0xf0]  ;;  %v3854_v32 = vld [vmem:[#allocation9 + $0x250] sm:$0xff] }
  0xcd   :  { %v3063_v44 = vor.u32 %v3772_v40, %v3062_v34  ;;  %v3067_v45 = vor.u32 %v3764_v35, %v3064_v41  ;;  %v3863_v35 = vld [vmem:[#allocation9 + $0x298] sm:$0xff]  ;;  %v3845_v40 = vld [vmem:[#allocation9 + $0x208] sm:$0xff] }
  0xce   :  { %2390 = vmatpush.bf16.msrb.mxu2 %v3830_v30  ;;  %2404 = vmatpush.bf16.msrb.mxu3 %v3838_v31  ;;  %v3846_v31 = vld [vmem:[#allocation9 + $0x210] sm:$0xff]  ;;  %v3853_v41 = vld [vmem:[#allocation9 + $0x248] sm:$0xff] }
  0xcf   :  { %2309 = vmatmul.bf16.vlgmr.msra.gmra.mxu0 %v3063_v44  ;;  %2323 = vmatmul.bf16.vlgmr.msra.gmra.mxu1 %v3067_v45  ;;  %v3870_v44 = vld [vmem:[#allocation9 + $0x2d0] sm:$0xff] }
  0xd0   :  { %2363 = vmatpush.bf16.msrb.mxu0 %v3813_v27  ;;  %2377 = vmatpush.bf16.msrb.mxu1 %v3821_v28  ;;  %v3872_v27 = vld [vmem:[#allocation9 + $0x2e0] sm:$0xff] }
  0xd2   :  { %2391 = vmatpush.bf16.msrb.mxu2 %v3829_v38  ;;  %2405 = vmatpush.bf16.msrb.mxu3 %v3837_v39 }
  0xd3   :  { %v3773_v54 = vld [vmem:[#allocation2 + $0x44] sm:$0xf0]  ;;  %v3072_v55 = vld [vmem:[#allocation2 + $0x48] sm:$0xf0] }
  0xd4   :  { %2364 = vmatpush.bf16.msrb.mxu0 %v3812_v33  ;;  %2378 = vmatpush.bf16.msrb.mxu1 %v3820_v36  ;;  %v954_v57 = vpop.f32.mrf.mxu0  ;;  %v3071_v58 = vor.u32 %v3773_v54, %v3070_v49  ;;  %v3075_v59 = vor.u32 %v3765_v50, %v3072_v55  ;;  %v968_v63 = vpop.f32.mrf.mxu1  ;;  %v3871_v36 = vld [vmem:[#allocation9 + $0x2d8] sm:$0xff] }
  0xd5   :  { %v955_v62 = vadd.f32 %v954_v57, %v221_v48  ;;  %v969_v0 = vadd.f32 %v968_v63, %v222_v51  ;;  %v4130_v55 = vld [vmem:[#allocation8 + $0x8] sm:$0xff] }
  0xd6   :  { %2392 = vmatpush.bf16.msrb.mxu2 %v3828_v46  ;;  %2406 = vmatpush.bf16.msrb.mxu3 %v3836_v47  ;;  %v3891_v57 = vld [vmem:[#allocation9 + $0x378] sm:$0xff] }
  0xd7   :  { %2337 = vmatmul.bf16.vlgmr.msra.gmra.mxu2 %v3071_v58  ;;  %2351 = vmatmul.bf16.vlgmr.msra.gmra.mxu3 %v3075_v59  ;;  %v1117_v1 = vmax.f32 %v955_v62, 0.0  ;;  %v1118_v4 = vmax.f32 %v969_v0, 0.0  ;;  %v3861_v58 = vld [vmem:[#allocation9 + $0x288] sm:$0xff]  ;;  %v226_v62 = vperm.slane %v4130_v55, 1  ;;  %v3882_v0 = vld [vmem:[#allocation9 + $0x330] sm:$0xff] }
  0xd8   :  { %2413 = vmatpush.bf16.msra.mxu0 %v3851_v37  ;;  %2427 = vmatpush.bf16.msra.mxu1 %v3859_v43  ;;  %v3862_v43 = vld [vmem:[#allocation9 + $0x290] sm:$0xff]  ;;  %v3869_v59 = vld [vmem:[#allocation9 + $0x2c8] sm:$0xff] }
  0xd9   :  { %v1147_v9 = vpack.c.bf16 %v1118_v4, %v1117_v1  ;;  %v3890_v1 = vld [vmem:[#allocation9 + $0x370] sm:$0xff] }
  0xda   :  { %2441 = vmatpush.bf16.msra.mxu2 %v3867_v60  ;;  %2455 = vmatpush.bf16.msra.mxu3 %v3875_v61  ;;  %v225_v60 = vperm.slane %v4130_v55, 0 }
  0xdb   :  { %1163 = vst [vmem:[#allocation2 + $0x10] sm:$0xff] %v1147_v9 }
  0xdc   :  { %2414 = vmatpush.bf16.msra.mxu0 %v3850_v53  ;;  %2428 = vmatpush.bf16.msra.mxu1 %v3858_v56  ;;  %v996_v14 = vpop.f32.mrf.mxu3  ;;  %v956_v15 = vpop.f32.mrf.mxu0  ;;  %v3883_v56 = vld [vmem:[#allocation9 + $0x338] sm:$0xff] }
  0xdd   :  { %v982_v10 = vpop.f32.mrf.mxu2  ;;  %v997_v18 = vadd.f32 %v996_v14, %v224_v8  ;;  %v957_v19 = vadd.f32 %v956_v15, %v221_v48  ;;  %v970_v20 = vpop.f32.mrf.mxu1  ;;  %v3844_v48 = vld [vmem:[#allocation9 + $0x200] sm:$0xff]  ;;  %v3881_v14 = vld [vmem:[#allocation9 + $0x328] sm:$0xff] }
  0xde   :  { %v983_v13 = vadd.f32 %v982_v10, %v223_v5  ;;  %2442 = vmatpush.bf16.msra.mxu2 %v3866_v6  ;;  %2456 = vmatpush.bf16.msra.mxu3 %v3874_v7  ;;  %v971_v52 = vadd.f32 %v970_v20, %v222_v51  ;;  %v3852_v51 = vld [vmem:[#allocation9 + $0x240] sm:$0xff]  ;;  %v3889_v15 = vld [vmem:[#allocation9 + $0x368] sm:$0xff]  ;;  %v3898_v20 = vld [vmem:[#allocation9 + $0x3b0] sm:$0xff] }
  0xdf   :  { %v1120_v42 = vmax.f32 %v997_v18, 0.0  ;;  %v1133_v22 = vmax.f32 %v957_v19, 0.0  ;;  %v3868_v6 = vld [vmem:[#allocation9 + $0x2c0] sm:$0xff]  ;;  %v227_v18 = vperm.slane %v4130_v55, 2  ;;  %v228_v19 = vperm.slane %v4130_v55, 3 }
  0xe0   :  { %2415 = vmatpush.bf16.msra.mxu0 %v3849_v2  ;;  %2429 = vmatpush.bf16.msra.mxu1 %v3857_v3  ;;  %v1119_v21 = vmax.f32 %v983_v13, 0.0  ;;  %v1134_v25 = vmax.f32 %v971_v52, 0.0  ;;  %v3860_v2 = vld [vmem:[#allocation9 + $0x280] sm:$0xff] }
  0xe2   :  { %2443 = vmatpush.bf16.msra.mxu2 %v3865_v16  ;;  %2457 = vmatpush.bf16.msra.mxu3 %v3873_v17  ;;  %v1148_v28 = vpack.c.bf16 %v1120_v42, %v1119_v21  ;;  %v1155_v29 = vpack.c.bf16 %v1134_v25, %v1133_v22  ;;  %v3078_v46 = vld [vmem:[#allocation2 + $0x10] sm:$0xf]  ;;  %v3766_v47 = vld [vmem:[#allocation2 + $0x14] sm:$0xf]  ;;  %v3880_v42 = vld [vmem:[#allocation9 + $0x320] sm:$0xff] }
  0xe3   :  { %v3906_v21 = vld [vmem:[#allocation9 + $0x3f0] sm:$0xff]  ;;  %v3888_v22 = vld [vmem:[#allocation9 + $0x360] sm:$0xff] }
  0xe4   :  { %2416 = vmatpush.bf16.msra.mxu0 %v3848_v11  ;;  %2430 = vmatpush.bf16.msra.mxu1 %v3856_v12  ;;  %1164 = vst [vmem:[#allocation2 + $0x18] sm:$0xff] %v1148_v28  ;;  %v998_v34 = vpop.f32.mrf.mxu3  ;;  %v3899_v11 = vld [vmem:[#allocation9 + $0x3b8] sm:$0xff] }
  0xe5   :  { %v984_v30 = vpop.f32.mrf.mxu2  ;;  %1171 = vst [vmem:[#allocation2 + $0x50] sm:$0xff] %v1155_v29  ;;  %v999_v37 = vadd.f32 %v998_v34, %v224_v8  ;;  %v3907_v12 = vld [vmem:[#allocation9 + $0x3f8] sm:$0xff] }
  0xe6   :  { %v985_v33 = vadd.f32 %v984_v30, %v223_v5  ;;  %2444 = vmatpush.bf16.msra.mxu2 %v3864_v26  ;;  %2458 = vmatpush.bf16.msra.mxu3 %v3872_v27  ;;  %v3897_v30 = vld [vmem:[#allocation9 + $0x3a8] sm:$0xff]  ;;  %v3879_v34 = vld [vmem:[#allocation9 + $0x318] sm:$0xff] }
  0xe7   :  { %v1136_v39 = vmax.f32 %v999_v37, 0.0 }
  0xe8   :  { %2417 = vmatpush.bf16.msra.mxu0 %v3847_v23  ;;  %2431 = vmatpush.bf16.msra.mxu1 %v3855_v24  ;;  %v1135_v38 = vmax.f32 %v985_v33, 0.0 }
  0xea   :  { %2445 = vmatpush.bf16.msra.mxu2 %v3863_v35  ;;  %2459 = vmatpush.bf16.msra.mxu3 %v3871_v36  ;;  %v1156_v45 = vpack.c.bf16 %v1136_v39, %v1135_v38  ;;  %v3887_v35 = vld [vmem:[#allocation9 + $0x358] sm:$0xff] }
  0xeb   :  { %v3086_v61 = vld [vmem:[#allocation2 + $0x18] sm:$0xf]  ;;  %v3767_v63 = vld [vmem:[#allocation2 + $0x1c] sm:$0xf] }
  0xec   :  { %2418 = vmatpush.bf16.msra.mxu0 %v3846_v31  ;;  %2432 = vmatpush.bf16.msra.mxu1 %v3854_v32  ;;  %1172 = vst [vmem:[#allocation2 + $0x58] sm:$0xff] %v1156_v45  ;;  %v3774_v49 = vld [vmem:[#allocation2 + $0x4c] sm:$0xf0]  ;;  %v3080_v50 = vld [vmem:[#allocation2 + $0x50] sm:$0xf0]  ;;  %v3905_v31 = vld [vmem:[#allocation9 + $0x3e8] sm:$0xff] }
  0xed   :  { %v3079_v53 = vor.u32 %v3774_v49, %v3078_v46  ;;  %v3083_v54 = vor.u32 %v3766_v47, %v3080_v50  ;;  %v3886_v45 = vld [vmem:[#allocation9 + $0x350] sm:$0xff]  ;;  %v3895_v50 = vld [vmem:[#allocation9 + $0x398] sm:$0xff] }
  0xee   :  { %2446 = vmatpush.bf16.msra.mxu2 %v3862_v43  ;;  %2460 = vmatpush.bf16.msra.mxu3 %v3870_v44  ;;  %v3878_v44 = vld [vmem:[#allocation9 + $0x310] sm:$0xff] }
  0xef   :  { %2365 = vmatmul.bf16.vlgmr.msrb.gmra.mxu0 %v3079_v53  ;;  %2379 = vmatmul.bf16.vlgmr.msrb.gmra.mxu1 %v3083_v54  ;;  %v3877_v54 = vld [vmem:[#allocation9 + $0x308] sm:$0xff] }
  0xf0   :  { %2419 = vmatpush.bf16.msra.mxu0 %v3845_v40  ;;  %2433 = vmatpush.bf16.msra.mxu1 %v3853_v41  ;;  %v3896_v40 = vld [vmem:[#allocation9 + $0x3a0] sm:$0xff] }
  0xf1   :  { %v3904_v41 = vld [vmem:[#allocation9 + $0x3e0] sm:$0xff] }
  0xf2   :  { %2447 = vmatpush.bf16.msra.mxu2 %v3861_v58  ;;  %2461 = vmatpush.bf16.msra.mxu3 %v3869_v59 }
  0xf3   :  { %v3775_v4 = vld [vmem:[#allocation2 + $0x54] sm:$0xf0]  ;;  %v3088_v5 = vld [vmem:[#allocation2 + $0x58] sm:$0xf0] }
  0xf4   :  { %2420 = vmatpush.bf16.msra.mxu0 %v3844_v48  ;;  %2434 = vmatpush.bf16.msra.mxu1 %v3852_v51  ;;  %v1010_v3 = vpop.f32.mrf.mxu0  ;;  %v1024_v8 = vpop.f32.mrf.mxu1  ;;  %v3087_v9 = vor.u32 %v3775_v4, %v3086_v61  ;;  %v3091_v10 = vor.u32 %v3767_v63, %v3088_v5  ;;  %v3903_v51 = vld [vmem:[#allocation9 + $0x3d8] sm:$0xff]  ;;  %v3894_v61 = vld [vmem:[#allocation9 + $0x390] sm:$0xff]  ;;  %v3876_v63 = vld [vmem:[#allocation9 + $0x300] sm:$0xff] }
  0xf5   :  { %v1011_v7 = vadd.f32 %v1010_v3, %v225_v60  ;;  %v1025_v13 = vadd.f32 %v1024_v8, %v226_v62  ;;  %v3893_v5 = vld [vmem:[#allocation9 + $0x388] sm:$0xff]  ;;  %v230_v8 = vperm.slane %v4130_v55, 5 }
  0xf6   :  { %2393 = vmatmul.bf16.vlgmr.msrb.gmra.mxu2 %v3087_v9  ;;  %2407 = vmatmul.bf16.vlgmr.msrb.gmra.mxu3 %v3091_v10 }
  0xf7   :  { %v1121_v16 = vmax.f32 %v1011_v7, 0.0  ;;  %v1122_v17 = vmax.f32 %v1025_v13, 0.0  ;;  %2448 = vmatpush.bf16.msra.mxu2 %v3860_v2  ;;  %2462 = vmatpush.bf16.msra.mxu3 %v3868_v6  ;;  %v3884_v2 = vld [vmem:[#allocation9 + $0x340] sm:$0xff]  ;;  %v3901_v6 = vld [vmem:[#allocation9 + $0x3c8] sm:$0xff]  ;;  %v229_v7 = vperm.slane %v4130_v55, 4 }
  0xf8   :  { %2469 = vmatpush.bf16.msrb.mxu0 %v3883_v56  ;;  %2483 = vmatpush.bf16.msrb.mxu1 %v3891_v57  ;;  %v3885_v56 = vld [vmem:[#allocation9 + $0x348] sm:$0xff] }
  0xf9   :  { %v1149_v52 = vpack.c.bf16 %v1122_v17, %v1121_v16  ;;  %v3900_v17 = vld [vmem:[#allocation9 + $0x3c0] sm:$0xff] }
  0xfb   :  { %2497 = vmatpush.bf16.msrb.mxu2 %v3899_v11  ;;  %2511 = vmatpush.bf16.msrb.mxu3 %v3907_v12  ;;  %1165 = vst [vmem:[#allocation2 + $0x20] sm:$0xff] %v1149_v52  ;;  %v3892_v12 = vld [vmem:[#allocation9 + $0x380] sm:$0xff] }
  0xfc   :  { %2470 = vmatpush.bf16.msrb.mxu0 %v3882_v0  ;;  %2484 = vmatpush.bf16.msrb.mxu1 %v3890_v1  ;;  %v1052_v25 = vpop.f32.mrf.mxu3  ;;  %v1012_v26 = vpop.f32.mrf.mxu0 }
  0xfd   :  { %v1038_v23 = vpop.f32.mrf.mxu2  ;;  %v1053_v27 = vadd.f32 %v1052_v25, %v228_v19  ;;  %v1013_v28 = vadd.f32 %v1012_v26, %v225_v60  ;;  %v1026_v29 = vpop.f32.mrf.mxu1 }
  0xfe   :  { %v1039_v24 = vadd.f32 %v1038_v23, %v227_v18  ;;  %v1027_v33 = vadd.f32 %v1026_v29, %v226_v62  ;;  %v3902_v62 = vld [vmem:[#allocation9 + $0x3d0] sm:$0xff] }
  0xff   :  { %2498 = vmatpush.bf16.msrb.mxu2 %v3898_v20  ;;  %2512 = vmatpush.bf16.msrb.mxu3 %v3906_v21  ;;  %v1124_v36 = vmax.f32 %v1053_v27, 0.0  ;;  %v1137_v37 = vmax.f32 %v1013_v28, 0.0 }
 0x100   :  { %2471 = vmatpush.bf16.msrb.mxu0 %v3881_v14  ;;  %2485 = vmatpush.bf16.msrb.mxu1 %v3889_v15  ;;  %v1123_v32 = vmax.f32 %v1039_v24, 0.0  ;;  %v1138_v38 = vmax.f32 %v1027_v33, 0.0 }
 0x102   :  { %v1150_v39 = vpack.c.bf16 %v1124_v36, %v1123_v32  ;;  %v1157_v43 = vpack.c.bf16 %v1138_v38, %v1137_v37  ;;  %v3094_v58 = vld [vmem:[#allocation2 + $0x20] sm:$0xf]  ;;  %v3768_v60 = vld [vmem:[#allocation2 + $0x24] sm:$0xf] }
 0x103   :  { %2499 = vmatpush.bf16.msrb.mxu2 %v3897_v30  ;;  %2513 = vmatpush.bf16.msrb.mxu3 %v3905_v31 }
 0x104   :  { %2472 = vmatpush.bf16.msrb.mxu0 %v3880_v42  ;;  %2486 = vmatpush.bf16.msrb.mxu1 %v3888_v22  ;;  %1166 = vst [vmem:[#allocation2 + $0x28] sm:$0xff] %v1150_v39  ;;  %v1054_v48 = vpop.f32.mrf.mxu3  ;;  %v231_v42 = vperm.slane %v4130_v55, 6  ;;  %v232_v22 = vperm.slane %v4130_v55, 7 }
 0x105   :  { %v1040_v46 = vpop.f32.mrf.mxu2  ;;  %1173 = vst [vmem:[#allocation2 + $0x60] sm:$0xff] %v1157_v43  ;;  %v1055_v49 = vadd.f32 %v1054_v48, %v228_v19 }
 0x106   :  { %v1041_v47 = vadd.f32 %v1040_v46, %v227_v18 }
 0x107   :  { %2500 = vmatpush.bf16.msrb.mxu2 %v3896_v40  ;;  %2514 = vmatpush.bf16.msrb.mxu3 %v3904_v41  ;;  %v1140_v57 = vmax.f32 %v1055_v49, 0.0 }
 0x108   :  { %2473 = vmatpush.bf16.msrb.mxu0 %v3879_v34  ;;  %2487 = vmatpush.bf16.msrb.mxu1 %v3887_v35  ;;  %v1139_v53 = vmax.f32 %v1041_v47, 0.0 }
 0x10a   :  { %v1158_v59 = vpack.c.bf16 %v1140_v57, %v1139_v53 }
 0x10b   :  { %2501 = vmatpush.bf16.msrb.mxu2 %v3895_v50  ;;  %2515 = vmatpush.bf16.msrb.mxu3 %v3903_v51  ;;  %v3102_v9 = vld [vmem:[#allocation2 + $0x28] sm:$0xf]  ;;  %v3769_v10 = vld [vmem:[#allocation2 + $0x2c] sm:$0xf] }
 0x10c   :  { %2474 = vmatpush.bf16.msrb.mxu0 %v3878_v44  ;;  %2488 = vmatpush.bf16.msrb.mxu1 %v3886_v45  ;;  %1174 = vst [vmem:[#allocation2 + $0x68] sm:$0xff] %v1158_v59  ;;  %v3776_v0 = vld [vmem:[#allocation2 + $0x5c] sm:$0xf0]  ;;  %v3096_v1 = vld [vmem:[#allocation2 + $0x60] sm:$0xf0] }
 0x10d   :  { %v3095_v3 = vor.u32 %v3776_v0, %v3094_v58  ;;  %v3099_v4 = vor.u32 %v3768_v60, %v3096_v1  ;;  %v3918_v1 = vld [vmem:[%s4153_s4] ss:$0 sm:$0xff]  ;;  %s4056_s4 = smov [#allocation11]  }
 0x10e   :  { %s2531_s16 = sshll.u32 %s4056_s4, 4  ;;  %s2532_s16 = int_to_ptr.vmem [resolvable:$true] %s2531_s16 }
 0x10f   :  { %2502 = vmatpush.bf16.msrb.mxu2 %v3894_v61  ;;  %2516 = vmatpush.bf16.msrb.mxu3 %v3902_v62 }
 0x110   :  { %2475 = vmatpush.bf16.msrb.mxu0 %v3877_v54  ;;  %2489 = vmatpush.bf16.msrb.mxu1 %v3885_v56 }
 0x111   :  { %2421 = vmatmul.bf16.vlgmr.msra.gmra.mxu0 %v3095_v3  ;;  %2435 = vmatmul.bf16.vlgmr.msra.gmra.mxu1 %v3099_v4 }
 0x113   :  { %2503 = vmatpush.bf16.msrb.mxu2 %v3893_v5  ;;  %2517 = vmatpush.bf16.msrb.mxu3 %v3901_v6  ;;  %v3777_v15 = vld [vmem:[#allocation2 + $0x64] sm:$0xf0]  ;;  %v3104_v16 = vld [vmem:[#allocation2 + $0x68] sm:$0xf0] }
 0x114   :  { %2476 = vmatpush.bf16.msrb.mxu0 %v3876_v63  ;;  %2490 = vmatpush.bf16.msrb.mxu1 %v3884_v2  ;;  %v1066_v11 = vpop.f32.mrf.mxu0  ;;  %v1080_v14 = vpop.f32.mrf.mxu1  ;;  %v3103_v19 = vor.u32 %v3777_v15, %v3102_v9  ;;  %v3107_v20 = vor.u32 %v3769_v10, %v3104_v16 }
 0x115   :  { %v1067_v13 = vadd.f32 %v1066_v11, %v229_v7  ;;  %v1081_v18 = vadd.f32 %v1080_v14, %v230_v8 }
 0x116   :  { %2449 = vmatmul.bf16.vlgmr.msra.gmra.mxu2 %v3103_v19  ;;  %2463 = vmatmul.bf16.vlgmr.msra.gmra.mxu3 %v3107_v20 }
 0x117   :  { %v1125_v21 = vmax.f32 %v1067_v13, 0.0  ;;  %v1126_v52 = vmax.f32 %v1081_v18, 0.0  ;;  %2504 = vmatpush.bf16.msrb.mxu2 %v3892_v12  ;;  %2518 = vmatpush.bf16.msrb.mxu3 %v3900_v17 }
 0x119   :  { %v1151_v23 = vpack.c.bf16 %v1126_v52, %v1125_v21 }
 0x11b   :  { %1167 = vst [vmem:[#allocation2 + $0x30] sm:$0xff] %v1151_v23 }
 0x11c   :  { %v1094_v24 = vpop.f32.mrf.mxu2  ;;  %v1108_v26 = vpop.f32.mrf.mxu3 }
 0x11d   :  { %v1095_v25 = vadd.f32 %v1094_v24, %v231_v42  ;;  %v1068_v27 = vpop.f32.mrf.mxu0  ;;  %v1109_v28 = vadd.f32 %v1108_v26, %v232_v22  ;;  %v1082_v30 = vpop.f32.mrf.mxu1 }
 0x11e   :  { %v1069_v29 = vadd.f32 %v1068_v27, %v229_v7  ;;  %v1083_v32 = vadd.f32 %v1082_v30, %v230_v8 }
 0x11f   :  { %v1127_v31 = vmax.f32 %v1095_v25, 0.0  ;;  %v1128_v33 = vmax.f32 %v1109_v28, 0.0 }
 0x120   :  { %v1141_v34 = vmax.f32 %v1069_v29, 0.0  ;;  %v1142_v35 = vmax.f32 %v1083_v32, 0.0 }
 0x121   :  { %v1152_v36 = vpack.c.bf16 %v1128_v33, %v1127_v31 }
 0x122   :  { %v1159_v37 = vpack.c.bf16 %v1142_v35, %v1141_v34  ;;  %v3110_v45 = vld [vmem:[#allocation2 + $0x30] sm:$0xf]  ;;  %v3770_v46 = vld [vmem:[#allocation2 + $0x34] sm:$0xf] }
 0x123   :  { %1168 = vst [vmem:[#allocation2 + $0x38] sm:$0xff] %v1152_v36 }
 0x124   :  { %v1096_v55 = vpop.f32.mrf.mxu2  ;;  %1175 = vst [vmem:[#allocation2 + $0x70] sm:$0xff] %v1159_v37  ;;  %v1110_v39 = vpop.f32.mrf.mxu3 }
 0x125   :  { %v1097_v38 = vadd.f32 %v1096_v55, %v231_v42  ;;  %v1111_v40 = vadd.f32 %v1110_v39, %v232_v22 }
 0x127   :  { %v1143_v41 = vmax.f32 %v1097_v38, 0.0  ;;  %v1144_v43 = vmax.f32 %v1111_v40, 0.0 }
 0x129   :  { %v1160_v44 = vpack.c.bf16 %v1144_v43, %v1143_v41 }
 0x12a   :  { %v3118_v51 = vld [vmem:[#allocation2 + $0x38] sm:$0xf]  ;;  %v3771_v54 = vld [vmem:[#allocation2 + $0x3c] sm:$0xf] }
 0x12b   :  { %1176 = vst [vmem:[#allocation2 + $0x78] sm:$0xff] %v1160_v44  ;;  %v3778_v47 = vld [vmem:[#allocation2 + $0x6c] sm:$0xf0]  ;;  %v3112_v48 = vld [vmem:[#allocation2 + $0x70] sm:$0xf0] }
 0x12c   :  { %v3111_v49 = vor.u32 %v3778_v47, %v3110_v45  ;;  %v3115_v50 = vor.u32 %v3770_v46, %v3112_v48 }
 0x12e   :  { %2477 = vmatmul.bf16.vlgmr.msrb.gmra.mxu0 %v3111_v49  ;;  %2491 = vmatmul.bf16.vlgmr.msrb.gmra.mxu1 %v3115_v50 }
 0x132   :  { %v3779_v53 = vld [vmem:[#allocation2 + $0x74] sm:$0xf0]  ;;  %v3120_v56 = vld [vmem:[#allocation2 + $0x78] sm:$0xf0] }
 0x133   :  { %v3119_v57 = vor.u32 %v3779_v53, %v3118_v51  ;;  %v3123_v58 = vor.u32 %v3771_v54, %v3120_v56 }
 0x135   :  { %2505 = vmatmul.bf16.vlgmr.msrb.gmra.mxu2 %v3119_v57  ;;  %2519 = vmatmul.bf16.vlgmr.msrb.gmra.mxu3 %v3123_v58 }
 0x14c   :  { %v2310_v59 = vpop.f32.mrf.mxu0  ;;  %v2324_v60 = vpop.f32.mrf.mxu1 }
 0x14d   :  { %v2311_v3 = vadd.f32 %v3918_v1, %v2310_v59 }
 0x14f   :  { %v2325_v6 = vadd.f32 %v2324_v60, %v2311_v3 }
 0x154   :  { %v2312_v61 = vpop.f32.mrf.mxu0  ;;  %v2326_v0 = vpop.f32.mrf.mxu1 }
 0x155   :  { %v2313_v12 = vadd.f32 %v3918_v1, %v2312_v61 }
 0x157   :  { %v2327_v14 = vadd.f32 %v2326_v0, %v2313_v12 }
 0x15a   :  { %v2338_v62 = vpop.f32.mrf.mxu2  ;;  %v2352_v63 = vpop.f32.mrf.mxu3 }
 0x15b   :  { %v2339_v8 = vadd.f32 %v2338_v62, %v2325_v6 }
 0x15d   :  { %v2353_v13 = vadd.f32 %v2352_v63, %v2339_v8 }
 0x162   :  { %v2340_v4 = vpop.f32.mrf.mxu2  ;;  %v2354_v5 = vpop.f32.mrf.mxu3 }
 0x163   :  { %v2341_v18 = vadd.f32 %v2340_v4, %v2327_v14 }
 0x165   :  { %v2355_v52 = vadd.f32 %v2354_v5, %v2341_v18 }
 0x16c   :  { %v2366_v2 = vpop.f32.mrf.mxu0  ;;  %v2380_v7 = vpop.f32.mrf.mxu1 }
 0x16d   :  { %v2367_v16 = vadd.f32 %v2366_v2, %v2353_v13 }
 0x16f   :  { %v2381_v21 = vadd.f32 %v2380_v7, %v2367_v16 }
 0x174   :  { %v2368_v9 = vpop.f32.mrf.mxu0  ;;  %v2382_v15 = vpop.f32.mrf.mxu1 }
 0x175   :  { %v2369_v23 = vadd.f32 %v2368_v9, %v2355_v52 }
 0x177   :  { %v2383_v28 = vadd.f32 %v2382_v15, %v2369_v23 }
 0x179   :  { %v2394_v10 = vpop.f32.mrf.mxu2  ;;  %v2408_v11 = vpop.f32.mrf.mxu3 }
 0x17a   :  { %v2395_v42 = vadd.f32 %v2394_v10, %v2381_v21 }
 0x17c   :  { %v2409_v24 = vadd.f32 %v2408_v11, %v2395_v42 }
 0x181   :  { %v2396_v19 = vpop.f32.mrf.mxu2  ;;  %v2410_v20 = vpop.f32.mrf.mxu3 }
 0x182   :  { %v2397_v30 = vadd.f32 %v2396_v19, %v2383_v28 }
 0x184   :  { %v2411_v33 = vadd.f32 %v2410_v20, %v2397_v30 }
 0x18e   :  { %v2422_v17 = vpop.f32.mrf.mxu0  ;;  %v2436_v22 = vpop.f32.mrf.mxu1 }
 0x18f   :  { %v2423_v29 = vadd.f32 %v2422_v17, %v2409_v24 }
 0x191   :  { %v2437_v31 = vadd.f32 %v2436_v22, %v2423_v29 }
 0x196   :  { %v2424_v25 = vpop.f32.mrf.mxu0  ;;  %v2438_v32 = vpop.f32.mrf.mxu1 }
 0x197   :  { %v2425_v36 = vadd.f32 %v2424_v25, %v2411_v33 }
 0x199   :  { %v2450_v26 = vpop.f32.mrf.mxu2  ;;  %v2464_v27 = vpop.f32.mrf.mxu3  ;;  %v2439_v39 = vadd.f32 %v2438_v32, %v2425_v36 }
 0x19a   :  { %v2451_v34 = vadd.f32 %v2450_v26, %v2437_v31 }
 0x19c   :  { %v2465_v38 = vadd.f32 %v2464_v27, %v2451_v34 }
 0x1a1   :  { %v2452_v37 = vpop.f32.mrf.mxu2  ;;  %v2466_v55 = vpop.f32.mrf.mxu3 }
 0x1a2   :  { %v2453_v43 = vadd.f32 %v2452_v37, %v2439_v39 }
 0x1a4   :  { %v2467_v48 = vadd.f32 %v2466_v55, %v2453_v43 }
 0x1ab   :  { %v2478_v35 = vpop.f32.mrf.mxu0  ;;  %v2492_v41 = vpop.f32.mrf.mxu1 }
 0x1ac   :  { %v2479_v40 = vadd.f32 %v2478_v35, %v2465_v38 }
 0x1ae   :  { %v2493_v44 = vadd.f32 %v2492_v41, %v2479_v40 }
 0x1b3   :  { %v2480_v45 = vpop.f32.mrf.mxu0  ;;  %v2494_v53 = vpop.f32.mrf.mxu1 }
 0x1b4   :  { %v2481_v50 = vadd.f32 %v2480_v45, %v2467_v48 }
 0x1b6   :  { %v2495_v54 = vadd.f32 %v2494_v53, %v2481_v50 }
 0x1b8   :  { %v2506_v46 = vpop.f32.mrf.mxu2  ;;  %v2520_v47 = vpop.f32.mrf.mxu3 }
 0x1b9   :  { %v2507_v49 = vadd.f32 %v2506_v46, %v2493_v44 }
 0x1bb   :  { %v2521_v51 = vadd.f32 %v2520_v47, %v2507_v49 }
 0x1bd   :  { %2525 = vst [vmem:[#allocation11] sm:$0xff] %v2521_v51 }
 0x1c0   :  { %v2508_v56 = vpop.f32.mrf.mxu2  ;;  %v2522_v58 = vpop.f32.mrf.mxu3 }
 0x1c1   :  { %v2509_v57 = vadd.f32 %v2508_v56, %v2495_v54 }
 0x1c3   :  { %v2523_v59 = vadd.f32 %v2522_v58, %v2509_v57 }
 0x1c5   :  { %2526 = vst [vmem:[#allocation11 + $0x8] sm:$0xff] %v2523_v59 }
 0x1c6   :  { %2539 = dma.vmem_to_hbm [thread:$0]  %s2532_s16, 256, %s2534_s19, [#allocation5], %s4051_s30, %s4051_s30, %s4052_s6  }
 0x1c7   :  { %4045 = dma.done.wait [#allocation5], 256  }
 0x1c8   :  { %4046 = vsyncadd [#allocation5], 4294967040 }
 0x1c9   :  { %2544 = vsyncpa [#allocation4], 1 }
 0x1ca   :  { %2545 = vsyncpa [#allocation7], 1 }
 0x1cb   :  { %2546 = vsyncpa [#allocation10], 1 }
 0x1cc   :  { %2547 = vsyncpa [#allocation5], 1 }

// kernel: tpu_custom_call.1
= control target key start
LH: loop header
LB: loop body
LE: loop exit
PB: predicated region body
PF: predicated region fallthrough
CT: control target
= control target key end

     0   :  { %10 = vsyncpa [#allocation4], 0  ;;  %s4149_s0 = inlined_call_operand.hbm [shape: f32[16,128], index: 0, kind: input, shape index: {}]   ;;  %s4150_s1 = inlined_call_operand.hbm [shape: bf16[128,2048], index: 1, kind: input, shape index: {}]   ;;  %s4151_s2 = inlined_call_operand.hbm [shape: f32[1,2048], index: 2, kind: input, shape index: {}]   ;;  %s4152_s3 = inlined_call_operand.hbm [shape: bf16[2048,128], index: 3, kind: input, shape index: {}]   ;;  %s4153_s4 = inlined_call_operand.vmem [shape: f32[1,128], index: 4, kind: input, shape index: {}]   ;;  %s4154_s5 = inlined_call_operand.hbm [shape: f32[16,128], index: 5, kind: output, shape index: {}]  }
   0x1   :  { %11 = vsyncpa [#allocation7], 0 }
   0x2   :  { %12 = vsyncpa [#allocation10], 0  ;;  %s31_s20 = sshll.u32 %s4150_s1, 4  ;;  %s32_s20 = int_to_ptr.hbm [resolvable:$true] %s31_s20 }
   0x3   :  { %13 = vsyncpa [#allocation5], 0  ;;  %s4047_s21 = smov [#allocation6]   ;;  %s18_s25 = sshll.u32 %s4149_s0, 4  ;;  %s19_s25 = int_to_ptr.hbm [resolvable:$true] %s18_s25 }
   0x4   :  { %s33_s22 = sshll.u32 %s4047_s21, 4  ;;  %s4048_s26 = smov 1024   ;;  %s34_s22 = int_to_ptr.vmem [resolvable:$true] %s33_s22 }
   0x5   :  { %s4049_s27 = smov 64   ;;  %s4050_s28 = smov [#allocation3]  }
   0x6   :  { %39 = dma.hbm_to_vmem [thread:$0]  %s32_s20, 16384, %s34_s22, [#allocation7], %s4048_s26, %s4048_s26, %s4049_s27  }
   0x7   :  { %s20_s29 = sshll.u32 %s4050_s28, 4  ;;  %s4051_s30 = smov 128   ;;  %s21_s29 = int_to_ptr.vmem [resolvable:$true] %s20_s29 }
   0x8   :  { %s4052_s6 = smov 8   ;;  %s45_s8 = sshll.u32 %s4151_s2, 4  ;;  %s46_s8 = int_to_ptr.hbm [resolvable:$true] %s45_s8 }
   0x9   :  { %26 = dma.hbm_to_vmem [thread:$0]  %s19_s25, 256, %s21_s29, [#allocation4], %s4051_s30, %s4051_s30, %s4052_s6  }
   0xa   :  { %s4053_s9 = smov [#allocation8]   ;;  %s55_s12 = sshll.u32 %s4152_s3, 4  ;;  %s56_s12 = int_to_ptr.hbm [resolvable:$true] %s55_s12 }
   0xb   :  { %s47_s0 = sshll.u32 %s4053_s9, 4  ;;  %s4054_s13 = smov [#allocation9]   ;;  %s48_s0 = int_to_ptr.vmem [resolvable:$true] %s47_s0 }
   0xc   :  { %50 = dma.hbm_to_vmem [thread:$0]  %s46_s8, 256, %s48_s0, [#allocation7]  }
   0xd   :  { %s57_s14 = sshll.u32 %s4054_s13, 4  ;;  %s4055_s15 = smov 4   ;;  %s58_s14 = int_to_ptr.vmem [resolvable:$true] %s57_s14 }
   0xe   :  { %63 = dma.hbm_to_vmem [thread:$0]  %s56_s12, 16384, %s58_s14, [#allocation10], %s4049_s27, %s4049_s27, %s4055_s15  }
   0xf   :  { %4039 = dma.done.wait [#allocation4], 256  }
  0x10   :  { %4040 = vsyncadd [#allocation4], 4294967040 }
  0x11   :  { %4041 = dma.done.wait [#allocation7], 16640  }
  0x12   :  { %4042 = vsyncadd [#allocation7], 4294950656 }
  0x13   :  { %4043 = dma.done.wait [#allocation10], 16384  }
  0x14   :  { %4044 = vsyncadd [#allocation10], 4294950912  ;;  %v2998_v0 = vld [vmem:[#allocation6 + $0x380] sm:$0xf]  ;;  %v3748_v2 = vld [vmem:[#allocation6 + $0x384] sm:$0xf] }
  0x15   :  { %v3756_v1 = vld [vmem:[#allocation6 + $0x3bc] sm:$0xf0]  ;;  %v3000_v4 = vld [vmem:[#allocation6 + $0x3c0] sm:$0xf0]  ;;  %v3006_v5 = vld [vmem:[#allocation6 + $0x388] sm:$0xf] }
  0x16   :  { %v2999_v3 = vor.u32 %v3756_v1, %v2998_v0  ;;  %v3757_v6 = vld [vmem:[#allocation6 + $0x3c4] sm:$0xf0]  ;;  %v3003_v7 = vor.u32 %v3748_v2, %v3000_v4  ;;  %v3749_v9 = vld [vmem:[#allocation6 + $0x38c] sm:$0xf]  ;;  %v2934_v11 = vld [vmem:[#allocation6 + $0x300] sm:$0xf] }
  0x17   :  { %v3007_v8 = vor.u32 %v3757_v6, %v3006_v5  ;;  %v3008_v10 = vld [vmem:[#allocation6 + $0x3c8] sm:$0xf0]  ;;  %v3740_v13 = vld [vmem:[#allocation6 + $0x33c] sm:$0xf0]  ;;  %v3732_v14 = vld [vmem:[#allocation6 + $0x304] sm:$0xf] }
  0x18   :  { %889 = vmatpush.bf16.msra.mxu0 %v2999_v3  ;;  %v3011_v12 = vor.u32 %v3749_v9, %v3008_v10  ;;  %v2936_v15 = vld [vmem:[#allocation6 + $0x340] sm:$0xf0]  ;;  %903 = vmatpush.bf16.msra.mxu1 %v3003_v7  ;;  %v2935_v16 = vor.u32 %v3740_v13, %v2934_v11  ;;  %v2942_v18 = vld [vmem:[#allocation6 + $0x308] sm:$0xf]  ;;  %v3733_v20 = vld [vmem:[#allocation6 + $0x30c] sm:$0xf] }
  0x19   :  { %917 = vmatpush.bf16.msra.mxu2 %v3007_v8  ;;  %v2939_v17 = vor.u32 %v3732_v14, %v2936_v15  ;;  %v3741_v19 = vld [vmem:[#allocation6 + $0x344] sm:$0xf0]  ;;  %v2944_v22 = vld [vmem:[#allocation6 + $0x348] sm:$0xf0]  ;;  %v2870_v23 = vld [vmem:[#allocation6 + $0x280] sm:$0xf] }
  0x1a   :  { %931 = vmatpush.bf16.msra.mxu3 %v3011_v12  ;;  %v2943_v21 = vor.u32 %v3741_v19, %v2942_v18  ;;  %v3724_v24 = vld [vmem:[#allocation6 + $0x2bc] sm:$0xf0]  ;;  %v2947_v25 = vor.u32 %v3733_v20, %v2944_v22  ;;  %v3716_v26 = vld [vmem:[#allocation6 + $0x284] sm:$0xf]  ;;  %v2878_v28 = vld [vmem:[#allocation6 + $0x288] sm:$0xf] }
  0x1b   :  { %v2872_v27 = vld [vmem:[#allocation6 + $0x2c0] sm:$0xf0]  ;;  %v2871_v29 = vor.u32 %v3724_v24, %v2870_v23  ;;  %v3725_v30 = vld [vmem:[#allocation6 + $0x2c4] sm:$0xf0]  ;;  %v3717_v31 = vld [vmem:[#allocation6 + $0x28c] sm:$0xf] }
  0x1c   :  { %890 = vmatpush.bf16.msra.mxu0 %v2935_v16  ;;  %v2880_v32 = vld [vmem:[#allocation6 + $0x2c8] sm:$0xf0]  ;;  %904 = vmatpush.bf16.msra.mxu1 %v2939_v17  ;;  %v2875_v33 = vor.u32 %v3716_v26, %v2872_v27  ;;  %v2879_v34 = vor.u32 %v3725_v30, %v2878_v28  ;;  %v2806_v35 = vld [vmem:[#allocation6 + $0x200] sm:$0xf]  ;;  %v3700_v37 = vld [vmem:[#allocation6 + $0x204] sm:$0xf] }
  0x1d   :  { %918 = vmatpush.bf16.msra.mxu2 %v2943_v21  ;;  %v3708_v36 = vld [vmem:[#allocation6 + $0x23c] sm:$0xf0]  ;;  %v2883_v38 = vor.u32 %v3717_v31, %v2880_v32  ;;  %v2808_v39 = vld [vmem:[#allocation6 + $0x240] sm:$0xf0]  ;;  %v2814_v40 = vld [vmem:[#allocation6 + $0x208] sm:$0xf] }
  0x1e   :  { %932 = vmatpush.bf16.msra.mxu3 %v2947_v25  ;;  %v3709_v41 = vld [vmem:[#allocation6 + $0x244] sm:$0xf0]  ;;  %v3701_v42 = vld [vmem:[#allocation6 + $0x20c] sm:$0xf]  ;;  %v2807_v44 = vor.u32 %v3708_v36, %v2806_v35  ;;  %v2811_v45 = vor.u32 %v3700_v37, %v2808_v39  ;;  %v2742_v47 = vld [vmem:[#allocation6 + $0x180] sm:$0xf] }
  0x1f   :  { %v2816_v43 = vld [vmem:[#allocation6 + $0x248] sm:$0xf0]  ;;  %v2815_v46 = vor.u32 %v3709_v41, %v2814_v40  ;;  %v3692_v48 = vld [vmem:[#allocation6 + $0x1bc] sm:$0xf0]  ;;  %v3684_v49 = vld [vmem:[#allocation6 + $0x184] sm:$0xf] }
  0x20   :  { %891 = vmatpush.bf16.msra.mxu0 %v2871_v29  ;;  %905 = vmatpush.bf16.msra.mxu1 %v2875_v33  ;;  %v2819_v50 = vor.u32 %v3701_v42, %v2816_v43  ;;  %v2744_v51 = vld [vmem:[#allocation6 + $0x1c0] sm:$0xf0]  ;;  %v2750_v52 = vld [vmem:[#allocation6 + $0x188] sm:$0xf]  ;;  %v3685_v54 = vld [vmem:[#allocation6 + $0x18c] sm:$0xf]  ;;  %v2743_v56 = vor.u32 %v3692_v48, %v2742_v47 }
  0x21   :  { %919 = vmatpush.bf16.msra.mxu2 %v2879_v34  ;;  %v3693_v53 = vld [vmem:[#allocation6 + $0x1c4] sm:$0xf0]  ;;  %v2752_v55 = vld [vmem:[#allocation6 + $0x1c8] sm:$0xf0]  ;;  %v2747_v57 = vor.u32 %v3684_v49, %v2744_v51  ;;  %v2678_v59 = vld [vmem:[#allocation6 + $0x100] sm:$0xf] }
  0x22   :  { %933 = vmatpush.bf16.msra.mxu3 %v2883_v38  ;;  %v2751_v58 = vor.u32 %v3693_v53, %v2750_v52  ;;  %v3676_v60 = vld [vmem:[#allocation6 + $0x13c] sm:$0xf0]  ;;  %v3668_v61 = vld [vmem:[#allocation6 + $0x104] sm:$0xf]  ;;  %v2755_v62 = vor.u32 %v3685_v54, %v2752_v55  ;;  %v2686_v0 = vld [vmem:[#allocation6 + $0x108] sm:$0xf] }
  0x23   :  { %v2680_v63 = vld [vmem:[#allocation6 + $0x140] sm:$0xf0]  ;;  %v3677_v1 = vld [vmem:[#allocation6 + $0x144] sm:$0xf0]  ;;  %v3669_v2 = vld [vmem:[#allocation6 + $0x10c] sm:$0xf]  ;;  %v2679_v4 = vor.u32 %v3676_v60, %v2678_v59 }
  0x24   :  { %892 = vmatpush.bf16.msra.mxu0 %v2807_v44  ;;  %906 = vmatpush.bf16.msra.mxu1 %v2811_v45  ;;  %v2688_v3 = vld [vmem:[#allocation6 + $0x148] sm:$0xf0]  ;;  %v2683_v5 = vor.u32 %v3668_v61, %v2680_v63  ;;  %v2687_v6 = vor.u32 %v3677_v1, %v2686_v0  ;;  %v2614_v7 = vld [vmem:[#allocation6 + $0x80] sm:$0xf]  ;;  %v3652_v9 = vld [vmem:[#allocation6 + $0x84] sm:$0xf] }
  0x25   :  { %920 = vmatpush.bf16.msra.mxu2 %v2815_v46  ;;  %v3660_v8 = vld [vmem:[#allocation6 + $0xbc] sm:$0xf0]  ;;  %v2691_v10 = vor.u32 %v3669_v2, %v2688_v3  ;;  %v2616_v11 = vld [vmem:[#allocation6 + $0xc0] sm:$0xf0]  ;;  %v2622_v12 = vld [vmem:[#allocation6 + $0x88] sm:$0xf] }
  0x26   :  { %934 = vmatpush.bf16.msra.mxu3 %v2819_v50  ;;  %v3661_v13 = vld [vmem:[#allocation6 + $0xc4] sm:$0xf0]  ;;  %v3653_v14 = vld [vmem:[#allocation6 + $0x8c] sm:$0xf]  ;;  %v2615_v16 = vor.u32 %v3660_v8, %v2614_v7  ;;  %v2550_v17 = vld [vmem:[#allocation6] sm:$0xf]  ;;  %v2619_v19 = vor.u32 %v3652_v9, %v2616_v11 }
  0x27   :  { %v2624_v15 = vld [vmem:[#allocation6 + $0xc8] sm:$0xf0]  ;;  %v3644_v18 = vld [vmem:[#allocation6 + $0x3c] sm:$0xf0]  ;;  %v2623_v20 = vor.u32 %v3661_v13, %v2622_v12  ;;  %v3636_v21 = vld [vmem:[#allocation6 + $0x4] sm:$0xf] }
  0x28   :  { %893 = vmatpush.bf16.msra.mxu0 %v2743_v56  ;;  %907 = vmatpush.bf16.msra.mxu1 %v2747_v57  ;;  %v2552_v22 = vld [vmem:[#allocation6 + $0x40] sm:$0xf0]  ;;  %v2558_v23 = vld [vmem:[#allocation6 + $0x8] sm:$0xf]  ;;  %v2627_v24 = vor.u32 %v3653_v14, %v2624_v15  ;;  %v3637_v26 = vld [vmem:[#allocation6 + $0xc] sm:$0xf]  ;;  %v2551_v31 = vor.u32 %v3644_v18, %v2550_v17 }
  0x29   :  { %921 = vmatpush.bf16.msra.mxu2 %v2751_v58  ;;  %v3645_v25 = vld [vmem:[#allocation6 + $0x44] sm:$0xf0]  ;;  %v2560_v27 = vld [vmem:[#allocation6 + $0x48] sm:$0xf0]  ;;  %v3014_v28 = vld [vmem:[#allocation6 + $0x390] sm:$0xf]  ;;  %v2555_v35 = vor.u32 %v3636_v21, %v2552_v22 }
  0x2a   :  { %935 = vmatpush.bf16.msra.mxu3 %v2755_v62  ;;  %v3758_v29 = vld [vmem:[#allocation6 + $0x3cc] sm:$0xf0]  ;;  %v3750_v30 = vld [vmem:[#allocation6 + $0x394] sm:$0xf]  ;;  %v3022_v33 = vld [vmem:[#allocation6 + $0x398] sm:$0xf]  ;;  %v2559_v36 = vor.u32 %v3645_v25, %v2558_v23  ;;  %v2563_v39 = vor.u32 %v3637_v26, %v2560_v27 }
  0x2b   :  { %v3016_v32 = vld [vmem:[#allocation6 + $0x3d0] sm:$0xf0]  ;;  %v3759_v34 = vld [vmem:[#allocation6 + $0x3d4] sm:$0xf0]  ;;  %v3751_v37 = vld [vmem:[#allocation6 + $0x39c] sm:$0xf]  ;;  %v3015_v40 = vor.u32 %v3758_v29, %v3014_v28 }
  0x2c   :  { %894 = vmatpush.bf16.msra.mxu0 %v2679_v4  ;;  %908 = vmatpush.bf16.msra.mxu1 %v2683_v5  ;;  %v3024_v38 = vld [vmem:[#allocation6 + $0x3d8] sm:$0xf0]  ;;  %v82_v41 = vld [vmem:[#allocation3] sm:$0xff]  ;;  %v3019_v43 = vor.u32 %v3750_v30, %v3016_v32  ;;  %v3023_v44 = vor.u32 %v3759_v34, %v3022_v33  ;;  %v2958_v50 = vld [vmem:[#allocation6 + $0x318] sm:$0xf]  ;;  %s2533_s19 = sshll.u32 %s4154_s5, 4  ;;  %s2534_s19 = int_to_ptr.hbm [resolvable:$true] %s2533_s19 }
  0x2d   :  { %922 = vmatpush.bf16.msra.mxu2 %v2687_v6  ;;  %v83_v42 = vld [vmem:[#allocation3 + $0x8] sm:$0xff]  ;;  %v2950_v45 = vld [vmem:[#allocation6 + $0x310] sm:$0xf]  ;;  %v3734_v47 = vld [vmem:[#allocation6 + $0x314] sm:$0xf]  ;;  %v3027_v48 = vor.u32 %v3751_v37, %v3024_v38 }
  0x2e   :  { %936 = vmatpush.bf16.msra.mxu3 %v2691_v10  ;;  %v3742_v46 = vld [vmem:[#allocation6 + $0x34c] sm:$0xf0]  ;;  %v2952_v49 = vld [vmem:[#allocation6 + $0x350] sm:$0xf0]  ;;  %v3743_v51 = vld [vmem:[#allocation6 + $0x354] sm:$0xf0]  ;;  %v4102_v52 = vpack.c.bf16 %v83_v42, %v82_v41 }
  0x2f   :  { %v3735_v53 = vld [vmem:[#allocation6 + $0x31c] sm:$0xf]  ;;  %v2951_v55 = vor.u32 %v3742_v46, %v2950_v45  ;;  %v2955_v56 = vor.u32 %v3734_v47, %v2952_v49  ;;  %v2959_v57 = vor.u32 %v3743_v51, %v2958_v50  ;;  %v2886_v58 = vld [vmem:[#allocation6 + $0x290] sm:$0xf]  ;;  %v3718_v60 = vld [vmem:[#allocation6 + $0x294] sm:$0xf] }
  0x30   :  { %895 = vmatpush.bf16.msra.mxu0 %v2615_v16  ;;  %909 = vmatpush.bf16.msra.mxu1 %v2619_v19  ;;  %v2960_v54 = vld [vmem:[#allocation6 + $0x358] sm:$0xf0]  ;;  %v3726_v59 = vld [vmem:[#allocation6 + $0x2cc] sm:$0xf0]  ;;  %v2888_v62 = vld [vmem:[#allocation6 + $0x2d0] sm:$0xf0] }
  0x31   :  { %923 = vmatpush.bf16.msra.mxu2 %v2623_v20  ;;  %v2963_v61 = vor.u32 %v3735_v53, %v2960_v54  ;;  %v2894_v63 = vld [vmem:[#allocation6 + $0x298] sm:$0xf]  ;;  %v3719_v1 = vld [vmem:[#allocation6 + $0x29c] sm:$0xf]  ;;  %v2887_v3 = vor.u32 %v3726_v59, %v2886_v58  ;;  %v2891_v4 = vor.u32 %v3718_v60, %v2888_v62  ;;  %v2822_v6 = vld [vmem:[#allocation6 + $0x210] sm:$0xf] }
  0x32   :  { %937 = vmatpush.bf16.msra.mxu3 %v2627_v24  ;;  %v3727_v0 = vld [vmem:[#allocation6 + $0x2d4] sm:$0xf0]  ;;  %v2896_v2 = vld [vmem:[#allocation6 + $0x2d8] sm:$0xf0]  ;;  %v3710_v7 = vld [vmem:[#allocation6 + $0x24c] sm:$0xf0] }
  0x33   :  { %v2895_v5 = vor.u32 %v3727_v0, %v2894_v63  ;;  %v3702_v8 = vld [vmem:[#allocation6 + $0x214] sm:$0xf]  ;;  %v2899_v9 = vor.u32 %v3719_v1, %v2896_v2  ;;  %v2830_v11 = vld [vmem:[#allocation6 + $0x218] sm:$0xf]  ;;  %v3703_v13 = vld [vmem:[#allocation6 + $0x21c] sm:$0xf]  ;;  %v2823_v15 = vor.u32 %v3710_v7, %v2822_v6 }
  0x34   :  { %896 = vmatpush.bf16.msra.mxu0 %v2551_v31  ;;  %910 = vmatpush.bf16.msra.mxu1 %v2555_v35  ;;  %v2824_v10 = vld [vmem:[#allocation6 + $0x250] sm:$0xf0]  ;;  %v3711_v12 = vld [vmem:[#allocation6 + $0x254] sm:$0xf0]  ;;  %v2832_v14 = vld [vmem:[#allocation6 + $0x258] sm:$0xf0] }
  0x35   :  { %924 = vmatpush.bf16.msra.mxu2 %v2559_v36  ;;  %v2827_v16 = vor.u32 %v3702_v8, %v2824_v10  ;;  %v2831_v17 = vor.u32 %v3711_v12, %v2830_v11  ;;  %v2758_v18 = vld [vmem:[#allocation6 + $0x190] sm:$0xf]  ;;  %v3686_v20 = vld [vmem:[#allocation6 + $0x194] sm:$0xf]  ;;  %v2835_v21 = vor.u32 %v3703_v13, %v2832_v14  ;;  %v2766_v23 = vld [vmem:[#allocation6 + $0x198] sm:$0xf] }
  0x36   :  { %938 = vmatpush.bf16.msra.mxu3 %v2563_v39  ;;  %v3694_v19 = vld [vmem:[#allocation6 + $0x1cc] sm:$0xf0]  ;;  %v2760_v22 = vld [vmem:[#allocation6 + $0x1d0] sm:$0xf0]  ;;  %v3695_v24 = vld [vmem:[#allocation6 + $0x1d4] sm:$0xf0] }
  0x37   :  { %897 = vmatmul.bf16.vlgmr.msra.gmra.mxu0 %v4102_v52  ;;  %911 = vmatmul.bf16.vlgmr.msra.gmra.mxu1 %v4102_v52  ;;  %v3687_v25 = vld [vmem:[#allocation6 + $0x19c] sm:$0xf]  ;;  %v2759_v27 = vor.u32 %v3694_v19, %v2758_v18  ;;  %v2763_v28 = vor.u32 %v3686_v20, %v2760_v22  ;;  %v2767_v29 = vor.u32 %v3695_v24, %v2766_v23  ;;  %v2694_v30 = vld [vmem:[#allocation6 + $0x110] sm:$0xf]  ;;  %v3670_v32 = vld [vmem:[#allocation6 + $0x114] sm:$0xf] }
  0x38   :  { %945 = vmatpush.bf16.msrb.mxu0 %v3015_v40  ;;  %959 = vmatpush.bf16.msrb.mxu1 %v3019_v43  ;;  %v2768_v26 = vld [vmem:[#allocation6 + $0x1d8] sm:$0xf0]  ;;  %v3678_v31 = vld [vmem:[#allocation6 + $0x14c] sm:$0xf0]  ;;  %v2696_v34 = vld [vmem:[#allocation6 + $0x150] sm:$0xf0] }
  0x39   :  { %973 = vmatpush.bf16.msrb.mxu2 %v3023_v44  ;;  %939 = vmatmul.bf16.vlgmr.msra.gmra.mxu3 %v4102_v52  ;;  %v2771_v33 = vor.u32 %v3687_v25, %v2768_v26  ;;  %v2702_v35 = vld [vmem:[#allocation6 + $0x118] sm:$0xf]  ;;  %v3671_v37 = vld [vmem:[#allocation6 + $0x11c] sm:$0xf]  ;;  %v2695_v39 = vor.u32 %v3678_v31, %v2694_v30  ;;  %v2699_v40 = vor.u32 %v3670_v32, %v2696_v34  ;;  %v2630_v42 = vld [vmem:[#allocation6 + $0x90] sm:$0xf] }
  0x3a   :  { %987 = vmatpush.bf16.msrb.mxu3 %v3027_v48  ;;  %925 = vmatmul.bf16.vlgmr.msra.gmra.mxu2 %v4102_v52  ;;  %v3679_v36 = vld [vmem:[#allocation6 + $0x154] sm:$0xf0]  ;;  %v2704_v38 = vld [vmem:[#allocation6 + $0x158] sm:$0xf0]  ;;  %v3662_v43 = vld [vmem:[#allocation6 + $0xcc] sm:$0xf0] }
  0x3b   :  { %v2703_v41 = vor.u32 %v3679_v36, %v2702_v35  ;;  %v3654_v44 = vld [vmem:[#allocation6 + $0x94] sm:$0xf]  ;;  %v2707_v45 = vor.u32 %v3671_v37, %v2704_v38  ;;  %v2638_v47 = vld [vmem:[#allocation6 + $0x98] sm:$0xf]  ;;  %v3655_v49 = vld [vmem:[#allocation6 + $0x9c] sm:$0xf]  ;;  %v2631_v51 = vor.u32 %v3662_v43, %v2630_v42 }
  0x3c   :  { %946 = vmatpush.bf16.msrb.mxu0 %v2951_v55  ;;  %960 = vmatpush.bf16.msrb.mxu1 %v2955_v56  ;;  %v2632_v46 = vld [vmem:[#allocation6 + $0xd0] sm:$0xf0]  ;;  %v3663_v48 = vld [vmem:[#allocation6 + $0xd4] sm:$0xf0]  ;;  %v2640_v50 = vld [vmem:[#allocation6 + $0xd8] sm:$0xf0] }
  0x3d   :  { %974 = vmatpush.bf16.msrb.mxu2 %v2959_v57  ;;  %v2566_v53 = vld [vmem:[#allocation6 + $0x10] sm:$0xf]  ;;  %v2635_v55 = vor.u32 %v3654_v44, %v2632_v46  ;;  %v2639_v56 = vor.u32 %v3663_v48, %v2638_v47  ;;  %v3638_v57 = vld [vmem:[#allocation6 + $0x14] sm:$0xf]  ;;  %v2574_v59 = vld [vmem:[#allocation6 + $0x18] sm:$0xf]  ;;  %v2643_v60 = vor.u32 %v3655_v49, %v2640_v50 }
  0x3e   :  { %988 = vmatpush.bf16.msrb.mxu3 %v2963_v61  ;;  %v3646_v54 = vld [vmem:[#allocation6 + $0x4c] sm:$0xf0]  ;;  %v2568_v58 = vld [vmem:[#allocation6 + $0x50] sm:$0xf0]  ;;  %v3647_v61 = vld [vmem:[#allocation6 + $0x54] sm:$0xf0] }
  0x3f   :  { %v3639_v62 = vld [vmem:[#allocation6 + $0x1c] sm:$0xf]  ;;  %v3030_v0 = vld [vmem:[#allocation6 + $0x3a0] sm:$0xf]  ;;  %v3752_v2 = vld [vmem:[#allocation6 + $0x3a4] sm:$0xf]  ;;  %v2571_v7 = vor.u32 %v3638_v57, %v2568_v58  ;;  %v2575_v8 = vor.u32 %v3647_v61, %v2574_v59 }
  0x40   :  { %947 = vmatpush.bf16.msrb.mxu0 %v2887_v3  ;;  %961 = vmatpush.bf16.msrb.mxu1 %v2891_v4  ;;  %v2576_v63 = vld [vmem:[#allocation6 + $0x58] sm:$0xf0]  ;;  %v3760_v1 = vld [vmem:[#allocation6 + $0x3dc] sm:$0xf0]  ;;  %v2567_v3 = vor.u32 %v3646_v54, %v2566_v53  ;;  %v3032_v4 = vld [vmem:[#allocation6 + $0x3e0] sm:$0xf0] }
  0x41   :  { %975 = vmatpush.bf16.msrb.mxu2 %v2895_v5  ;;  %v3038_v5 = vld [vmem:[#allocation6 + $0x3a8] sm:$0xf]  ;;  %v3040_v10 = vld [vmem:[#allocation6 + $0x3e8] sm:$0xf0]  ;;  %v2579_v11 = vor.u32 %v3639_v62, %v2576_v63  ;;  %v3031_v12 = vor.u32 %v3760_v1, %v3030_v0  ;;  %v3035_v13 = vor.u32 %v3752_v2, %v3032_v4  ;;  %v2968_v19 = vld [vmem:[#allocation6 + $0x360] sm:$0xf0] }
  0x42   :  { %989 = vmatpush.bf16.msrb.mxu3 %v2899_v9  ;;  %v3761_v6 = vld [vmem:[#allocation6 + $0x3e4] sm:$0xf0]  ;;  %v3753_v9 = vld [vmem:[#allocation6 + $0x3ac] sm:$0xf]  ;;  %v2904_v31 = vld [vmem:[#allocation6 + $0x2e0] sm:$0xf0] }
  0x43   :  { %v3039_v14 = vor.u32 %v3761_v6, %v3038_v5  ;;  %v3043_v18 = vor.u32 %v3753_v9, %v3040_v10  ;;  %v2974_v20 = vld [vmem:[#allocation6 + $0x328] sm:$0xf]  ;;  %v3737_v22 = vld [vmem:[#allocation6 + $0x32c] sm:$0xf]  ;;  %v2840_v43 = vld [vmem:[#allocation6 + $0x260] sm:$0xf0] }
  0x44   :  { %948 = vmatpush.bf16.msrb.mxu0 %v2823_v15  ;;  %962 = vmatpush.bf16.msrb.mxu1 %v2827_v16  ;;  %v2966_v15 = vld [vmem:[#allocation6 + $0x320] sm:$0xf]  ;;  %v2976_v23 = vld [vmem:[#allocation6 + $0x368] sm:$0xf0]  ;;  %v2910_v32 = vld [vmem:[#allocation6 + $0x2a8] sm:$0xf] }
  0x45   :  { %976 = vmatpush.bf16.msrb.mxu2 %v2831_v17  ;;  %v3744_v16 = vld [vmem:[#allocation6 + $0x35c] sm:$0xf0]  ;;  %v3736_v17 = vld [vmem:[#allocation6 + $0x324] sm:$0xf]  ;;  %v2979_v30 = vor.u32 %v3737_v22, %v2976_v23  ;;  %v3721_v34 = vld [vmem:[#allocation6 + $0x2ac] sm:$0xf] }
  0x46   :  { %990 = vmatpush.bf16.msrb.mxu3 %v2835_v21  ;;  %v3745_v21 = vld [vmem:[#allocation6 + $0x364] sm:$0xf0]  ;;  %v2967_v24 = vor.u32 %v3744_v16, %v2966_v15  ;;  %v2971_v25 = vor.u32 %v3736_v17, %v2968_v19  ;;  %v2912_v35 = vld [vmem:[#allocation6 + $0x2e8] sm:$0xf0]  ;;  %v3696_v53 = vld [vmem:[#allocation6 + $0x1dc] sm:$0xf0] }
  0x47   :  { %v2975_v26 = vor.u32 %v3745_v21, %v2974_v20  ;;  %v2915_v42 = vor.u32 %v3721_v34, %v2912_v35  ;;  %v2846_v44 = vld [vmem:[#allocation6 + $0x228] sm:$0xf]  ;;  %v3705_v46 = vld [vmem:[#allocation6 + $0x22c] sm:$0xf]  ;;  %v3688_v54 = vld [vmem:[#allocation6 + $0x1a4] sm:$0xf] }
  0x48   :  { %949 = vmatpush.bf16.msrb.mxu0 %v2759_v27  ;;  %963 = vmatpush.bf16.msrb.mxu1 %v2763_v28  ;;  %v2902_v27 = vld [vmem:[#allocation6 + $0x2a0] sm:$0xf]  ;;  %v2848_v47 = vld [vmem:[#allocation6 + $0x268] sm:$0xf0]  ;;  %v2782_v57 = vld [vmem:[#allocation6 + $0x1a8] sm:$0xf] }
  0x49   :  { %977 = vmatpush.bf16.msrb.mxu2 %v2767_v29  ;;  %v3728_v28 = vld [vmem:[#allocation6 + $0x2dc] sm:$0xf0]  ;;  %v3720_v29 = vld [vmem:[#allocation6 + $0x2a4] sm:$0xf]  ;;  %v3697_v58 = vld [vmem:[#allocation6 + $0x1e4] sm:$0xf0] }
  0x4a   :  { %991 = vmatpush.bf16.msrb.mxu3 %v2771_v33  ;;  %v3729_v33 = vld [vmem:[#allocation6 + $0x2e4] sm:$0xf0]  ;;  %v2903_v36 = vor.u32 %v3728_v28, %v2902_v27  ;;  %v2907_v37 = vor.u32 %v3720_v29, %v2904_v31  ;;  %v3689_v59 = vld [vmem:[#allocation6 + $0x1ac] sm:$0xf]  ;;  %v2783_v63 = vor.u32 %v3697_v58, %v2782_v57  ;;  %v2710_v0 = vld [vmem:[#allocation6 + $0x120] sm:$0xf] }
  0x4b   :  { %v2911_v38 = vor.u32 %v3729_v33, %v2910_v32  ;;  %v3680_v1 = vld [vmem:[#allocation6 + $0x15c] sm:$0xf0]  ;;  %v3672_v2 = vld [vmem:[#allocation6 + $0x124] sm:$0xf]  ;;  %v2718_v5 = vld [vmem:[#allocation6 + $0x128] sm:$0xf] }
  0x4c   :  { %950 = vmatpush.bf16.msrb.mxu0 %v2695_v39  ;;  %964 = vmatpush.bf16.msrb.mxu1 %v2699_v40  ;;  %v2838_v39 = vld [vmem:[#allocation6 + $0x220] sm:$0xf]  ;;  %v2712_v4 = vld [vmem:[#allocation6 + $0x160] sm:$0xf0]  ;;  %v3681_v6 = vld [vmem:[#allocation6 + $0x164] sm:$0xf0]  ;;  %v2711_v9 = vor.u32 %v3680_v1, %v2710_v0 }
  0x4d   :  { %978 = vmatpush.bf16.msrb.mxu2 %v2703_v41  ;;  %v3712_v40 = vld [vmem:[#allocation6 + $0x25c] sm:$0xf0]  ;;  %v3704_v41 = vld [vmem:[#allocation6 + $0x224] sm:$0xf]  ;;  %v2715_v10 = vor.u32 %v3672_v2, %v2712_v4  ;;  %v2654_v17 = vld [vmem:[#allocation6 + $0xa8] sm:$0xf] }
  0x4e   :  { %992 = vmatpush.bf16.msrb.mxu3 %v2707_v45  ;;  %v3713_v45 = vld [vmem:[#allocation6 + $0x264] sm:$0xf0]  ;;  %v2839_v48 = vor.u32 %v3712_v40, %v2838_v39  ;;  %v2843_v49 = vor.u32 %v3704_v41, %v2840_v43  ;;  %v2648_v16 = vld [vmem:[#allocation6 + $0xe0] sm:$0xf0]  ;;  %v3657_v19 = vld [vmem:[#allocation6 + $0xac] sm:$0xf] }
  0x4f   :  { %v2847_v50 = vor.u32 %v3713_v45, %v2846_v44  ;;  %v2656_v20 = vld [vmem:[#allocation6 + $0xe8] sm:$0xf0]  ;;  %v2582_v22 = vld [vmem:[#allocation6 + $0x20] sm:$0xf]  ;;  %v2584_v27 = vld [vmem:[#allocation6 + $0x60] sm:$0xf0] }
  0x50   :  { %951 = vmatpush.bf16.msrb.mxu0 %v2631_v51  ;;  %965 = vmatpush.bf16.msrb.mxu1 %v2635_v55  ;;  %v2774_v51 = vld [vmem:[#allocation6 + $0x1a0] sm:$0xf]  ;;  %v2851_v55 = vor.u32 %v3705_v46, %v2848_v47  ;;  %v2590_v28 = vld [vmem:[#allocation6 + $0x28] sm:$0xf]  ;;  %v2659_v29 = vor.u32 %v3657_v19, %v2656_v20  ;;  %v3641_v31 = vld [vmem:[#allocation6 + $0x2c] sm:$0xf] }
  0x51   :  { %979 = vmatpush.bf16.msrb.mxu2 %v2639_v56  ;;  %v2776_v56 = vld [vmem:[#allocation6 + $0x1e0] sm:$0xf0]  ;;  %v2775_v61 = vor.u32 %v3696_v53, %v2774_v51  ;;  %v3648_v23 = vld [vmem:[#allocation6 + $0x5c] sm:$0xf0]  ;;  %v2592_v32 = vld [vmem:[#allocation6 + $0x68] sm:$0xf0] }
  0x52   :  { %993 = vmatpush.bf16.msrb.mxu3 %v2643_v60  ;;  %v2784_v60 = vld [vmem:[#allocation6 + $0x1e8] sm:$0xf0]  ;;  %v2779_v62 = vor.u32 %v3688_v54, %v2776_v56  ;;  %v3046_v33 = vld [vmem:[#allocation6 + $0x3b0] sm:$0xf]  ;;  %v3754_v35 = vld [vmem:[#allocation6 + $0x3b4] sm:$0xf]  ;;  %v2595_v44 = vor.u32 %v3641_v31, %v2592_v32 }
  0x53   :  { %v3762_v34 = vld [vmem:[#allocation6 + $0x3ec] sm:$0xf0]  ;;  %v3763_v39 = vld [vmem:[#allocation6 + $0x3f4] sm:$0xf0]  ;;  %v3056_v43 = vld [vmem:[#allocation6 + $0x3f8] sm:$0xf0] }
  0x54   :  { %952 = vmatpush.bf16.msrb.mxu0 %v2567_v3  ;;  %966 = vmatpush.bf16.msrb.mxu1 %v2571_v7  ;;  %v2787_v3 = vor.u32 %v3689_v59, %v2784_v60  ;;  %v3673_v7 = vld [vmem:[#allocation6 + $0x12c] sm:$0xf]  ;;  %v3047_v45 = vor.u32 %v3762_v34, %v3046_v33  ;;  %v2984_v53 = vld [vmem:[#allocation6 + $0x370] sm:$0xf0]  ;;  %v2990_v54 = vld [vmem:[#allocation6 + $0x338] sm:$0xf] }
  0x55   :  { %980 = vmatpush.bf16.msrb.mxu2 %v2575_v8  ;;  %v2720_v8 = vld [vmem:[#allocation6 + $0x168] sm:$0xf0]  ;;  %v3739_v56 = vld [vmem:[#allocation6 + $0x33c] sm:$0xf]  ;;  %v2920_v1 = vld [vmem:[#allocation6 + $0x2f0] sm:$0xf0] }
  0x56   :  { %994 = vmatpush.bf16.msrb.mxu3 %v2579_v11  ;;  %v2719_v11 = vor.u32 %v3681_v6, %v2718_v5  ;;  %v2723_v15 = vor.u32 %v3673_v7, %v2720_v8  ;;  %v2992_v57 = vld [vmem:[#allocation6 + $0x378] sm:$0xf0]  ;;  %v2926_v2 = vld [vmem:[#allocation6 + $0x2b8] sm:$0xf]  ;;  %v2726_v33 = vld [vmem:[#allocation6 + $0x130] sm:$0xf] }
  0x57   :  { %953 = vmatmul.bf16.vlgmr.msrb.gmra.mxu0 %v4102_v52  ;;  %967 = vmatmul.bf16.vlgmr.msrb.gmra.mxu1 %v4102_v52  ;;  %v2995_v0 = vor.u32 %v3739_v56, %v2992_v57  ;;  %v3723_v4 = vld [vmem:[#allocation6 + $0x2bc] sm:$0xf]  ;;  %v3682_v34 = vld [vmem:[#allocation6 + $0x16c] sm:$0xf0] }
  0x58   :  { %1001 = vmatpush.bf16.msra.mxu0 %v3031_v12  ;;  %1015 = vmatpush.bf16.msra.mxu1 %v3035_v13  ;;  %v2646_v12 = vld [vmem:[#allocation6 + $0xa0] sm:$0xf]  ;;  %v2928_v5 = vld [vmem:[#allocation6 + $0x2f8] sm:$0xf0] }
  0x59   :  { %1029 = vmatpush.bf16.msra.mxu2 %v3039_v14  ;;  %995 = vmatmul.bf16.vlgmr.msrb.gmra.mxu3 %v4102_v52  ;;  %v3664_v13 = vld [vmem:[#allocation6 + $0xdc] sm:$0xf0]  ;;  %v3656_v14 = vld [vmem:[#allocation6 + $0xa4] sm:$0xf] }
  0x5a   :  { %1043 = vmatpush.bf16.msra.mxu3 %v3043_v18  ;;  %981 = vmatmul.bf16.vlgmr.msrb.gmra.mxu2 %v4102_v52  ;;  %v3665_v18 = vld [vmem:[#allocation6 + $0xe4] sm:$0xf0]  ;;  %v2647_v21 = vor.u32 %v3664_v13, %v2646_v12  ;;  %v2931_v12 = vor.u32 %v3723_v4, %v2928_v5  ;;  %v2856_v13 = vld [vmem:[#allocation6 + $0x270] sm:$0xf0] }
  0x5c   :  { %1002 = vmatpush.bf16.msra.mxu0 %v2967_v24  ;;  %1016 = vmatpush.bf16.msra.mxu1 %v2971_v25  ;;  %v2651_v24 = vor.u32 %v3656_v14, %v2648_v16  ;;  %v2655_v25 = vor.u32 %v3665_v18, %v2654_v17  ;;  %v2862_v14 = vld [vmem:[#allocation6 + $0x238] sm:$0xf]  ;;  %v3707_v16 = vld [vmem:[#allocation6 + $0x23c] sm:$0xf] }
  0x5d   :  { %1030 = vmatpush.bf16.msra.mxu2 %v2975_v26  ;;  %v3640_v26 = vld [vmem:[#allocation6 + $0x24] sm:$0xf]  ;;  %v2864_v17 = vld [vmem:[#allocation6 + $0x278] sm:$0xf0] }
  0x5e   :  { %1044 = vmatpush.bf16.msra.mxu3 %v2979_v30  ;;  %v3649_v30 = vld [vmem:[#allocation6 + $0x64] sm:$0xf0]  ;;  %v2587_v40 = vor.u32 %v3640_v26, %v2584_v27  ;;  %v2798_v26 = vld [vmem:[#allocation6 + $0x1b8] sm:$0xf] }
  0x5f   :  { %v2591_v41 = vor.u32 %v3649_v30, %v2590_v28  ;;  %v3699_v27 = vld [vmem:[#allocation6 + $0x1f4] sm:$0xf0]  ;;  %v3691_v28 = vld [vmem:[#allocation6 + $0x1bc] sm:$0xf] }
  0x60   :  { %1003 = vmatpush.bf16.msra.mxu0 %v2903_v36  ;;  %1017 = vmatpush.bf16.msra.mxu1 %v2907_v37  ;;  %v2583_v36 = vor.u32 %v3648_v23, %v2582_v22  ;;  %v3048_v37 = vld [vmem:[#allocation6 + $0x3f0] sm:$0xf0]  ;;  %v3698_v22 = vld [vmem:[#allocation6 + $0x1ec] sm:$0xf0]  ;;  %v2799_v32 = vor.u32 %v3699_v27, %v2798_v26  ;;  %v3799_v26 = vld [vmem:[#allocation9 + $0x98] sm:$0xff] }
  0x61   :  { %1031 = vmatpush.bf16.msra.mxu2 %v2911_v38  ;;  %v3054_v38 = vld [vmem:[#allocation6 + $0x3b8] sm:$0xf]  ;;  %v3051_v46 = vor.u32 %v3754_v35, %v3048_v37  ;;  %v3690_v23 = vld [vmem:[#allocation6 + $0x1b4] sm:$0xf]  ;;  %v3807_v27 = vld [vmem:[#allocation9 + $0xd8] sm:$0xff] }
  0x62   :  { %1045 = vmatpush.bf16.msra.mxu3 %v2915_v42  ;;  %v3755_v42 = vld [vmem:[#allocation6 + $0x3bc] sm:$0xf]  ;;  %v3055_v47 = vor.u32 %v3763_v39, %v3054_v38  ;;  %v3674_v35 = vld [vmem:[#allocation6 + $0x134] sm:$0xf]  ;;  %v2734_v38 = vld [vmem:[#allocation6 + $0x138] sm:$0xf] }
  0x63   :  { %v3059_v51 = vor.u32 %v3755_v42, %v3056_v43  ;;  %v2728_v37 = vld [vmem:[#allocation6 + $0x170] sm:$0xf0]  ;;  %v3683_v39 = vld [vmem:[#allocation6 + $0x174] sm:$0xf0]  ;;  %v2727_v42 = vor.u32 %v3682_v34, %v2726_v33  ;;  %v3819_v34 = vld [vmem:[#allocation9 + $0x138] sm:$0xff] }
  0x64   :  { %1004 = vmatpush.bf16.msra.mxu0 %v2839_v48  ;;  %1018 = vmatpush.bf16.msra.mxu1 %v2843_v49  ;;  %v2982_v48 = vld [vmem:[#allocation6 + $0x330] sm:$0xf]  ;;  %v2731_v43 = vor.u32 %v3674_v35, %v2728_v37  ;;  %v3827_v35 = vld [vmem:[#allocation9 + $0x178] sm:$0xff]  ;;  %v3805_v37 = vld [vmem:[#allocation9 + $0xc8] sm:$0xff] }
  0x65   :  { %1032 = vmatpush.bf16.msra.mxu2 %v2847_v50  ;;  %v3746_v49 = vld [vmem:[#allocation6 + $0x36c] sm:$0xf0]  ;;  %v3738_v50 = vld [vmem:[#allocation6 + $0x334] sm:$0xf] }
  0x66   :  { %1046 = vmatpush.bf16.msra.mxu3 %v2851_v55  ;;  %v3747_v55 = vld [vmem:[#allocation6 + $0x374] sm:$0xf0]  ;;  %v2983_v58 = vor.u32 %v3746_v49, %v2982_v48  ;;  %v2987_v59 = vor.u32 %v3738_v50, %v2984_v53  ;;  %v2664_v49 = vld [vmem:[#allocation6 + $0xf0] sm:$0xf0]  ;;  %v3659_v53 = vld [vmem:[#allocation6 + $0xbc] sm:$0xf] }
  0x67   :  { %v2991_v60 = vor.u32 %v3747_v55, %v2990_v54  ;;  %v2670_v50 = vld [vmem:[#allocation6 + $0xb8] sm:$0xf]  ;;  %v2672_v54 = vld [vmem:[#allocation6 + $0xf8] sm:$0xf0]  ;;  %v3788_v33 = vld [vmem:[#allocation9 + $0x40] sm:$0xff] }
  0x68   :  { %1005 = vmatpush.bf16.msra.mxu0 %v2775_v61  ;;  %1019 = vmatpush.bf16.msra.mxu1 %v2779_v62  ;;  %v2918_v61 = vld [vmem:[#allocation6 + $0x2b0] sm:$0xf] }
  0x69   :  { %1033 = vmatpush.bf16.msra.mxu2 %v2783_v63  ;;  %v3730_v62 = vld [vmem:[#allocation6 + $0x2ec] sm:$0xf0]  ;;  %v3722_v63 = vld [vmem:[#allocation6 + $0x2b4] sm:$0xf] }
  0x6a   :  { %1047 = vmatpush.bf16.msra.mxu3 %v2787_v3  ;;  %v3731_v3 = vld [vmem:[#allocation6 + $0x2f4] sm:$0xf0]  ;;  %v2919_v6 = vor.u32 %v3730_v62, %v2918_v61  ;;  %v2923_v7 = vor.u32 %v3722_v63, %v2920_v1  ;;  %v2675_v61 = vor.u32 %v3659_v53, %v2672_v54  ;;  %v2600_v62 = vld [vmem:[#allocation6 + $0x70] sm:$0xf0]  ;;  %v3643_v1 = vld [vmem:[#allocation6 + $0x3c] sm:$0xf] }
  0x6b   :  { %v2927_v8 = vor.u32 %v3731_v3, %v2926_v2  ;;  %v2606_v63 = vld [vmem:[#allocation6 + $0x38] sm:$0xf]  ;;  %v2608_v2 = vld [vmem:[#allocation6 + $0x78] sm:$0xf0] }
  0x6c   :  { %1006 = vmatpush.bf16.msra.mxu0 %v2711_v9  ;;  %1020 = vmatpush.bf16.msra.mxu1 %v2715_v10  ;;  %v2854_v9 = vld [vmem:[#allocation6 + $0x230] sm:$0xf] }
  0x6d   :  { %1034 = vmatpush.bf16.msra.mxu2 %v2719_v11  ;;  %v3714_v10 = vld [vmem:[#allocation6 + $0x26c] sm:$0xf0]  ;;  %v3706_v11 = vld [vmem:[#allocation6 + $0x234] sm:$0xf] }
  0x6e   :  { %1048 = vmatpush.bf16.msra.mxu3 %v2723_v15  ;;  %v3715_v15 = vld [vmem:[#allocation6 + $0x274] sm:$0xf0]  ;;  %v2855_v18 = vor.u32 %v3714_v10, %v2854_v9  ;;  %v2859_v19 = vor.u32 %v3706_v11, %v2856_v13  ;;  %v3803_v9 = vld [vmem:[#allocation9 + $0xb8] sm:$0xff]  ;;  %v3786_v10 = vld [vmem:[#allocation9 + $0x30] sm:$0xff] }
  0x6f   :  { %v2863_v20 = vor.u32 %v3715_v15, %v2862_v14  ;;  %v3811_v11 = vld [vmem:[#allocation9 + $0xf8] sm:$0xff]  ;;  %v3802_v13 = vld [vmem:[#allocation9 + $0xb0] sm:$0xff]  ;;  %v3785_v14 = vld [vmem:[#allocation9 + $0x28] sm:$0xff] }
  0x70   :  { %1007 = vmatpush.bf16.msra.mxu0 %v2647_v21  ;;  %1021 = vmatpush.bf16.msra.mxu1 %v2651_v24  ;;  %v2790_v21 = vld [vmem:[#allocation6 + $0x1b0] sm:$0xf]  ;;  %v2867_v24 = vor.u32 %v3707_v16, %v2864_v17  ;;  %v3810_v15 = vld [vmem:[#allocation9 + $0xf0] sm:$0xff]  ;;  %v3793_v16 = vld [vmem:[#allocation9 + $0x68] sm:$0xff] }
  0x71   :  { %1035 = vmatpush.bf16.msra.mxu2 %v2655_v25  ;;  %v2792_v25 = vld [vmem:[#allocation6 + $0x1f0] sm:$0xf0]  ;;  %v2791_v30 = vor.u32 %v3698_v22, %v2790_v21  ;;  %v3801_v17 = vld [vmem:[#allocation9 + $0xa8] sm:$0xff] }
  0x72   :  { %1049 = vmatpush.bf16.msra.mxu3 %v2659_v29  ;;  %v2800_v29 = vld [vmem:[#allocation6 + $0x1f8] sm:$0xf0]  ;;  %v2795_v31 = vor.u32 %v3690_v23, %v2792_v25  ;;  %v3800_v21 = vld [vmem:[#allocation9 + $0xa0] sm:$0xff]  ;;  %v3791_v23 = vld [vmem:[#allocation9 + $0x58] sm:$0xff] }
  0x73   :  { %v3808_v22 = vld [vmem:[#allocation9 + $0xe0] sm:$0xff]  ;;  %v3790_v25 = vld [vmem:[#allocation9 + $0x50] sm:$0xff] }
  0x74   :  { %1008 = vmatpush.bf16.msra.mxu0 %v2583_v36  ;;  %1022 = vmatpush.bf16.msra.mxu1 %v2587_v40  ;;  %v2803_v36 = vor.u32 %v3691_v28, %v2800_v29  ;;  %v3675_v40 = vld [vmem:[#allocation6 + $0x13c] sm:$0xf] }
  0x75   :  { %1036 = vmatpush.bf16.msra.mxu2 %v2591_v41  ;;  %v2736_v41 = vld [vmem:[#allocation6 + $0x178] sm:$0xf0] }
  0x76   :  { %1050 = vmatpush.bf16.msra.mxu3 %v2595_v44  ;;  %v2735_v44 = vor.u32 %v3683_v39, %v2734_v38  ;;  %v2739_v48 = vor.u32 %v3675_v40, %v2736_v41  ;;  %v3781_v28 = vld [vmem:[#allocation9 + $0x8] sm:$0xff]  ;;  %v3818_v38 = vld [vmem:[#allocation9 + $0x130] sm:$0xff]  ;;  %v3796_v40 = vld [vmem:[#allocation9 + $0x80] sm:$0xff] }
  0x77   :  { %1009 = vmatmul.bf16.vlgmr.msra.gmra.mxu0 %v4102_v52  ;;  %1023 = vmatmul.bf16.vlgmr.msra.gmra.mxu1 %v4102_v52  ;;  %v3789_v29 = vld [vmem:[#allocation9 + $0x48] sm:$0xff]  ;;  %v3826_v39 = vld [vmem:[#allocation9 + $0x170] sm:$0xff]  ;;  %v3804_v41 = vld [vmem:[#allocation9 + $0xc0] sm:$0xff] }
  0x78   :  { %1057 = vmatpush.bf16.msrb.mxu0 %v3047_v45  ;;  %1071 = vmatpush.bf16.msrb.mxu1 %v3051_v46  ;;  %v2662_v45 = vld [vmem:[#allocation6 + $0xb0] sm:$0xf] }
  0x79   :  { %1085 = vmatpush.bf16.msrb.mxu2 %v3055_v47  ;;  %1051 = vmatmul.bf16.vlgmr.msra.gmra.mxu3 %v4102_v52  ;;  %v3666_v46 = vld [vmem:[#allocation6 + $0xec] sm:$0xf0]  ;;  %v3658_v47 = vld [vmem:[#allocation6 + $0xb4] sm:$0xf] }
  0x7a   :  { %1099 = vmatpush.bf16.msrb.mxu3 %v3059_v51  ;;  %1037 = vmatmul.bf16.vlgmr.msra.gmra.mxu2 %v4102_v52  ;;  %v3667_v51 = vld [vmem:[#allocation6 + $0xf4] sm:$0xf0]  ;;  %v2663_v55 = vor.u32 %v3666_v46, %v2662_v45  ;;  %v2667_v56 = vor.u32 %v3658_v47, %v2664_v49  ;;  %v3835_v45 = vld [vmem:[#allocation9 + $0x1b8] sm:$0xff] }
  0x7b   :  { %v2671_v57 = vor.u32 %v3667_v51, %v2670_v50  ;;  %v3843_v46 = vld [vmem:[#allocation9 + $0x1f8] sm:$0xff]  ;;  %v3825_v49 = vld [vmem:[#allocation9 + $0x168] sm:$0xff] }
  0x7c   :  { %1058 = vmatpush.bf16.msrb.mxu0 %v2983_v58  ;;  %1072 = vmatpush.bf16.msrb.mxu1 %v2987_v59  ;;  %v2598_v58 = vld [vmem:[#allocation6 + $0x30] sm:$0xf] }
  0x7d   :  { %1086 = vmatpush.bf16.msrb.mxu2 %v2991_v60  ;;  %v3650_v59 = vld [vmem:[#allocation6 + $0x6c] sm:$0xf0]  ;;  %v3642_v60 = vld [vmem:[#allocation6 + $0x34] sm:$0xf] }
  0x7e   :  { %1100 = vmatpush.bf16.msrb.mxu3 %v2995_v0  ;;  %v3651_v0 = vld [vmem:[#allocation6 + $0x74] sm:$0xf0]  ;;  %v2599_v3 = vor.u32 %v3650_v59, %v2598_v58  ;;  %v2603_v4 = vor.u32 %v3642_v60, %v2600_v62  ;;  %v3816_v60 = vld [vmem:[#allocation9 + $0x120] sm:$0xff] }
  0x7f   :  { %v2607_v5 = vor.u32 %v3651_v0, %v2606_v63 }
  0x80   :  { %1059 = vmatpush.bf16.msrb.mxu0 %v2919_v6  ;;  %1073 = vmatpush.bf16.msrb.mxu1 %v2923_v7  ;;  %v2611_v6 = vor.u32 %v3643_v1, %v2608_v2  ;;  %v3787_v7 = vld [vmem:[#allocation9 + $0x38] sm:$0xff]  ;;  %v3833_v2 = vld [vmem:[#allocation9 + $0x1a8] sm:$0xff] }
  0x81   :  { %1087 = vmatpush.bf16.msrb.mxu2 %v2927_v8  ;;  %v3795_v8 = vld [vmem:[#allocation9 + $0x78] sm:$0xff] }
  0x82   :  { %1101 = vmatpush.bf16.msrb.mxu3 %v2931_v12  ;;  %v3794_v12 = vld [vmem:[#allocation9 + $0x70] sm:$0xff] }
  0x84   :  { %1060 = vmatpush.bf16.msrb.mxu0 %v2855_v18  ;;  %1074 = vmatpush.bf16.msrb.mxu1 %v2859_v19  ;;  %v3784_v18 = vld [vmem:[#allocation9 + $0x20] sm:$0xff]  ;;  %v3809_v19 = vld [vmem:[#allocation9 + $0xe8] sm:$0xff] }
  0x85   :  { %1088 = vmatpush.bf16.msrb.mxu2 %v2863_v20  ;;  %v3792_v20 = vld [vmem:[#allocation9 + $0x60] sm:$0xff] }
  0x86   :  { %1102 = vmatpush.bf16.msrb.mxu3 %v2867_v24  ;;  %v3782_v24 = vld [vmem:[#allocation9 + $0x10] sm:$0xff] }
  0x88   :  { %1061 = vmatpush.bf16.msrb.mxu0 %v2791_v30  ;;  %1075 = vmatpush.bf16.msrb.mxu1 %v2795_v31  ;;  %v3798_v30 = vld [vmem:[#allocation9 + $0x90] sm:$0xff] }
  0x89   :  { %1089 = vmatpush.bf16.msrb.mxu2 %v2799_v32  ;;  %v3806_v31 = vld [vmem:[#allocation9 + $0xd0] sm:$0xff]  ;;  %v3780_v32 = vld [vmem:[#allocation9] sm:$0xff] }
  0x8a   :  { %1103 = vmatpush.bf16.msrb.mxu3 %v2803_v36  ;;  %v3797_v36 = vld [vmem:[#allocation9 + $0x88] sm:$0xff] }
  0x8c   :  { %1062 = vmatpush.bf16.msrb.mxu0 %v2727_v42  ;;  %1076 = vmatpush.bf16.msrb.mxu1 %v2731_v43  ;;  %v4120_v42 = vld [vmem:[#allocation8] sm:$0xff] }
  0x8d   :  { %1090 = vmatpush.bf16.msrb.mxu2 %v2735_v44  ;;  %v217_v43 = vperm.slane %v4120_v42, 0  ;;  %v218_v44 = vperm.slane %v4120_v42, 1  ;;  %v219_v54 = vperm.slane %v4120_v42, 2  ;;  %v220_v58 = vperm.slane %v4120_v42, 3 }
  0x8e   :  { %1104 = vmatpush.bf16.msrb.mxu3 %v2739_v48  ;;  %v3817_v48 = vld [vmem:[#allocation9 + $0x128] sm:$0xff] }
  0x90   :  { %1063 = vmatpush.bf16.msrb.mxu0 %v2663_v55  ;;  %1077 = vmatpush.bf16.msrb.mxu1 %v2667_v56  ;;  %v3834_v55 = vld [vmem:[#allocation9 + $0x1b0] sm:$0xff] }
  0x91   :  { %1091 = vmatpush.bf16.msrb.mxu2 %v2671_v57  ;;  %v3842_v56 = vld [vmem:[#allocation9 + $0x1f0] sm:$0xff] }
  0x92   :  { %1105 = vmatpush.bf16.msrb.mxu3 %v2675_v61  ;;  %v3824_v61 = vld [vmem:[#allocation9 + $0x160] sm:$0xff] }
  0x94   :  { %1064 = vmatpush.bf16.msrb.mxu0 %v2599_v3  ;;  %1078 = vmatpush.bf16.msrb.mxu1 %v2603_v4  ;;  %v3841_v3 = vld [vmem:[#allocation9 + $0x1e8] sm:$0xff] }
  0x95   :  { %1092 = vmatpush.bf16.msrb.mxu2 %v2607_v5 }
  0x96   :  { %1106 = vmatpush.bf16.msrb.mxu3 %v2611_v6 }
  0x97   :  { %1065 = vmatmul.bf16.vlgmr.msrb.gmra.mxu0 %v4102_v52  ;;  %1079 = vmatmul.bf16.vlgmr.msrb.gmra.mxu1 %v4102_v52 }
  0x98   :  { %2301 = vmatpush.bf16.msra.mxu0 %v3787_v7  ;;  %2315 = vmatpush.bf16.msra.mxu1 %v3795_v8  ;;  %v3815_v7 = vld [vmem:[#allocation9 + $0x118] sm:$0xff] }
  0x99   :  { %1093 = vmatmul.bf16.vlgmr.msrb.gmra.mxu2 %v4102_v52  ;;  %1107 = vmatmul.bf16.vlgmr.msrb.gmra.mxu3 %v4102_v52  ;;  %v3783_v52 = vld [vmem:[#allocation9 + $0x18] sm:$0xff] }
  0x9a   :  { %2329 = vmatpush.bf16.msra.mxu2 %v3803_v9  ;;  %2343 = vmatpush.bf16.msra.mxu3 %v3811_v11  ;;  %v3823_v8 = vld [vmem:[#allocation9 + $0x158] sm:$0xff] }
  0x9c   :  { %2302 = vmatpush.bf16.msra.mxu0 %v3786_v10  ;;  %2316 = vmatpush.bf16.msra.mxu1 %v3794_v12 }
  0x9e   :  { %2330 = vmatpush.bf16.msra.mxu2 %v3802_v13  ;;  %2344 = vmatpush.bf16.msra.mxu3 %v3810_v15  ;;  %v3832_v13 = vld [vmem:[#allocation9 + $0x1a0] sm:$0xff] }
  0xa0   :  { %2303 = vmatpush.bf16.msra.mxu0 %v3785_v14  ;;  %2317 = vmatpush.bf16.msra.mxu1 %v3793_v16  ;;  %v3840_v14 = vld [vmem:[#allocation9 + $0x1e0] sm:$0xff] }
  0xa2   :  { %2331 = vmatpush.bf16.msra.mxu2 %v3801_v17  ;;  %2345 = vmatpush.bf16.msra.mxu3 %v3809_v19  ;;  %v3822_v19 = vld [vmem:[#allocation9 + $0x150] sm:$0xff] }
  0xa4   :  { %2304 = vmatpush.bf16.msra.mxu0 %v3784_v18  ;;  %2318 = vmatpush.bf16.msra.mxu1 %v3792_v20  ;;  %v3814_v18 = vld [vmem:[#allocation9 + $0x110] sm:$0xff] }
  0xa6   :  { %2332 = vmatpush.bf16.msra.mxu2 %v3800_v21  ;;  %2346 = vmatpush.bf16.msra.mxu3 %v3808_v22 }
  0xa8   :  { %2305 = vmatpush.bf16.msra.mxu0 %v3783_v52  ;;  %2319 = vmatpush.bf16.msra.mxu1 %v3791_v23  ;;  %v3831_v23 = vld [vmem:[#allocation9 + $0x198] sm:$0xff] }
  0xaa   :  { %2333 = vmatpush.bf16.msra.mxu2 %v3799_v26  ;;  %2347 = vmatpush.bf16.msra.mxu3 %v3807_v27  ;;  %v3813_v27 = vld [vmem:[#allocation9 + $0x108] sm:$0xff] }
  0xac   :  { %2306 = vmatpush.bf16.msra.mxu0 %v3782_v24  ;;  %2320 = vmatpush.bf16.msra.mxu1 %v3790_v25  ;;  %v3839_v24 = vld [vmem:[#allocation9 + $0x1d8] sm:$0xff] }
  0xae   :  { %2334 = vmatpush.bf16.msra.mxu2 %v3798_v30  ;;  %2348 = vmatpush.bf16.msra.mxu3 %v3806_v31  ;;  %v3830_v30 = vld [vmem:[#allocation9 + $0x190] sm:$0xff] }
  0xaf   :  { %v3838_v31 = vld [vmem:[#allocation9 + $0x1d0] sm:$0xff] }
  0xb0   :  { %2307 = vmatpush.bf16.msra.mxu0 %v3781_v28  ;;  %2321 = vmatpush.bf16.msra.mxu1 %v3789_v29  ;;  %v3821_v28 = vld [vmem:[#allocation9 + $0x148] sm:$0xff] }
  0xb2   :  { %2335 = vmatpush.bf16.msra.mxu2 %v3797_v36  ;;  %2349 = vmatpush.bf16.msra.mxu3 %v3805_v37  ;;  %v3820_v36 = vld [vmem:[#allocation9 + $0x140] sm:$0xff]  ;;  %v3851_v37 = vld [vmem:[#allocation9 + $0x238] sm:$0xff] }
  0xb4   :  { %2308 = vmatpush.bf16.msra.mxu0 %v3780_v32  ;;  %2322 = vmatpush.bf16.msra.mxu1 %v3788_v33  ;;  %v898_v47 = vpop.f32.mrf.mxu0  ;;  %v912_v51 = vpop.f32.mrf.mxu1  ;;  %v3812_v33 = vld [vmem:[#allocation9 + $0x100] sm:$0xff] }
  0xb5   :  { %v899_v50 = vadd.f32 %v898_v47, %v217_v43  ;;  %v913_v53 = vadd.f32 %v912_v51, %v218_v44  ;;  %v3836_v47 = vld [vmem:[#allocation9 + $0x1c0] sm:$0xff]  ;;  %v222_v51 = vperm.slane %v4120_v42, 5 }
  0xb6   :  { %2336 = vmatpush.bf16.msra.mxu2 %v3796_v40  ;;  %2350 = vmatpush.bf16.msra.mxu3 %v3804_v41 }
  0xb7   :  { %v1113_v57 = vmax.f32 %v899_v50, 0.0  ;;  %v1114_v59 = vmax.f32 %v913_v53, 0.0  ;;  %v3850_v53 = vld [vmem:[#allocation9 + $0x230] sm:$0xff] }
  0xb8   :  { %2357 = vmatpush.bf16.msrb.mxu0 %v3819_v34  ;;  %2371 = vmatpush.bf16.msrb.mxu1 %v3827_v35 }
  0xb9   :  { %v1145_v63 = vpack.c.bf16 %v1114_v59, %v1113_v57 }
  0xba   :  { %2385 = vmatpush.bf16.msrb.mxu2 %v3835_v45  ;;  %2399 = vmatpush.bf16.msrb.mxu3 %v3843_v46  ;;  %v3828_v46 = vld [vmem:[#allocation9 + $0x180] sm:$0xff] }
  0xbb   :  { %1161 = vst [vmem:[#allocation2] sm:$0xff] %v1145_v63 }
  0xbc   :  { %2358 = vmatpush.bf16.msrb.mxu0 %v3818_v38  ;;  %2372 = vmatpush.bf16.msrb.mxu1 %v3826_v39  ;;  %v940_v1 = vpop.f32.mrf.mxu3  ;;  %v900_v6 = vpop.f32.mrf.mxu0  ;;  %v3829_v38 = vld [vmem:[#allocation9 + $0x188] sm:$0xff] }
  0xbd   :  { %v926_v62 = vpop.f32.mrf.mxu2  ;;  %v941_v4 = vadd.f32 %v940_v1, %v220_v58  ;;  %v901_v10 = vadd.f32 %v900_v6, %v217_v43  ;;  %v914_v11 = vpop.f32.mrf.mxu1  ;;  %v3837_v39 = vld [vmem:[#allocation9 + $0x1c8] sm:$0xff]  ;;  %v3859_v43 = vld [vmem:[#allocation9 + $0x278] sm:$0xff]  ;;  %v3866_v6 = vld [vmem:[#allocation9 + $0x2b0] sm:$0xff] }
  0xbe   :  { %2386 = vmatpush.bf16.msrb.mxu2 %v3834_v55  ;;  %2400 = vmatpush.bf16.msrb.mxu3 %v3842_v56  ;;  %v927_v0 = vadd.f32 %v926_v62, %v219_v54  ;;  %v915_v12 = vadd.f32 %v914_v11, %v218_v44  ;;  %v3858_v56 = vld [vmem:[#allocation9 + $0x270] sm:$0xff]  ;;  %v3848_v11 = vld [vmem:[#allocation9 + $0x220] sm:$0xff] }
  0xbf   :  { %v1116_v9 = vmax.f32 %v941_v4, 0.0  ;;  %v1129_v16 = vmax.f32 %v901_v10, 0.0 }
  0xc0   :  { %2359 = vmatpush.bf16.msrb.mxu0 %v3817_v48  ;;  %2373 = vmatpush.bf16.msrb.mxu1 %v3825_v49  ;;  %v1115_v5 = vmax.f32 %v927_v0, 0.0  ;;  %v1130_v17 = vmax.f32 %v915_v12, 0.0  ;;  %v221_v48 = vperm.slane %v4120_v42, 4  ;;  %v3856_v12 = vld [vmem:[#allocation9 + $0x260] sm:$0xff] }
  0xc2   :  { %2387 = vmatpush.bf16.msrb.mxu2 %v3833_v2  ;;  %2401 = vmatpush.bf16.msrb.mxu3 %v3841_v3  ;;  %v1146_v15 = vpack.c.bf16 %v1116_v9, %v1115_v5  ;;  %v1153_v21 = vpack.c.bf16 %v1130_v17, %v1129_v16  ;;  %v3062_v34 = vld [vmem:[#allocation2] sm:$0xf]  ;;  %v3764_v35 = vld [vmem:[#allocation2 + $0x4] sm:$0xf]  ;;  %v3849_v2 = vld [vmem:[#allocation9 + $0x228] sm:$0xff]  ;;  %v223_v5 = vperm.slane %v4120_v42, 6 }
  0xc3   :  { %v3857_v3 = vld [vmem:[#allocation9 + $0x268] sm:$0xff] }
  0xc4   :  { %2360 = vmatpush.bf16.msrb.mxu0 %v3816_v60  ;;  %2374 = vmatpush.bf16.msrb.mxu1 %v3824_v61  ;;  %1162 = vst [vmem:[#allocation2 + $0x8] sm:$0xff] %v1146_v15  ;;  %v942_v22 = vpop.f32.mrf.mxu3  ;;  %v3867_v60 = vld [vmem:[#allocation9 + $0x2b8] sm:$0xff]  ;;  %v3865_v16 = vld [vmem:[#allocation9 + $0x2a8] sm:$0xff] }
  0xc5   :  { %v928_v20 = vpop.f32.mrf.mxu2  ;;  %v943_v25 = vadd.f32 %v942_v22, %v220_v58  ;;  %1169 = vst [vmem:[#allocation2 + $0x40] sm:$0xff] %v1153_v21  ;;  %v3875_v61 = vld [vmem:[#allocation9 + $0x2f8] sm:$0xff]  ;;  %v3873_v17 = vld [vmem:[#allocation9 + $0x2e8] sm:$0xff] }
  0xc6   :  { %2388 = vmatpush.bf16.msrb.mxu2 %v3832_v13  ;;  %2402 = vmatpush.bf16.msrb.mxu3 %v3840_v14  ;;  %v929_v52 = vadd.f32 %v928_v20, %v219_v54 }
  0xc7   :  { %v1132_v29 = vmax.f32 %v943_v25, 0.0 }
  0xc8   :  { %2361 = vmatpush.bf16.msrb.mxu0 %v3815_v7  ;;  %2375 = vmatpush.bf16.msrb.mxu1 %v3823_v8  ;;  %v1131_v26 = vmax.f32 %v929_v52, 0.0  ;;  %v3874_v7 = vld [vmem:[#allocation9 + $0x2f0] sm:$0xff]  ;;  %v224_v8 = vperm.slane %v4120_v42, 7 }
  0xca   :  { %2389 = vmatpush.bf16.msrb.mxu2 %v3831_v23  ;;  %2403 = vmatpush.bf16.msrb.mxu3 %v3839_v24  ;;  %v1154_v32 = vpack.c.bf16 %v1132_v29, %v1131_v26  ;;  %v3847_v23 = vld [vmem:[#allocation9 + $0x218] sm:$0xff]  ;;  %v3864_v26 = vld [vmem:[#allocation9 + $0x2a0] sm:$0xff] }
  0xcb   :  { %v3070_v49 = vld [vmem:[#allocation2 + $0x8] sm:$0xf]  ;;  %v3765_v50 = vld [vmem:[#allocation2 + $0xc] sm:$0xf]  ;;  %v3855_v24 = vld [vmem:[#allocation9 + $0x258] sm:$0xff] }
  0xcc   :  { %2362 = vmatpush.bf16.msrb.mxu0 %v3814_v18  ;;  %2376 = vmatpush.bf16.msrb.mxu1 %v3822_v19  ;;  %1170 = vst [vmem:[#allocation2 + $0x48] sm:$0xff] %v1154_v32  ;;  %v3772_v40 = vld [vmem:[#allocation2 + $0x3c] sm:$0xf0]  ;;  %v3064_v41 = vld [vmem:[#allocation2 + $0x40] sm:$0xf0]  ;;  %v3854_v32 = vld [vmem:[#allocation9 + $0x250] sm:$0xff] }
  0xcd   :  { %v3063_v44 = vor.u32 %v3772_v40, %v3062_v34  ;;  %v3067_v45 = vor.u32 %v3764_v35, %v3064_v41  ;;  %v3863_v35 = vld [vmem:[#allocation9 + $0x298] sm:$0xff]  ;;  %v3845_v40 = vld [vmem:[#allocation9 + $0x208] sm:$0xff] }
  0xce   :  { %2390 = vmatpush.bf16.msrb.mxu2 %v3830_v30  ;;  %2404 = vmatpush.bf16.msrb.mxu3 %v3838_v31  ;;  %v3846_v31 = vld [vmem:[#allocation9 + $0x210] sm:$0xff]  ;;  %v3853_v41 = vld [vmem:[#allocation9 + $0x248] sm:$0xff] }
  0xcf   :  { %2309 = vmatmul.bf16.vlgmr.msra.gmra.mxu0 %v3063_v44  ;;  %2323 = vmatmul.bf16.vlgmr.msra.gmra.mxu1 %v3067_v45  ;;  %v3870_v44 = vld [vmem:[#allocation9 + $0x2d0] sm:$0xff] }
  0xd0   :  { %2363 = vmatpush.bf16.msrb.mxu0 %v3813_v27  ;;  %2377 = vmatpush.bf16.msrb.mxu1 %v3821_v28  ;;  %v3872_v27 = vld [vmem:[#allocation9 + $0x2e0] sm:$0xff] }
  0xd2   :  { %2391 = vmatpush.bf16.msrb.mxu2 %v3829_v38  ;;  %2405 = vmatpush.bf16.msrb.mxu3 %v3837_v39 }
  0xd3   :  { %v3773_v54 = vld [vmem:[#allocation2 + $0x44] sm:$0xf0]  ;;  %v3072_v55 = vld [vmem:[#allocation2 + $0x48] sm:$0xf0] }
  0xd4   :  { %2364 = vmatpush.bf16.msrb.mxu0 %v3812_v33  ;;  %2378 = vmatpush.bf16.msrb.mxu1 %v3820_v36  ;;  %v954_v57 = vpop.f32.mrf.mxu0  ;;  %v3071_v58 = vor.u32 %v3773_v54, %v3070_v49  ;;  %v3075_v59 = vor.u32 %v3765_v50, %v3072_v55  ;;  %v968_v63 = vpop.f32.mrf.mxu1  ;;  %v3871_v36 = vld [vmem:[#allocation9 + $0x2d8] sm:$0xff] }
  0xd5   :  { %v955_v62 = vadd.f32 %v954_v57, %v221_v48  ;;  %v969_v0 = vadd.f32 %v968_v63, %v222_v51  ;;  %v4130_v55 = vld [vmem:[#allocation8 + $0x8] sm:$0xff] }
  0xd6   :  { %2392 = vmatpush.bf16.msrb.mxu2 %v3828_v46  ;;  %2406 = vmatpush.bf16.msrb.mxu3 %v3836_v47  ;;  %v3891_v57 = vld [vmem:[#allocation9 + $0x378] sm:$0xff] }
  0xd7   :  { %2337 = vmatmul.bf16.vlgmr.msra.gmra.mxu2 %v3071_v58  ;;  %2351 = vmatmul.bf16.vlgmr.msra.gmra.mxu3 %v3075_v59  ;;  %v1117_v1 = vmax.f32 %v955_v62, 0.0  ;;  %v1118_v4 = vmax.f32 %v969_v0, 0.0  ;;  %v3861_v58 = vld [vmem:[#allocation9 + $0x288] sm:$0xff]  ;;  %v226_v62 = vperm.slane %v4130_v55, 1  ;;  %v3882_v0 = vld [vmem:[#allocation9 + $0x330] sm:$0xff] }
  0xd8   :  { %2413 = vmatpush.bf16.msra.mxu0 %v3851_v37  ;;  %2427 = vmatpush.bf16.msra.mxu1 %v3859_v43  ;;  %v3862_v43 = vld [vmem:[#allocation9 + $0x290] sm:$0xff]  ;;  %v3869_v59 = vld [vmem:[#allocation9 + $0x2c8] sm:$0xff] }
  0xd9   :  { %v1147_v9 = vpack.c.bf16 %v1118_v4, %v1117_v1  ;;  %v3890_v1 = vld [vmem:[#allocation9 + $0x370] sm:$0xff] }
  0xda   :  { %2441 = vmatpush.bf16.msra.mxu2 %v3867_v60  ;;  %2455 = vmatpush.bf16.msra.mxu3 %v3875_v61  ;;  %v225_v60 = vperm.slane %v4130_v55, 0 }
  0xdb   :  { %1163 = vst [vmem:[#allocation2 + $0x10] sm:$0xff] %v1147_v9 }
  0xdc   :  { %2414 = vmatpush.bf16.msra.mxu0 %v3850_v53  ;;  %2428 = vmatpush.bf16.msra.mxu1 %v3858_v56  ;;  %v996_v14 = vpop.f32.mrf.mxu3  ;;  %v956_v15 = vpop.f32.mrf.mxu0  ;;  %v3883_v56 = vld [vmem:[#allocation9 + $0x338] sm:$0xff] }
  0xdd   :  { %v982_v10 = vpop.f32.mrf.mxu2  ;;  %v997_v18 = vadd.f32 %v996_v14, %v224_v8  ;;  %v957_v19 = vadd.f32 %v956_v15, %v221_v48  ;;  %v970_v20 = vpop.f32.mrf.mxu1  ;;  %v3844_v48 = vld [vmem:[#allocation9 + $0x200] sm:$0xff]  ;;  %v3881_v14 = vld [vmem:[#allocation9 + $0x328] sm:$0xff] }
  0xde   :  { %v983_v13 = vadd.f32 %v982_v10, %v223_v5  ;;  %2442 = vmatpush.bf16.msra.mxu2 %v3866_v6  ;;  %2456 = vmatpush.bf16.msra.mxu3 %v3874_v7  ;;  %v971_v52 = vadd.f32 %v970_v20, %v222_v51  ;;  %v3852_v51 = vld [vmem:[#allocation9 + $0x240] sm:$0xff]  ;;  %v3889_v15 = vld [vmem:[#allocation9 + $0x368] sm:$0xff]  ;;  %v3898_v20 = vld [vmem:[#allocation9 + $0x3b0] sm:$0xff] }
  0xdf   :  { %v1120_v42 = vmax.f32 %v997_v18, 0.0  ;;  %v1133_v22 = vmax.f32 %v957_v19, 0.0  ;;  %v3868_v6 = vld [vmem:[#allocation9 + $0x2c0] sm:$0xff]  ;;  %v227_v18 = vperm.slane %v4130_v55, 2  ;;  %v228_v19 = vperm.slane %v4130_v55, 3 }
  0xe0   :  { %2415 = vmatpush.bf16.msra.mxu0 %v3849_v2  ;;  %2429 = vmatpush.bf16.msra.mxu1 %v3857_v3  ;;  %v1119_v21 = vmax.f32 %v983_v13, 0.0  ;;  %v1134_v25 = vmax.f32 %v971_v52, 0.0  ;;  %v3860_v2 = vld [vmem:[#allocation9 + $0x280] sm:$0xff] }
  0xe2   :  { %2443 = vmatpush.bf16.msra.mxu2 %v3865_v16  ;;  %2457 = vmatpush.bf16.msra.mxu3 %v3873_v17  ;;  %v1148_v28 = vpack.c.bf16 %v1120_v42, %v1119_v21  ;;  %v1155_v29 = vpack.c.bf16 %v1134_v25, %v1133_v22  ;;  %v3078_v46 = vld [vmem:[#allocation2 + $0x10] sm:$0xf]  ;;  %v3766_v47 = vld [vmem:[#allocation2 + $0x14] sm:$0xf]  ;;  %v3880_v42 = vld [vmem:[#allocation9 + $0x320] sm:$0xff] }
  0xe3   :  { %v3906_v21 = vld [vmem:[#allocation9 + $0x3f0] sm:$0xff]  ;;  %v3888_v22 = vld [vmem:[#allocation9 + $0x360] sm:$0xff] }
  0xe4   :  { %2416 = vmatpush.bf16.msra.mxu0 %v3848_v11  ;;  %2430 = vmatpush.bf16.msra.mxu1 %v3856_v12  ;;  %1164 = vst [vmem:[#allocation2 + $0x18] sm:$0xff] %v1148_v28  ;;  %v998_v34 = vpop.f32.mrf.mxu3  ;;  %v3899_v11 = vld [vmem:[#allocation9 + $0x3b8] sm:$0xff] }
  0xe5   :  { %v984_v30 = vpop.f32.mrf.mxu2  ;;  %1171 = vst [vmem:[#allocation2 + $0x50] sm:$0xff] %v1155_v29  ;;  %v999_v37 = vadd.f32 %v998_v34, %v224_v8  ;;  %v3907_v12 = vld [vmem:[#allocation9 + $0x3f8] sm:$0xff] }
  0xe6   :  { %v985_v33 = vadd.f32 %v984_v30, %v223_v5  ;;  %2444 = vmatpush.bf16.msra.mxu2 %v3864_v26  ;;  %2458 = vmatpush.bf16.msra.mxu3 %v3872_v27  ;;  %v3897_v30 = vld [vmem:[#allocation9 + $0x3a8] sm:$0xff]  ;;  %v3879_v34 = vld [vmem:[#allocation9 + $0x318] sm:$0xff] }
  0xe7   :  { %v1136_v39 = vmax.f32 %v999_v37, 0.0 }
  0xe8   :  { %2417 = vmatpush.bf16.msra.mxu0 %v3847_v23  ;;  %2431 = vmatpush.bf16.msra.mxu1 %v3855_v24  ;;  %v1135_v38 = vmax.f32 %v985_v33, 0.0 }
  0xea   :  { %2445 = vmatpush.bf16.msra.mxu2 %v3863_v35  ;;  %2459 = vmatpush.bf16.msra.mxu3 %v3871_v36  ;;  %v1156_v45 = vpack.c.bf16 %v1136_v39, %v1135_v38  ;;  %v3887_v35 = vld [vmem:[#allocation9 + $0x358] sm:$0xff] }
  0xeb   :  { %v3086_v61 = vld [vmem:[#allocation2 + $0x18] sm:$0xf]  ;;  %v3767_v63 = vld [vmem:[#allocation2 + $0x1c] sm:$0xf] }
  0xec   :  { %2418 = vmatpush.bf16.msra.mxu0 %v3846_v31  ;;  %2432 = vmatpush.bf16.msra.mxu1 %v3854_v32  ;;  %1172 = vst [vmem:[#allocation2 + $0x58] sm:$0xff] %v1156_v45  ;;  %v3774_v49 = vld [vmem:[#allocation2 + $0x4c] sm:$0xf0]  ;;  %v3080_v50 = vld [vmem:[#allocation2 + $0x50] sm:$0xf0]  ;;  %v3905_v31 = vld [vmem:[#allocation9 + $0x3e8] sm:$0xff] }
  0xed   :  { %v3079_v53 = vor.u32 %v3774_v49, %v3078_v46  ;;  %v3083_v54 = vor.u32 %v3766_v47, %v3080_v50  ;;  %v3886_v45 = vld [vmem:[#allocation9 + $0x350] sm:$0xff]  ;;  %v3895_v50 = vld [vmem:[#allocation9 + $0x398] sm:$0xff] }
  0xee   :  { %2446 = vmatpush.bf16.msra.mxu2 %v3862_v43  ;;  %2460 = vmatpush.bf16.msra.mxu3 %v3870_v44  ;;  %v3878_v44 = vld [vmem:[#allocation9 + $0x310] sm:$0xff] }
  0xef   :  { %2365 = vmatmul.bf16.vlgmr.msrb.gmra.mxu0 %v3079_v53  ;;  %2379 = vmatmul.bf16.vlgmr.msrb.gmra.mxu1 %v3083_v54  ;;  %v3877_v54 = vld [vmem:[#allocation9 + $0x308] sm:$0xff] }
  0xf0   :  { %2419 = vmatpush.bf16.msra.mxu0 %v3845_v40  ;;  %2433 = vmatpush.bf16.msra.mxu1 %v3853_v41  ;;  %v3896_v40 = vld [vmem:[#allocation9 + $0x3a0] sm:$0xff] }
  0xf1   :  { %v3904_v41 = vld [vmem:[#allocation9 + $0x3e0] sm:$0xff] }
  0xf2   :  { %2447 = vmatpush.bf16.msra.mxu2 %v3861_v58  ;;  %2461 = vmatpush.bf16.msra.mxu3 %v3869_v59 }
  0xf3   :  { %v3775_v4 = vld [vmem:[#allocation2 + $0x54] sm:$0xf0]  ;;  %v3088_v5 = vld [vmem:[#allocation2 + $0x58] sm:$0xf0] }
  0xf4   :  { %2420 = vmatpush.bf16.msra.mxu0 %v3844_v48  ;;  %2434 = vmatpush.bf16.msra.mxu1 %v3852_v51  ;;  %v1010_v3 = vpop.f32.mrf.mxu0  ;;  %v1024_v8 = vpop.f32.mrf.mxu1  ;;  %v3087_v9 = vor.u32 %v3775_v4, %v3086_v61  ;;  %v3091_v10 = vor.u32 %v3767_v63, %v3088_v5  ;;  %v3903_v51 = vld [vmem:[#allocation9 + $0x3d8] sm:$0xff]  ;;  %v3894_v61 = vld [vmem:[#allocation9 + $0x390] sm:$0xff]  ;;  %v3876_v63 = vld [vmem:[#allocation9 + $0x300] sm:$0xff] }
  0xf5   :  { %v1011_v7 = vadd.f32 %v1010_v3, %v225_v60  ;;  %v1025_v13 = vadd.f32 %v1024_v8, %v226_v62  ;;  %v3893_v5 = vld [vmem:[#allocation9 + $0x388] sm:$0xff]  ;;  %v230_v8 = vperm.slane %v4130_v55, 5 }
  0xf6   :  { %2393 = vmatmul.bf16.vlgmr.msrb.gmra.mxu2 %v3087_v9  ;;  %2407 = vmatmul.bf16.vlgmr.msrb.gmra.mxu3 %v3091_v10 }
  0xf7   :  { %v1121_v16 = vmax.f32 %v1011_v7, 0.0  ;;  %v1122_v17 = vmax.f32 %v1025_v13, 0.0  ;;  %2448 = vmatpush.bf16.msra.mxu2 %v3860_v2  ;;  %2462 = vmatpush.bf16.msra.mxu3 %v3868_v6  ;;  %v3884_v2 = vld [vmem:[#allocation9 + $0x340] sm:$0xff]  ;;  %v3901_v6 = vld [vmem:[#allocation9 + $0x3c8] sm:$0xff]  ;;  %v229_v7 = vperm.slane %v4130_v55, 4 }
  0xf8   :  { %2469 = vmatpush.bf16.msrb.mxu0 %v3883_v56  ;;  %2483 = vmatpush.bf16.msrb.mxu1 %v3891_v57  ;;  %v3885_v56 = vld [vmem:[#allocation9 + $0x348] sm:$0xff] }
  0xf9   :  { %v1149_v52 = vpack.c.bf16 %v1122_v17, %v1121_v16  ;;  %v3900_v17 = vld [vmem:[#allocation9 + $0x3c0] sm:$0xff] }
  0xfb   :  { %2497 = vmatpush.bf16.msrb.mxu2 %v3899_v11  ;;  %2511 = vmatpush.bf16.msrb.mxu3 %v3907_v12  ;;  %1165 = vst [vmem:[#allocation2 + $0x20] sm:$0xff] %v1149_v52  ;;  %v3892_v12 = vld [vmem:[#allocation9 + $0x380] sm:$0xff] }
  0xfc   :  { %2470 = vmatpush.bf16.msrb.mxu0 %v3882_v0  ;;  %2484 = vmatpush.bf16.msrb.mxu1 %v3890_v1  ;;  %v1052_v25 = vpop.f32.mrf.mxu3  ;;  %v1012_v26 = vpop.f32.mrf.mxu0 }
  0xfd   :  { %v1038_v23 = vpop.f32.mrf.mxu2  ;;  %v1053_v27 = vadd.f32 %v1052_v25, %v228_v19  ;;  %v1013_v28 = vadd.f32 %v1012_v26, %v225_v60  ;;  %v1026_v29 = vpop.f32.mrf.mxu1 }
  0xfe   :  { %v1039_v24 = vadd.f32 %v1038_v23, %v227_v18  ;;  %v1027_v33 = vadd.f32 %v1026_v29, %v226_v62  ;;  %v3902_v62 = vld [vmem:[#allocation9 + $0x3d0] sm:$0xff] }
  0xff   :  { %2498 = vmatpush.bf16.msrb.mxu2 %v3898_v20  ;;  %2512 = vmatpush.bf16.msrb.mxu3 %v3906_v21  ;;  %v1124_v36 = vmax.f32 %v1053_v27, 0.0  ;;  %v1137_v37 = vmax.f32 %v1013_v28, 0.0 }
 0x100   :  { %2471 = vmatpush.bf16.msrb.mxu0 %v3881_v14  ;;  %2485 = vmatpush.bf16.msrb.mxu1 %v3889_v15  ;;  %v1123_v32 = vmax.f32 %v1039_v24, 0.0  ;;  %v1138_v38 = vmax.f32 %v1027_v33, 0.0 }
 0x102   :  { %v1150_v39 = vpack.c.bf16 %v1124_v36, %v1123_v32  ;;  %v1157_v43 = vpack.c.bf16 %v1138_v38, %v1137_v37  ;;  %v3094_v58 = vld [vmem:[#allocation2 + $0x20] sm:$0xf]  ;;  %v3768_v60 = vld [vmem:[#allocation2 + $0x24] sm:$0xf] }
 0x103   :  { %2499 = vmatpush.bf16.msrb.mxu2 %v3897_v30  ;;  %2513 = vmatpush.bf16.msrb.mxu3 %v3905_v31 }
 0x104   :  { %2472 = vmatpush.bf16.msrb.mxu0 %v3880_v42  ;;  %2486 = vmatpush.bf16.msrb.mxu1 %v3888_v22  ;;  %1166 = vst [vmem:[#allocation2 + $0x28] sm:$0xff] %v1150_v39  ;;  %v1054_v48 = vpop.f32.mrf.mxu3  ;;  %v231_v42 = vperm.slane %v4130_v55, 6  ;;  %v232_v22 = vperm.slane %v4130_v55, 7 }
 0x105   :  { %v1040_v46 = vpop.f32.mrf.mxu2  ;;  %1173 = vst [vmem:[#allocation2 + $0x60] sm:$0xff] %v1157_v43  ;;  %v1055_v49 = vadd.f32 %v1054_v48, %v228_v19 }
 0x106   :  { %v1041_v47 = vadd.f32 %v1040_v46, %v227_v18 }
 0x107   :  { %2500 = vmatpush.bf16.msrb.mxu2 %v3896_v40  ;;  %2514 = vmatpush.bf16.msrb.mxu3 %v3904_v41  ;;  %v1140_v57 = vmax.f32 %v1055_v49, 0.0 }
 0x108   :  { %2473 = vmatpush.bf16.msrb.mxu0 %v3879_v34  ;;  %2487 = vmatpush.bf16.msrb.mxu1 %v3887_v35  ;;  %v1139_v53 = vmax.f32 %v1041_v47, 0.0 }
 0x10a   :  { %v1158_v59 = vpack.c.bf16 %v1140_v57, %v1139_v53 }
 0x10b   :  { %2501 = vmatpush.bf16.msrb.mxu2 %v3895_v50  ;;  %2515 = vmatpush.bf16.msrb.mxu3 %v3903_v51  ;;  %v3102_v9 = vld [vmem:[#allocation2 + $0x28] sm:$0xf]  ;;  %v3769_v10 = vld [vmem:[#allocation2 + $0x2c] sm:$0xf] }
 0x10c   :  { %2474 = vmatpush.bf16.msrb.mxu0 %v3878_v44  ;;  %2488 = vmatpush.bf16.msrb.mxu1 %v3886_v45  ;;  %1174 = vst [vmem:[#allocation2 + $0x68] sm:$0xff] %v1158_v59  ;;  %v3776_v0 = vld [vmem:[#allocation2 + $0x5c] sm:$0xf0]  ;;  %v3096_v1 = vld [vmem:[#allocation2 + $0x60] sm:$0xf0] }
 0x10d   :  { %v3095_v3 = vor.u32 %v3776_v0, %v3094_v58  ;;  %v3099_v4 = vor.u32 %v3768_v60, %v3096_v1  ;;  %v3918_v1 = vld [vmem:[%s4153_s4] ss:$0 sm:$0xff]  ;;  %s4056_s4 = smov [#allocation11]  }
 0x10e   :  { %s2531_s16 = sshll.u32 %s4056_s4, 4  ;;  %s2532_s16 = int_to_ptr.vmem [resolvable:$true] %s2531_s16 }
 0x10f   :  { %2502 = vmatpush.bf16.msrb.mxu2 %v3894_v61  ;;  %2516 = vmatpush.bf16.msrb.mxu3 %v3902_v62 }
 0x110   :  { %2475 = vmatpush.bf16.msrb.mxu0 %v3877_v54  ;;  %2489 = vmatpush.bf16.msrb.mxu1 %v3885_v56 }
 0x111   :  { %2421 = vmatmul.bf16.vlgmr.msra.gmra.mxu0 %v3095_v3  ;;  %2435 = vmatmul.bf16.vlgmr.msra.gmra.mxu1 %v3099_v4 }
 0x113   :  { %2503 = vmatpush.bf16.msrb.mxu2 %v3893_v5  ;;  %2517 = vmatpush.bf16.msrb.mxu3 %v3901_v6  ;;  %v3777_v15 = vld [vmem:[#allocation2 + $0x64] sm:$0xf0]  ;;  %v3104_v16 = vld [vmem:[#allocation2 + $0x68] sm:$0xf0] }
 0x114   :  { %2476 = vmatpush.bf16.msrb.mxu0 %v3876_v63  ;;  %2490 = vmatpush.bf16.msrb.mxu1 %v3884_v2  ;;  %v1066_v11 = vpop.f32.mrf.mxu0  ;;  %v1080_v14 = vpop.f32.mrf.mxu1  ;;  %v3103_v19 = vor.u32 %v3777_v15, %v3102_v9  ;;  %v3107_v20 = vor.u32 %v3769_v10, %v3104_v16 }
 0x115   :  { %v1067_v13 = vadd.f32 %v1066_v11, %v229_v7  ;;  %v1081_v18 = vadd.f32 %v1080_v14, %v230_v8 }
 0x116   :  { %2449 = vmatmul.bf16.vlgmr.msra.gmra.mxu2 %v3103_v19  ;;  %2463 = vmatmul.bf16.vlgmr.msra.gmra.mxu3 %v3107_v20 }
 0x117   :  { %v1125_v21 = vmax.f32 %v1067_v13, 0.0  ;;  %v1126_v52 = vmax.f32 %v1081_v18, 0.0  ;;  %2504 = vmatpush.bf16.msrb.mxu2 %v3892_v12  ;;  %2518 = vmatpush.bf16.msrb.mxu3 %v3900_v17 }
 0x119   :  { %v1151_v23 = vpack.c.bf16 %v1126_v52, %v1125_v21 }
 0x11b   :  { %1167 = vst [vmem:[#allocation2 + $0x30] sm:$0xff] %v1151_v23 }
 0x11c   :  { %v1094_v24 = vpop.f32.mrf.mxu2  ;;  %v1108_v26 = vpop.f32.mrf.mxu3 }
 0x11d   :  { %v1095_v25 = vadd.f32 %v1094_v24, %v231_v42  ;;  %v1068_v27 = vpop.f32.mrf.mxu0  ;;  %v1109_v28 = vadd.f32 %v1108_v26, %v232_v22  ;;  %v1082_v30 = vpop.f32.mrf.mxu1 }
 0x11e   :  { %v1069_v29 = vadd.f32 %v1068_v27, %v229_v7  ;;  %v1083_v32 = vadd.f32 %v1082_v30, %v230_v8 }
 0x11f   :  { %v1127_v31 = vmax.f32 %v1095_v25, 0.0  ;;  %v1128_v33 = vmax.f32 %v1109_v28, 0.0 }
 0x120   :  { %v1141_v34 = vmax.f32 %v1069_v29, 0.0  ;;  %v1142_v35 = vmax.f32 %v1083_v32, 0.0 }
 0x121   :  { %v1152_v36 = vpack.c.bf16 %v1128_v33, %v1127_v31 }
 0x122   :  { %v1159_v37 = vpack.c.bf16 %v1142_v35, %v1141_v34  ;;  %v3110_v45 = vld [vmem:[#allocation2 + $0x30] sm:$0xf]  ;;  %v3770_v46 = vld [vmem:[#allocation2 + $0x34] sm:$0xf] }
 0x123   :  { %1168 = vst [vmem:[#allocation2 + $0x38] sm:$0xff] %v1152_v36 }
 0x124   :  { %v1096_v55 = vpop.f32.mrf.mxu2  ;;  %1175 = vst [vmem:[#allocation2 + $0x70] sm:$0xff] %v1159_v37  ;;  %v1110_v39 = vpop.f32.mrf.mxu3 }
 0x125   :  { %v1097_v38 = vadd.f32 %v1096_v55, %v231_v42  ;;  %v1111_v40 = vadd.f32 %v1110_v39, %v232_v22 }
 0x127   :  { %v1143_v41 = vmax.f32 %v1097_v38, 0.0  ;;  %v1144_v43 = vmax.f32 %v1111_v40, 0.0 }
 0x129   :  { %v1160_v44 = vpack.c.bf16 %v1144_v43, %v1143_v41 }
 0x12a   :  { %v3118_v51 = vld [vmem:[#allocation2 + $0x38] sm:$0xf]  ;;  %v3771_v54 = vld [vmem:[#allocation2 + $0x3c] sm:$0xf] }
 0x12b   :  { %1176 = vst [vmem:[#allocation2 + $0x78] sm:$0xff] %v1160_v44  ;;  %v3778_v47 = vld [vmem:[#allocation2 + $0x6c] sm:$0xf0]  ;;  %v3112_v48 = vld [vmem:[#allocation2 + $0x70] sm:$0xf0] }
 0x12c   :  { %v3111_v49 = vor.u32 %v3778_v47, %v3110_v45  ;;  %v3115_v50 = vor.u32 %v3770_v46, %v3112_v48 }
 0x12e   :  { %2477 = vmatmul.bf16.vlgmr.msrb.gmra.mxu0 %v3111_v49  ;;  %2491 = vmatmul.bf16.vlgmr.msrb.gmra.mxu1 %v3115_v50 }
 0x132   :  { %v3779_v53 = vld [vmem:[#allocation2 + $0x74] sm:$0xf0]  ;;  %v3120_v56 = vld [vmem:[#allocation2 + $0x78] sm:$0xf0] }
 0x133   :  { %v3119_v57 = vor.u32 %v3779_v53, %v3118_v51  ;;  %v3123_v58 = vor.u32 %v3771_v54, %v3120_v56 }
 0x135   :  { %2505 = vmatmul.bf16.vlgmr.msrb.gmra.mxu2 %v3119_v57  ;;  %2519 = vmatmul.bf16.vlgmr.msrb.gmra.mxu3 %v3123_v58 }
 0x14c   :  { %v2310_v59 = vpop.f32.mrf.mxu0  ;;  %v2324_v60 = vpop.f32.mrf.mxu1 }
 0x14d   :  { %v2311_v3 = vadd.f32 %v3918_v1, %v2310_v59 }
 0x14f   :  { %v2325_v6 = vadd.f32 %v2324_v60, %v2311_v3 }
 0x154   :  { %v2312_v61 = vpop.f32.mrf.mxu0  ;;  %v2326_v0 = vpop.f32.mrf.mxu1 }
 0x155   :  { %v2313_v12 = vadd.f32 %v3918_v1, %v2312_v61 }
 0x157   :  { %v2327_v14 = vadd.f32 %v2326_v0, %v2313_v12 }
 0x15a   :  { %v2338_v62 = vpop.f32.mrf.mxu2  ;;  %v2352_v63 = vpop.f32.mrf.mxu3 }
 0x15b   :  { %v2339_v8 = vadd.f32 %v2338_v62, %v2325_v6 }
 0x15d   :  { %v2353_v13 = vadd.f32 %v2352_v63, %v2339_v8 }
 0x162   :  { %v2340_v4 = vpop.f32.mrf.mxu2  ;;  %v2354_v5 = vpop.f32.mrf.mxu3 }
 0x163   :  { %v2341_v18 = vadd.f32 %v2340_v4, %v2327_v14 }
 0x165   :  { %v2355_v52 = vadd.f32 %v2354_v5, %v2341_v18 }
 0x16c   :  { %v2366_v2 = vpop.f32.mrf.mxu0  ;;  %v2380_v7 = vpop.f32.mrf.mxu1 }
 0x16d   :  { %v2367_v16 = vadd.f32 %v2366_v2, %v2353_v13 }
 0x16f   :  { %v2381_v21 = vadd.f32 %v2380_v7, %v2367_v16 }
 0x174   :  { %v2368_v9 = vpop.f32.mrf.mxu0  ;;  %v2382_v15 = vpop.f32.mrf.mxu1 }
 0x175   :  { %v2369_v23 = vadd.f32 %v2368_v9, %v2355_v52 }
 0x177   :  { %v2383_v28 = vadd.f32 %v2382_v15, %v2369_v23 }
 0x179   :  { %v2394_v10 = vpop.f32.mrf.mxu2  ;;  %v2408_v11 = vpop.f32.mrf.mxu3 }
 0x17a   :  { %v2395_v42 = vadd.f32 %v2394_v10, %v2381_v21 }
 0x17c   :  { %v2409_v24 = vadd.f32 %v2408_v11, %v2395_v42 }
 0x181   :  { %v2396_v19 = vpop.f32.mrf.mxu2  ;;  %v2410_v20 = vpop.f32.mrf.mxu3 }
 0x182   :  { %v2397_v30 = vadd.f32 %v2396_v19, %v2383_v28 }
 0x184   :  { %v2411_v33 = vadd.f32 %v2410_v20, %v2397_v30 }
 0x18e   :  { %v2422_v17 = vpop.f32.mrf.mxu0  ;;  %v2436_v22 = vpop.f32.mrf.mxu1 }
 0x18f   :  { %v2423_v29 = vadd.f32 %v2422_v17, %v2409_v24 }
 0x191   :  { %v2437_v31 = vadd.f32 %v2436_v22, %v2423_v29 }
 0x196   :  { %v2424_v25 = vpop.f32.mrf.mxu0  ;;  %v2438_v32 = vpop.f32.mrf.mxu1 }
 0x197   :  { %v2425_v36 = vadd.f32 %v2424_v25, %v2411_v33 }
 0x199   :  { %v2450_v26 = vpop.f32.mrf.mxu2  ;;  %v2464_v27 = vpop.f32.mrf.mxu3  ;;  %v2439_v39 = vadd.f32 %v2438_v32, %v2425_v36 }
 0x19a   :  { %v2451_v34 = vadd.f32 %v2450_v26, %v2437_v31 }
 0x19c   :  { %v2465_v38 = vadd.f32 %v2464_v27, %v2451_v34 }
 0x1a1   :  { %v2452_v37 = vpop.f32.mrf.mxu2  ;;  %v2466_v55 = vpop.f32.mrf.mxu3 }
 0x1a2   :  { %v2453_v43 = vadd.f32 %v2452_v37, %v2439_v39 }
 0x1a4   :  { %v2467_v48 = vadd.f32 %v2466_v55, %v2453_v43 }
 0x1ab   :  { %v2478_v35 = vpop.f32.mrf.mxu0  ;;  %v2492_v41 = vpop.f32.mrf.mxu1 }
 0x1ac   :  { %v2479_v40 = vadd.f32 %v2478_v35, %v2465_v38 }
 0x1ae   :  { %v2493_v44 = vadd.f32 %v2492_v41, %v2479_v40 }
 0x1b3   :  { %v2480_v45 = vpop.f32.mrf.mxu0  ;;  %v2494_v53 = vpop.f32.mrf.mxu1 }
 0x1b4   :  { %v2481_v50 = vadd.f32 %v2480_v45, %v2467_v48 }
 0x1b6   :  { %v2495_v54 = vadd.f32 %v2494_v53, %v2481_v50 }
 0x1b8   :  { %v2506_v46 = vpop.f32.mrf.mxu2  ;;  %v2520_v47 = vpop.f32.mrf.mxu3 }
 0x1b9   :  { %v2507_v49 = vadd.f32 %v2506_v46, %v2493_v44 }
 0x1bb   :  { %v2521_v51 = vadd.f32 %v2520_v47, %v2507_v49 }
 0x1bd   :  { %2525 = vst [vmem:[#allocation11] sm:$0xff] %v2521_v51 }
 0x1c0   :  { %v2508_v56 = vpop.f32.mrf.mxu2  ;;  %v2522_v58 = vpop.f32.mrf.mxu3 }
 0x1c1   :  { %v2509_v57 = vadd.f32 %v2508_v56, %v2495_v54 }
 0x1c3   :  { %v2523_v59 = vadd.f32 %v2522_v58, %v2509_v57 }
 0x1c5   :  { %2526 = vst [vmem:[#allocation11 + $0x8] sm:$0xff] %v2523_v59 }
 0x1c6   :  { %2539 = dma.vmem_to_hbm [thread:$0]  %s2532_s16, 256, %s2534_s19, [#allocation5], %s4051_s30, %s4051_s30, %s4052_s6  }
 0x1c7   :  { %4045 = dma.done.wait [#allocation5], 256  }
 0x1c8   :  { %4046 = vsyncadd [#allocation5], 4294967040 }
 0x1c9   :  { %2544 = vsyncpa [#allocation4], 1 }
 0x1ca   :  { %2545 = vsyncpa [#allocation7], 1 }
 0x1cb   :  { %2546 = vsyncpa [#allocation10], 1 }
 0x1cc   :  { %2547 = vsyncpa [#allocation5], 1 }

</bundles_post_ra>
